<compile_context>
chip_gen: v7x
topology: tpu7x:2x2x1
jax: 0.10.0
libtpu: 0.0.40
codegen_flags: <defaults>
</compile_context>

<pallas_src>
import functools
import math

import numpy as np
import jax
import jax.numpy as jnp
from jax.experimental import pallas as pl
from jax.experimental.pallas import tpu as pltpu

_LOG2PI = float(np.log(2.0 * np.pi))
_LOG01 = float(np.log(0.1))


# ----------------------------------------------------------------------------
# Fused kernel: one grid step == one domain (0 = source, 1 = target).
# ----------------------------------------------------------------------------
def _dann_sem_kernel(
    # per-domain data
    x_ref, xcol_ref, adj_ref, adjinv_ref, gum_ref, nrm_ref,
    # shared data / constants
    mask_ref, srcy_ref, u_ref, ut_ref, v_ref,
    # per-domain inference params
    qyx_w1, qyx_b1, qyx_w2, qyx_b2, qyx_wl, qyx_bl,
    qz_w1x, qz_w1y, qz_b1, qz_w2, qz_b2, qz_wmu, qz_bmu, qz_wvar, qz_bvar,
    # per-domain generative params
    y1_w, y1_b, ymu_w2, ymu_b2, yvar_w2, yvar_b2,
    pxz_w1, pxz_b1, pxz_w2, pxz_b2, pxz_w3, pxz_b3,
    # shared predictor params
    p1_w, p1_b, p2_w, p2_b, p3_w, p3_b,
    # per-domain outputs
    mean_o, var_o, z_o, logits_o, prob_o, cat_o, muori_o,
    ymean_o, yvar_o, xrec_o, pred_o, lrec_o, lgauss_o, lcat_o, lpred_o,
    *, temperature):
  f32 = jnp.float32

  x = x_ref[0]            # (B, G)
  xcol = xcol_ref[0]      # (B*G, 1)
  adj = adj_ref[0]        # (G, G)   I - A^T
  adj_inv = adjinv_ref[0]
  gum = gum_ref[0]        # (B, Y)   gumbel noise
  noise = nrm_ref[0]      # (B, G)   reparam noise
  mask = mask_ref[...]    # (B, G)   dropout_mask for rec loss
  src_y = srcy_ref[...]   # (B, C)
  u = u_ref[...]          # (B*G, B) one-hot of batch index b(bg)
  ut = ut_ref[...]        # (B, B*G)
  v = v_ref[...]          # (B*G, G) one-hot of gene index g(bg)

  def mm(a, b):
    return jnp.dot(a, b, preferred_element_type=f32)

  def softmax_parts(t):
    m = jnp.max(t, axis=-1, keepdims=True)
    e = jnp.exp(t - m)
    s = jnp.sum(e, axis=-1, keepdims=True)
    return e * pl.reciprocal(s, approx=True), m, s

  def leaky(t):
    return jnp.where(t >= 0, t, 0.2 * t)

  def fullsum(t):  # lane reduce then sublane reduce -> (1, 1)
    return jnp.sum(jnp.sum(t, axis=-1, keepdims=True), axis=0, keepdims=True)

  # ---- q(y|x): Linear-tanh-Linear-tanh-Linear, softmax / gumbel-softmax ----
  h = jnp.tanh(mm(x, qyx_w1[0]) + qyx_b1[0])
  h = jnp.tanh(mm(h, qyx_w2[0]) + qyx_b2[0])
  logits = mm(h, qyx_wl[0]) + qyx_bl[0]                      # (B, Y)
  prob, lmax, lsum = softmax_parts(logits)
  y, _, _ = softmax_parts((logits + gum) * (1.0 / temperature))

  # ---- q(z|x,y): per-gene MLP via concat decomposition, (B*G, Z) layout ----
  ypart = mm(y, qz_w1y[0]) + qz_b1[0]                        # (B, Z)
  h1 = jnp.tanh(xcol * qz_w1x[0] + mm(u, ypart))             # (B*G, Z)
  h2 = jnp.tanh(mm(h1, qz_w2[0]) + qz_b2[0])                 # (B*G, Z)
  mu_col = jnp.sum(h2 * qz_wmu[0], axis=-1, keepdims=True) + qz_bmu[0]
  lv_col = jnp.sum(h2 * qz_wvar[0], axis=-1, keepdims=True) + qz_bvar[0]
  mu_ori = mm(ut, v * mu_col)                                # (B, G)
  logvar = mm(ut, v * lv_col)                                # (B, G)

  mu = mm(mu_ori, adj)                                       # mean
  var = jnp.exp(mm(logvar, adj))
  z = mu + noise * jnp.sqrt(var + 1e-10)                     # reparameterize

  # ---- p(z|y) prior heads (merged W1, block-padded W2) ----
  h12 = jnp.tanh(mm(y, y1_w[0]) + y1_b[0])                   # (B, 2Z)
  y_mu = mm(h12, ymu_w2[0]) + ymu_b2[0]                      # (B, G)
  y_lv = mm(h12, yvar_w2[0]) + yvar_b2[0]                    # (B, G)
  y_mean = mm(y_mu, adj_inv)
  y_var = jnp.exp(mm(y_lv, adj_inv))

  # ---- p(x|z): per-gene decoder on z, flat layout ----
  zcol = jnp.sum(mm(u, z) * v, axis=-1, keepdims=True)       # (B*G, 1)
  g1 = jnp.tanh(zcol * pxz_w1[0] + pxz_b1[0])                # (B*G, Z)
  g2 = jnp.tanh(mm(g1, pxz_w2[0]) + pxz_b2[0])               # (B*G, Z)
  xr_col = jnp.sum(g2 * pxz_w3[0], axis=-1, keepdims=True) + pxz_b3[0]
  x_rec = mm(ut, v * xr_col)                                 # (B, G)

  # ---- celltype predictor on z ----
  # TODO(synk): nn.Dropout(p=0.2) in MLPBlock omitted (eval-mode identity).
  p = leaky(mm(z, p1_w[...]) + p1_b[...])
  p = leaky(mm(p, p2_w[...]) + p2_b[...])
  pred, _, _ = softmax_parts(mm(p, p3_w[...]) + p3_b[...])   # (B, C)

  # ---- losses (per-domain scalars, written as (1,1) tiles) ----
  B = x.shape[0]
  sq = (x - x_rec) ** 2 * mask
  lrec = fullsum(sq) / fullsum(mask)

  def log_normal(val, m, s):
    s = s + 1e-8
    return -0.5 * jnp.mean(_LOG2PI + jnp.log(s) + (val - m) ** 2 / s,
                           axis=-1, keepdims=True)            # (B, 1)

  lgauss = jnp.sum(log_normal(z, mu, var) - log_normal(z, y_mean, y_var),
                   axis=0, keepdims=True) * (1.0 / B)

  lse = lmax + jnp.log(lsum)                                  # reuse softmax
  lcat = jnp.sum(jnp.sum(prob * (logits - lse), axis=-1, keepdims=True),
                 axis=0, keepdims=True) * (1.0 / B)

  lpred = fullsum(jnp.abs(pred - src_y)) * (1.0 / (B * pred.shape[-1]))

  # ---- writeback ----
  mean_o[0] = mu
  var_o[0] = var
  z_o[0] = z
  logits_o[0] = logits
  prob_o[0] = prob
  cat_o[0] = y
  muori_o[0] = mu_ori
  ymean_o[0] = y_mean
  yvar_o[0] = y_var
  xrec_o[0] = x_rec
  pred_o[0] = pred
  lrec_o[0] = lrec
  lgauss_o[0] = lgauss
  lcat_o[0] = lcat
  lpred_o[0] = lpred


# ----------------------------------------------------------------------------
# BlockSpec helpers / parameter packing
# ----------------------------------------------------------------------------
def _dom_spec(shape):
  n = len(shape)
  return pl.BlockSpec((1,) + tuple(shape[1:]),
                      lambda d, _n=n: (d,) + (0,) * (_n - 1))


def _shared_spec(shape):
  n = len(shape)
  return pl.BlockSpec(tuple(shape), lambda d, _n=n: (0,) * _n)


def _row(b):
  return b.reshape(1, -1)


def _pack_domain(inf, gen, z_dim, n_gene):
  """Per-domain parameter list in kernel-argument order."""
  zpad = jnp.zeros((z_dim, n_gene), jnp.float32)
  return [
      inf["qyx_w1"], _row(inf["qyx_b1"]),
      inf["qyx_w2"], _row(inf["qyx_b2"]),
      inf["qyx_wl"], _row(inf["qyx_bl"]),
      inf["qz_w1"][0:1, :], inf["qz_w1"][1:, :], _row(inf["qz_b1"]),
      inf["qz_w2"], _row(inf["qz_b2"]),
      inf["qz_wmu"].T, _row(inf["qz_bmu"]),
      inf["qz_wvar"].T, _row(inf["qz_bvar"]),
      jnp.concatenate([gen["ymu_w1"], gen["yvar_w1"]], axis=1),
      _row(jnp.concatenate([gen["ymu_b1"], gen["yvar_b1"]])),
      jnp.concatenate([gen["ymu_w2"], zpad], axis=0), _row(gen["ymu_b2"]),
      jnp.concatenate([zpad, gen["yvar_w2"]], axis=0), _row(gen["yvar_b2"]),
      gen["pxz_w1"], _row(gen["pxz_b1"]),
      gen["pxz_w2"], _row(gen["pxz_b2"]),
      gen["pxz_w3"].T, _row(gen["pxz_b3"]),
  ]


# ----------------------------------------------------------------------------
# Forward pass (glue = stacking / RNG / matrix inverse; compute = one kernel)
# ----------------------------------------------------------------------------
@functools.partial(jax.jit, static_argnames=("temperature",))
def dann_sem_forward(params, source_x, target_x, source_y, dropout_mask, key,
                     temperature=1.0):
  G = params["adj_S"].shape[0]
  Z = params["inf_s"]["qyx_w1"].shape[1]
  Y = params["inf_s"]["qyx_wl"].shape[1]
  C = params["pred"]["p3_w"].shape[1]
  B = source_x.shape[0]
  assert source_y.shape[1] == C

  # Adjacency prep + inverse (matrix inverse stays in plain JAX glue).
  eye = jnp.eye(G, dtype=jnp.float32)
  off_diag = jnp.ones((G, G), jnp.float32) - eye
  adj_S_t = eye - (params["adj_S"] * off_diag).T
  adj_T_t = eye - (params["adj_T"] * off_diag).T
  adj = jnp.stack([adj_S_t, adj_T_t])
  adj_inv = jnp.linalg.inv(adj)

  # Noise, stacked on the domain axis.
  ks = jax.random.split(key, 4)

  def gumbel(k, shape, eps=1e-20):
    uu = jax.random.uniform(k, shape)
    return -jnp.log(-jnp.log(uu + eps) + eps)

  gum = jnp.stack([gumbel(ks[0], (B, Y)), gumbel(ks[1], (B, Y))])
  nrm = jnp.stack([jax.random.normal(ks[2], (B, G), jnp.float32),
                   jax.random.normal(ks[3], (B, G), jnp.float32)])

  x = jnp.stack([source_x, target_x]).astype(jnp.float32)        # (2, B, G)
  xcol = x.reshape(2, B * G, 1)

  # One-hot helper matrices for gene broadcast / gather inside the kernel.
  u_mat = jnp.asarray(np.kron(np.eye(B, dtype=np.float32),
                              np.ones((G, 1), np.float32)))       # (B*G, B)
  ut_mat = u_mat.T                                                # (B, B*G)
  v_mat = jnp.asarray(np.kron(np.ones((B, 1), np.float32),
                              np.eye(G, dtype=np.float32)))       # (B*G, G)

  dom = [jnp.stack([a, b]) for a, b in
         zip(_pack_domain(params["inf_s"], params["gen_s"], Z, G),
             _pack_domain(params["inf_t"], params["gen_t"], Z, G))]
  pred_p = [params["pred"]["p1_w"], _row(params["pred"]["p1_b"]),
            params["pred"]["p2_w"], _row(params["pred"]["p2_b"]),
            params["pred"]["p3_w"], _row(params["pred"]["p3_b"])]

  inputs = ([x, xcol, adj, adj_inv, gum, nrm,
             dropout_mask.astype(jnp.float32), source_y.astype(jnp.float32),
             u_mat, ut_mat, v_mat] + dom + pred_p)
  in_specs = ([_dom_spec(a.shape) for a in inputs[:6]]
              + [_shared_spec(a.shape) for a in inputs[6:11]]
              + [_dom_spec(a.shape) for a in dom]
              + [_shared_spec(a.shape) for a in pred_p])

  out_shapes3 = [(2, B, G), (2, B, G), (2, B, G), (2, B, Y), (2, B, Y),
                 (2, B, Y), (2, B, G), (2, B, G), (2, B, G), (2, B, G),
                 (2, B, C), (2, 1, 1), (2, 1, 1), (2, 1, 1), (2, 1, 1)]
  out_shape = tuple(jax.ShapeDtypeStruct(s, jnp.float32) for s in out_shapes3)
  out_specs = tuple(_dom_spec(s) for s in out_shapes3)

  fused = pl.pallas_call(
      functools.partial(_dann_sem_kernel, temperature=float(temperature)),
      out_shape=out_shape,
      grid_spec=pltpu.PrefetchScalarGridSpec(
          num_scalar_prefetch=0, grid=(2,),
          in_specs=in_specs, out_specs=out_specs),
      compiler_params=pltpu.CompilerParams(
          dimension_semantics=("parallel",)),
  )
  (mean, var, gauss, logits, prob, cat, mu_ori, y_mean, y_var, x_rec, pred,
   lrec, lgauss, lcat, lpred) = fused(*inputs)

  def dom_out(i):
    return {"mean": mean[i], "var": var[i], "gaussian": gauss[i],
            "logits": logits[i], "prob_cat": prob[i], "categorical": cat[i],
            "mu_ori": mu_ori[i], "y_mean": y_mean[i], "y_var": y_var[i],
            "x_rec": x_rec[i]}

  output_s = dom_out(0)
  output_t = dom_out(1)
  output_s["source_pred"] = pred[0]
  output_t["target_pred"] = pred[1]

  loss_dict = {
      "loss_rec": lrec[0, 0, 0] + lrec[1, 0, 0],
      "loss_gauss": lgauss[0, 0, 0] + lgauss[1, 0, 0],
      "loss_cat": (lcat[0, 0, 0] - _LOG01) + (lcat[1, 0, 0] - _LOG01),
      "loss_pred": lpred[0, 0, 0],
  }
  return loss_dict, (output_s, output_t)


# ----------------------------------------------------------------------------
# Parameter init (deterministic; xavier_normal weights, zero biases)
# ----------------------------------------------------------------------------
def initialize_A(topic_nums=16, seed=42):
  np.random.seed(seed)
  A = np.ones([topic_nums, topic_nums]) / (topic_nums - 1) + \
      (np.random.rand(topic_nums * topic_nums) * 0.0002).reshape(
          [topic_nums, topic_nums])
  for i in range(topic_nums):
    A[i, i] = 0
  return A.astype(np.float32)


def xavier(key, fan_in, fan_out):
  std = math.sqrt(2.0 / (fan_in + fan_out))
  return (std * jax.random.normal(key, (fan_in, fan_out))).astype(jnp.float32)


def zeros(n):
  return jnp.zeros((n,), jnp.float32)


def init_inference_params(key, x_dim, z_dim, y_dim, n_gene):
  ks = jax.random.split(key, 7)
  return {
      "qyx_w1": xavier(ks[0], n_gene, z_dim), "qyx_b1": zeros(z_dim),
      "qyx_w2": xavier(ks[1], z_dim, z_dim), "qyx_b2": zeros(z_dim),
      "qyx_wl": xavier(ks[2], z_dim, y_dim), "qyx_bl": zeros(y_dim),
      "qz_w1": xavier(ks[3], x_dim + y_dim, z_dim), "qz_b1": zeros(z_dim),
      "qz_w2": xavier(ks[4], z_dim, z_dim), "qz_b2": zeros(z_dim),
      "qz_wmu": xavier(ks[5], z_dim, 1), "qz_bmu": zeros(1),
      "qz_wvar": xavier(ks[6], z_dim, 1), "qz_bvar": zeros(1),
  }


def init_generative_params(key, x_dim, z_dim, y_dim, n_gene):
  ks = jax.random.split(key, 7)
  return {
      "ymu_w1": xavier(ks[0], y_dim, z_dim), "ymu_b1": zeros(z_dim),
      "ymu_w2": xavier(ks[1], z_dim, n_gene), "ymu_b2": zeros(n_gene),
      "yvar_w1": xavier(ks[2], y_dim, z_dim), "yvar_b1": zeros(z_dim),
      "yvar_w2": xavier(ks[3], z_dim, n_gene), "yvar_b2": zeros(n_gene),
      "pxz_w1": xavier(ks[4], 1, z_dim), "pxz_b1": zeros(z_dim),
      "pxz_w2": xavier(ks[5], z_dim, z_dim), "pxz_b2": zeros(z_dim),
      "pxz_w3": xavier(ks[6], z_dim, x_dim), "pxz_b3": zeros(x_dim),
  }


def init_predictor_params(key, n_gene, n_celltype):
  ks = jax.random.split(key, 3)
  return {
      "p1_w": xavier(ks[0], n_gene, n_gene // 2), "p1_b": zeros(n_gene // 2),
      "p2_w": xavier(ks[1], n_gene // 2, n_gene // 4), "p2_b": zeros(n_gene // 4),
      "p3_w": xavier(ks[2], n_gene // 4, n_celltype), "p3_b": zeros(n_celltype),
  }


# ----------------------------------------------------------------------------
if __name__ == "__main__":
  B, n_gene, z_dim, y_dim, n_celltype = 2, 16, 32, 8, 4
  x_dim = 1  # implied by Linear(x_dim + y_dim, z_dim) on [B, n_gene, 1+y_dim]

  key = jax.random.PRNGKey(0)
  k_param, k_sx, k_tx, k_sy, k_noise = jax.random.split(key, 5)
  kp = jax.random.split(k_param, 5)

  params = {
      "adj_S": jnp.asarray(initialize_A(n_gene, seed=42)),
      "adj_T": jnp.asarray(initialize_A(n_gene, seed=42)),
      "inf_s": init_inference_params(kp[0], x_dim, z_dim, y_dim, n_gene),
      "inf_t": init_inference_params(kp[1], x_dim, z_dim, y_dim, n_gene),
      "gen_s": init_generative_params(kp[2], x_dim, z_dim, y_dim, n_gene),
      "gen_t": init_generative_params(kp[3], x_dim, z_dim, y_dim, n_gene),
      "pred": init_predictor_params(kp[4], n_gene, n_celltype),
  }

  source_x = jax.random.uniform(k_sx, (B, n_gene), jnp.float32)
  target_x = jax.random.uniform(k_tx, (B, n_gene), jnp.float32)
  source_y = jax.nn.softmax(jax.random.normal(k_sy, (B, n_celltype)), axis=1)
  dropout_mask = jnp.ones((B, n_gene), jnp.float32)

  loss_dict, (out_s, out_t) = dann_sem_forward(
      params, source_x, target_x, source_y, dropout_mask, k_noise,
      temperature=1.0)

  jax.block_until_ready(loss_dict)
  for name, val in loss_dict.items():
    assert np.isfinite(float(val)), name
  assert out_s["x_rec"].shape == (B, n_gene)
  assert out_s["mean"].shape == (B, n_gene)
  assert out_s["var"].shape == (B, n_gene)
  assert out_s["gaussian"].shape == (B, n_gene)
  assert out_s["prob_cat"].shape == (B, y_dim)
  assert out_s["source_pred"].shape == (B, n_celltype)
  assert out_t["target_pred"].shape == (B, n_celltype)
  print("KERNEL_OK")
</pallas_src>

<mosaic_0001>
module attributes {stable_mosaic.version = 11 : i64} {
  func.func @_dann_sem_kernel(%arg0: i32, %arg1: memref<1x2x16xf32, #tpu.memory_space<vmem>>, %arg2: memref<1x32x1xf32, #tpu.memory_space<vmem>>, %arg3: memref<1x16x16xf32, #tpu.memory_space<vmem>>, %arg4: memref<1x16x16xf32, #tpu.memory_space<vmem>>, %arg5: memref<1x2x8xf32, #tpu.memory_space<vmem>>, %arg6: memref<1x2x16xf32, #tpu.memory_space<vmem>>, %arg7: memref<2x16xf32, #tpu.memory_space<vmem>>, %arg8: memref<2x4xf32, #tpu.memory_space<vmem>>, %arg9: memref<32x2xf32, #tpu.memory_space<vmem>>, %arg10: memref<2x32xf32, #tpu.memory_space<vmem>>, %arg11: memref<32x16xf32, #tpu.memory_space<vmem>>, %arg12: memref<1x16x32xf32, #tpu.memory_space<vmem>>, %arg13: memref<1x1x32xf32, #tpu.memory_space<vmem>>, %arg14: memref<1x32x32xf32, #tpu.memory_space<vmem>>, %arg15: memref<1x1x32xf32, #tpu.memory_space<vmem>>, %arg16: memref<1x32x8xf32, #tpu.memory_space<vmem>>, %arg17: memref<1x1x8xf32, #tpu.memory_space<vmem>>, %arg18: memref<1x1x32xf32, #tpu.memory_space<vmem>>, %arg19: memref<1x8x32xf32, #tpu.memory_space<vmem>>, %arg20: memref<1x1x32xf32, #tpu.memory_space<vmem>>, %arg21: memref<1x32x32xf32, #tpu.memory_space<vmem>>, %arg22: memref<1x1x32xf32, #tpu.memory_space<vmem>>, %arg23: memref<1x1x32xf32, #tpu.memory_space<vmem>>, %arg24: memref<1x1x1xf32, #tpu.memory_space<vmem>>, %arg25: memref<1x1x32xf32, #tpu.memory_space<vmem>>, %arg26: memref<1x1x1xf32, #tpu.memory_space<vmem>>, %arg27: memref<1x8x64xf32, #tpu.memory_space<vmem>>, %arg28: memref<1x1x64xf32, #tpu.memory_space<vmem>>, %arg29: memref<1x64x16xf32, #tpu.memory_space<vmem>>, %arg30: memref<1x1x16xf32, #tpu.memory_space<vmem>>, %arg31: memref<1x64x16xf32, #tpu.memory_space<vmem>>, %arg32: memref<1x1x16xf32, #tpu.memory_space<vmem>>, %arg33: memref<1x1x32xf32, #tpu.memory_space<vmem>>, %arg34: memref<1x1x32xf32, #tpu.memory_space<vmem>>, %arg35: memref<1x32x32xf32, #tpu.memory_space<vmem>>, %arg36: memref<1x1x32xf32, #tpu.memory_space<vmem>>, %arg37: memref<1x1x32xf32, #tpu.memory_space<vmem>>, %arg38: memref<1x1x1xf32, #tpu.memory_space<vmem>>, %arg39: memref<16x8xf32, #tpu.memory_space<vmem>>, %arg40: memref<1x8xf32, #tpu.memory_space<vmem>>, %arg41: memref<8x4xf32, #tpu.memory_space<vmem>>, %arg42: memref<1x4xf32, #tpu.memory_space<vmem>>, %arg43: memref<4x4xf32, #tpu.memory_space<vmem>>, %arg44: memref<1x4xf32, #tpu.memory_space<vmem>>, %arg45: memref<1x2x16xf32, #tpu.memory_space<vmem>>, %arg46: memref<1x2x16xf32, #tpu.memory_space<vmem>>, %arg47: memref<1x2x16xf32, #tpu.memory_space<vmem>>, %arg48: memref<1x2x8xf32, #tpu.memory_space<vmem>>, %arg49: memref<1x2x8xf32, #tpu.memory_space<vmem>>, %arg50: memref<1x2x8xf32, #tpu.memory_space<vmem>>, %arg51: memref<1x2x16xf32, #tpu.memory_space<vmem>>, %arg52: memref<1x2x16xf32, #tpu.memory_space<vmem>>, %arg53: memref<1x2x16xf32, #tpu.memory_space<vmem>>, %arg54: memref<1x2x16xf32, #tpu.memory_space<vmem>>, %arg55: memref<1x2x4xf32, #tpu.memory_space<vmem>>, %arg56: memref<1x1x1xf32, #tpu.memory_space<vmem>>, %arg57: memref<1x1x1xf32, #tpu.memory_space<vmem>>, %arg58: memref<1x1x1xf32, #tpu.memory_space<vmem>>, %arg59: memref<1x1x1xf32, #tpu.memory_space<vmem>>) attributes {dimension_semantics = [#tpu.dimension_semantics<parallel>], iteration_bounds = array<i64: 2>, scalar_prefetch = 0 : i64, scratch_operands = 0 : i64, tpu.core_type = #tpu.core_type<tc>, window_params = [{transform_indices = @transform_0, window_bounds = array<i64: 1, 2, 16>}, {transform_indices = @transform_1, window_bounds = array<i64: 1, 32, 1>}, {transform_indices = @transform_2, window_bounds = array<i64: 1, 16, 16>}, {transform_indices = @transform_3, window_bounds = array<i64: 1, 16, 16>}, {transform_indices = @transform_4, window_bounds = array<i64: 1, 2, 8>}, {transform_indices = @transform_5, window_bounds = array<i64: 1, 2, 16>}, {pipeline_mode = #tpu.pipeline_mode<synchronous>, transform_indices = @transform_6, window_bounds = array<i64: 2, 16>}, {pipeline_mode = #tpu.pipeline_mode<synchronous>, transform_indices = @transform_7, window_bounds = array<i64: 2, 4>}, {pipeline_mode = #tpu.pipeline_mode<synchronous>, transform_indices = @transform_8, window_bounds = array<i64: 32, 2>}, {pipeline_mode = #tpu.pipeline_mode<synchronous>, transform_indices = @transform_9, window_bounds = array<i64: 2, 32>}, {pipeline_mode = #tpu.pipeline_mode<synchronous>, transform_indices = @transform_10, window_bounds = array<i64: 32, 16>}, {transform_indices = @transform_11, window_bounds = array<i64: 1, 16, 32>}, {transform_indices = @transform_12, window_bounds = array<i64: 1, 1, 32>}, {transform_indices = @transform_13, window_bounds = array<i64: 1, 32, 32>}, {transform_indices = @transform_14, window_bounds = array<i64: 1, 1, 32>}, {transform_indices = @transform_15, window_bounds = array<i64: 1, 32, 8>}, {transform_indices = @transform_16, window_bounds = array<i64: 1, 1, 8>}, {transform_indices = @transform_17, window_bounds = array<i64: 1, 1, 32>}, {transform_indices = @transform_18, window_bounds = array<i64: 1, 8, 32>}, {transform_indices = @transform_19, window_bounds = array<i64: 1, 1, 32>}, {transform_indices = @transform_20, window_bounds = array<i64: 1, 32, 32>}, {transform_indices = @transform_21, window_bounds = array<i64: 1, 1, 32>}, {transform_indices = @transform_22, window_bounds = array<i64: 1, 1, 32>}, {transform_indices = @transform_23, window_bounds = array<i64: 1, 1, 1>}, {transform_indices = @transform_24, window_bounds = array<i64: 1, 1, 32>}, {transform_indices = @transform_25, window_bounds = array<i64: 1, 1, 1>}, {transform_indices = @transform_26, window_bounds = array<i64: 1, 8, 64>}, {transform_indices = @transform_27, window_bounds = array<i64: 1, 1, 64>}, {transform_indices = @transform_28, window_bounds = array<i64: 1, 64, 16>}, {transform_indices = @transform_29, window_bounds = array<i64: 1, 1, 16>}, {transform_indices = @transform_30, window_bounds = array<i64: 1, 64, 16>}, {transform_indices = @transform_31, window_bounds = array<i64: 1, 1, 16>}, {transform_indices = @transform_32, window_bounds = array<i64: 1, 1, 32>}, {transform_indices = @transform_33, window_bounds = array<i64: 1, 1, 32>}, {transform_indices = @transform_34, window_bounds = array<i64: 1, 32, 32>}, {transform_indices = @transform_35, window_bounds = array<i64: 1, 1, 32>}, {transform_indices = @transform_36, window_bounds = array<i64: 1, 1, 32>}, {transform_indices = @transform_37, window_bounds = array<i64: 1, 1, 1>}, {pipeline_mode = #tpu.pipeline_mode<synchronous>, transform_indices = @transform_38, window_bounds = array<i64: 16, 8>}, {pipeline_mode = #tpu.pipeline_mode<synchronous>, transform_indices = @transform_39, window_bounds = array<i64: 1, 8>}, {pipeline_mode = #tpu.pipeline_mode<synchronous>, transform_indices = @transform_40, window_bounds = array<i64: 8, 4>}, {pipeline_mode = #tpu.pipeline_mode<synchronous>, transform_indices = @transform_41, window_bounds = array<i64: 1, 4>}, {pipeline_mode = #tpu.pipeline_mode<synchronous>, transform_indices = @transform_42, window_bounds = array<i64: 4, 4>}, {pipeline_mode = #tpu.pipeline_mode<synchronous>, transform_indices = @transform_43, window_bounds = array<i64: 1, 4>}, {transform_indices = @transform_44, window_bounds = array<i64: 1, 2, 16>}, {transform_indices = @transform_45, window_bounds = array<i64: 1, 2, 16>}, {transform_indices = @transform_46, window_bounds = array<i64: 1, 2, 16>}, {transform_indices = @transform_47, window_bounds = array<i64: 1, 2, 8>}, {transform_indices = @transform_48, window_bounds = array<i64: 1, 2, 8>}, {transform_indices = @transform_49, window_bounds = array<i64: 1, 2, 8>}, {transform_indices = @transform_50, window_bounds = array<i64: 1, 2, 16>}, {transform_indices = @transform_51, window_bounds = array<i64: 1, 2, 16>}, {transform_indices = @transform_52, window_bounds = array<i64: 1, 2, 16>}, {transform_indices = @transform_53, window_bounds = array<i64: 1, 2, 16>}, {transform_indices = @transform_54, window_bounds = array<i64: 1, 2, 4>}, {transform_indices = @transform_55, window_bounds = array<i64: 1, 1, 1>}, {transform_indices = @transform_56, window_bounds = array<i64: 1, 1, 1>}, {transform_indices = @transform_57, window_bounds = array<i64: 1, 1, 1>}, {transform_indices = @transform_58, window_bounds = array<i64: 1, 1, 1>}]} {
    %c0 = arith.constant 0 : index
    %c0_0 = arith.constant 0 : index
    %c0_1 = arith.constant 0 : index
    %0 = vector.load %arg1[%c0, %c0_0, %c0_1] : memref<1x2x16xf32, #tpu.memory_space<vmem>>, vector<1x2x16xf32>
    %1 = vector.shape_cast %0 : vector<1x2x16xf32> to vector<2x16xf32>
    %c0_2 = arith.constant 0 : index
    %c0_3 = arith.constant 0 : index
    %c0_4 = arith.constant 0 : index
    %2 = vector.load %arg2[%c0_2, %c0_3, %c0_4] : memref<1x32x1xf32, #tpu.memory_space<vmem>>, vector<1x32x1xf32>
    %3 = vector.shape_cast %2 : vector<1x32x1xf32> to vector<32x1xf32>
    %c0_5 = arith.constant 0 : index
    %c0_6 = arith.constant 0 : index
    %c0_7 = arith.constant 0 : index
    %4 = vector.load %arg3[%c0_5, %c0_6, %c0_7] : memref<1x16x16xf32, #tpu.memory_space<vmem>>, vector<1x16x16xf32>
    %5 = vector.shape_cast %4 : vector<1x16x16xf32> to vector<16x16xf32>
    %c0_8 = arith.constant 0 : index
    %c0_9 = arith.constant 0 : index
    %c0_10 = arith.constant 0 : index
    %6 = vector.load %arg4[%c0_8, %c0_9, %c0_10] : memref<1x16x16xf32, #tpu.memory_space<vmem>>, vector<1x16x16xf32>
    %7 = vector.shape_cast %6 : vector<1x16x16xf32> to vector<16x16xf32>
    %c0_11 = arith.constant 0 : index
    %c0_12 = arith.constant 0 : index
    %c0_13 = arith.constant 0 : index
    %8 = vector.load %arg5[%c0_11, %c0_12, %c0_13] : memref<1x2x8xf32, #tpu.memory_space<vmem>>, vector<1x2x8xf32>
    %9 = vector.shape_cast %8 : vector<1x2x8xf32> to vector<2x8xf32>
    %c0_14 = arith.constant 0 : index
    %c0_15 = arith.constant 0 : index
    %c0_16 = arith.constant 0 : index
    %10 = vector.load %arg6[%c0_14, %c0_15, %c0_16] : memref<1x2x16xf32, #tpu.memory_space<vmem>>, vector<1x2x16xf32>
    %11 = vector.shape_cast %10 : vector<1x2x16xf32> to vector<2x16xf32>
    %c0_17 = arith.constant 0 : index
    %c0_18 = arith.constant 0 : index
    %12 = vector.load %arg7[%c0_17, %c0_18] : memref<2x16xf32, #tpu.memory_space<vmem>>, vector<2x16xf32>
    %c0_19 = arith.constant 0 : index
    %c0_20 = arith.constant 0 : index
    %13 = vector.load %arg8[%c0_19, %c0_20] : memref<2x4xf32, #tpu.memory_space<vmem>>, vector<2x4xf32>
    %c0_21 = arith.constant 0 : index
    %c0_22 = arith.constant 0 : index
    %14 = vector.load %arg9[%c0_21, %c0_22] : memref<32x2xf32, #tpu.memory_space<vmem>>, vector<32x2xf32>
    %c0_23 = arith.constant 0 : index
    %c0_24 = arith.constant 0 : index
    %15 = vector.load %arg10[%c0_23, %c0_24] : memref<2x32xf32, #tpu.memory_space<vmem>>, vector<2x32xf32>
    %c0_25 = arith.constant 0 : index
    %c0_26 = arith.constant 0 : index
    %16 = vector.load %arg11[%c0_25, %c0_26] : memref<32x16xf32, #tpu.memory_space<vmem>>, vector<32x16xf32>
    %c0_27 = arith.constant 0 : index
    %c0_28 = arith.constant 0 : index
    %c0_29 = arith.constant 0 : index
    %17 = vector.load %arg12[%c0_27, %c0_28, %c0_29] : memref<1x16x32xf32, #tpu.memory_space<vmem>>, vector<1x16x32xf32>
    %18 = vector.shape_cast %17 : vector<1x16x32xf32> to vector<16x32xf32>
    %cst = arith.constant dense<0.000000e+00> : vector<2x32xf32>
    %19 = tpu.matmul %1, %18, %cst {dimension_numbers = #tpu.dot_dimension_numbers<[1], [0], [0], [1], [0, 0, 1, 1], [], []>} : vector<2x16xf32>, vector<16x32xf32>, vector<2x32xf32> -> vector<2x32xf32>
    %c0_30 = arith.constant 0 : index
    %c0_31 = arith.constant 0 : index
    %c0_32 = arith.constant 0 : index
    %20 = vector.load %arg13[%c0_30, %c0_31, %c0_32] : memref<1x1x32xf32, #tpu.memory_space<vmem>>, vector<1x1x32xf32>
    %21 = vector.shape_cast %20 : vector<1x1x32xf32> to vector<1x32xf32>
    %22 = vector.broadcast %21 : vector<1x32xf32> to vector<2x32xf32>
    %23 = arith.addf %19, %22 : vector<2x32xf32>
    %24 = math.tanh %23 : vector<2x32xf32>
    %c0_33 = arith.constant 0 : index
    %c0_34 = arith.constant 0 : index
    %c0_35 = arith.constant 0 : index
    %25 = vector.load %arg14[%c0_33, %c0_34, %c0_35] : memref<1x32x32xf32, #tpu.memory_space<vmem>>, vector<1x32x32xf32>
    %26 = vector.shape_cast %25 : vector<1x32x32xf32> to vector<32x32xf32>
    %cst_36 = arith.constant dense<0.000000e+00> : vector<2x32xf32>
    %27 = tpu.matmul %24, %26, %cst_36 {dimension_numbers = #tpu.dot_dimension_numbers<[1], [0], [0], [1], [0, 0, 1, 1], [], []>} : vector<2x32xf32>, vector<32x32xf32>, vector<2x32xf32> -> vector<2x32xf32>
    %c0_37 = arith.constant 0 : index
    %c0_38 = arith.constant 0 : index
    %c0_39 = arith.constant 0 : index
    %28 = vector.load %arg15[%c0_37, %c0_38, %c0_39] : memref<1x1x32xf32, #tpu.memory_space<vmem>>, vector<1x1x32xf32>
    %29 = vector.shape_cast %28 : vector<1x1x32xf32> to vector<1x32xf32>
    %30 = vector.broadcast %29 : vector<1x32xf32> to vector<2x32xf32>
    %31 = arith.addf %27, %30 : vector<2x32xf32>
    %32 = math.tanh %31 : vector<2x32xf32>
    %c0_40 = arith.constant 0 : index
    %c0_41 = arith.constant 0 : index
    %c0_42 = arith.constant 0 : index
    %33 = vector.load %arg16[%c0_40, %c0_41, %c0_42] : memref<1x32x8xf32, #tpu.memory_space<vmem>>, vector<1x32x8xf32>
    %34 = vector.shape_cast %33 : vector<1x32x8xf32> to vector<32x8xf32>
    %cst_43 = arith.constant dense<0.000000e+00> : vector<2x8xf32>
    %35 = tpu.matmul %32, %34, %cst_43 {dimension_numbers = #tpu.dot_dimension_numbers<[1], [0], [0], [1], [0, 0, 1, 1], [], []>} : vector<2x32xf32>, vector<32x8xf32>, vector<2x8xf32> -> vector<2x8xf32>
    %c0_44 = arith.constant 0 : index
    %c0_45 = arith.constant 0 : index
    %c0_46 = arith.constant 0 : index
    %36 = vector.load %arg17[%c0_44, %c0_45, %c0_46] : memref<1x1x8xf32, #tpu.memory_space<vmem>>, vector<1x1x8xf32>
    %37 = vector.shape_cast %36 : vector<1x1x8xf32> to vector<1x8xf32>
    %38 = vector.broadcast %37 : vector<1x8xf32> to vector<2x8xf32>
    %39 = arith.addf %35, %38 : vector<2x8xf32>
    %cst_47 = arith.constant dense<0xFF800000> : vector<2xf32>
    %40 = vector.multi_reduction <maximumf>, %39, %cst_47 [1] : vector<2x8xf32> to vector<2xf32>
    %41 = vector.shape_cast %40 : vector<2xf32> to vector<2x1xf32>
    %42 = vector.broadcast %41 : vector<2x1xf32> to vector<2x8xf32>
    %43 = arith.subf %39, %42 : vector<2x8xf32>
    %44 = math.exp %43 : vector<2x8xf32>
    %cst_48 = arith.constant dense<0.000000e+00> : vector<2xf32>
    %45 = vector.multi_reduction <add>, %44, %cst_48 [1] : vector<2x8xf32> to vector<2xf32>
    %46 = vector.shape_cast %45 : vector<2xf32> to vector<2x1xf32>
    %47 = tpu.reciprocal %46 {approx = true} : vector<2x1xf32> -> vector<2x1xf32>
    %48 = vector.broadcast %47 : vector<2x1xf32> to vector<2x8xf32>
    %49 = arith.mulf %44, %48 : vector<2x8xf32>
    %50 = arith.addf %39, %9 : vector<2x8xf32>
    %cst_49 = arith.constant 1.000000e+00 : f32
    %51 = vector.broadcast %cst_49 : f32 to vector<2x8xf32>
    %52 = arith.mulf %50, %51 : vector<2x8xf32>
    %cst_50 = arith.constant dense<0xFF800000> : vector<2xf32>
    %53 = vector.multi_reduction <maximumf>, %52, %cst_50 [1] : vector<2x8xf32> to vector<2xf32>
    %54 = vector.shape_cast %53 : vector<2xf32> to vector<2x1xf32>
    %55 = vector.broadcast %54 : vector<2x1xf32> to vector<2x8xf32>
    %56 = arith.subf %52, %55 : vector<2x8xf32>
    %57 = math.exp %56 : vector<2x8xf32>
    %cst_51 = arith.constant dense<0.000000e+00> : vector<2xf32>
    %58 = vector.multi_reduction <add>, %57, %cst_51 [1] : vector<2x8xf32> to vector<2xf32>
    %59 = vector.shape_cast %58 : vector<2xf32> to vector<2x1xf32>
    %60 = tpu.reciprocal %59 {approx = true} : vector<2x1xf32> -> vector<2x1xf32>
    %61 = vector.broadcast %60 : vector<2x1xf32> to vector<2x8xf32>
    %62 = arith.mulf %57, %61 : vector<2x8xf32>
    %c0_52 = arith.constant 0 : index
    %c0_53 = arith.constant 0 : index
    %c0_54 = arith.constant 0 : index
    %63 = vector.load %arg19[%c0_52, %c0_53, %c0_54] : memref<1x8x32xf32, #tpu.memory_space<vmem>>, vector<1x8x32xf32>
    %64 = vector.shape_cast %63 : vector<1x8x32xf32> to vector<8x32xf32>
    %cst_55 = arith.constant dense<0.000000e+00> : vector<2x32xf32>
    %65 = tpu.matmul %62, %64, %cst_55 {dimension_numbers = #tpu.dot_dimension_numbers<[1], [0], [0], [1], [0, 0, 1, 1], [], []>} : vector<2x8xf32>, vector<8x32xf32>, vector<2x32xf32> -> vector<2x32xf32>
    %c0_56 = arith.constant 0 : index
    %c0_57 = arith.constant 0 : index
    %c0_58 = arith.constant 0 : index
    %66 = vector.load %arg20[%c0_56, %c0_57, %c0_58] : memref<1x1x32xf32, #tpu.memory_space<vmem>>, vector<1x1x32xf32>
    %67 = vector.shape_cast %66 : vector<1x1x32xf32> to vector<1x32xf32>
    %68 = vector.broadcast %67 : vector<1x32xf32> to vector<2x32xf32>
    %69 = arith.addf %65, %68 : vector<2x32xf32>
    %c0_59 = arith.constant 0 : index
    %c0_60 = arith.constant 0 : index
    %c0_61 = arith.constant 0 : index
    %70 = vector.load %arg18[%c0_59, %c0_60, %c0_61] : memref<1x1x32xf32, #tpu.memory_space<vmem>>, vector<1x1x32xf32>
    %71 = vector.shape_cast %70 : vector<1x1x32xf32> to vector<1x32xf32>
    %72 = vector.broadcast %3 : vector<32x1xf32> to vector<32x32xf32>
    %73 = vector.broadcast %71 : vector<1x32xf32> to vector<32x32xf32>
    %74 = arith.mulf %72, %73 : vector<32x32xf32>
    %cst_62 = arith.constant dense<0.000000e+00> : vector<32x32xf32>
    %75 = tpu.matmul %14, %69, %cst_62 {dimension_numbers = #tpu.dot_dimension_numbers<[1], [0], [0], [1], [0, 0, 1, 1], [], []>} : vector<32x2xf32>, vector<2x32xf32>, vector<32x32xf32> -> vector<32x32xf32>
    %76 = arith.addf %74, %75 : vector<32x32xf32>
    %77 = math.tanh %76 : vector<32x32xf32>
    %c0_63 = arith.constant 0 : index
    %c0_64 = arith.constant 0 : index
    %c0_65 = arith.constant 0 : index
    %78 = vector.load %arg21[%c0_63, %c0_64, %c0_65] : memref<1x32x32xf32, #tpu.memory_space<vmem>>, vector<1x32x32xf32>
    %79 = vector.shape_cast %78 : vector<1x32x32xf32> to vector<32x32xf32>
    %cst_66 = arith.constant dense<0.000000e+00> : vector<32x32xf32>
    %80 = tpu.matmul %77, %79, %cst_66 {dimension_numbers = #tpu.dot_dimension_numbers<[1], [0], [0], [1], [0, 0, 1, 1], [], []>} : vector<32x32xf32>, vector<32x32xf32>, vector<32x32xf32> -> vector<32x32xf32>
    %c0_67 = arith.constant 0 : index
    %c0_68 = arith.constant 0 : index
    %c0_69 = arith.constant 0 : index
    %81 = vector.load %arg22[%c0_67, %c0_68, %c0_69] : memref<1x1x32xf32, #tpu.memory_space<vmem>>, vector<1x1x32xf32>
    %82 = vector.shape_cast %81 : vector<1x1x32xf32> to vector<1x32xf32>
    %83 = vector.broadcast %82 : vector<1x32xf32> to vector<32x32xf32>
    %84 = arith.addf %80, %83 : vector<32x32xf32>
    %85 = math.tanh %84 : vector<32x32xf32>
    %c0_70 = arith.constant 0 : index
    %c0_71 = arith.constant 0 : index
    %c0_72 = arith.constant 0 : index
    %86 = vector.load %arg23[%c0_70, %c0_71, %c0_72] : memref<1x1x32xf32, #tpu.memory_space<vmem>>, vector<1x1x32xf32>
    %87 = vector.shape_cast %86 : vector<1x1x32xf32> to vector<1x32xf32>
    %88 = vector.broadcast %87 : vector<1x32xf32> to vector<32x32xf32>
    %89 = arith.mulf %85, %88 : vector<32x32xf32>
    %cst_73 = arith.constant dense<0.000000e+00> : vector<32xf32>
    %90 = vector.multi_reduction <add>, %89, %cst_73 [1] : vector<32x32xf32> to vector<32xf32>
    %91 = vector.shape_cast %90 : vector<32xf32> to vector<32x1xf32>
    %c0_74 = arith.constant 0 : index
    %c0_75 = arith.constant 0 : index
    %c0_76 = arith.constant 0 : index
    %92 = vector.load %arg24[%c0_74, %c0_75, %c0_76] : memref<1x1x1xf32, #tpu.memory_space<vmem>>, vector<1x1x1xf32>
    %93 = vector.shape_cast %92 : vector<1x1x1xf32> to vector<1x1xf32>
    %94 = vector.broadcast %93 : vector<1x1xf32> to vector<32x1xf32>
    %95 = arith.addf %91, %94 : vector<32x1xf32>
    %c0_77 = arith.constant 0 : index
    %c0_78 = arith.constant 0 : index
    %c0_79 = arith.constant 0 : index
    %96 = vector.load %arg25[%c0_77, %c0_78, %c0_79] : memref<1x1x32xf32, #tpu.memory_space<vmem>>, vector<1x1x32xf32>
    %97 = vector.shape_cast %96 : vector<1x1x32xf32> to vector<1x32xf32>
    %98 = vector.broadcast %97 : vector<1x32xf32> to vector<32x32xf32>
    %99 = arith.mulf %85, %98 : vector<32x32xf32>
    %cst_80 = arith.constant dense<0.000000e+00> : vector<32xf32>
    %100 = vector.multi_reduction <add>, %99, %cst_80 [1] : vector<32x32xf32> to vector<32xf32>
    %101 = vector.shape_cast %100 : vector<32xf32> to vector<32x1xf32>
    %c0_81 = arith.constant 0 : index
    %c0_82 = arith.constant 0 : index
    %c0_83 = arith.constant 0 : index
    %102 = vector.load %arg26[%c0_81, %c0_82, %c0_83] : memref<1x1x1xf32, #tpu.memory_space<vmem>>, vector<1x1x1xf32>
    %103 = vector.shape_cast %102 : vector<1x1x1xf32> to vector<1x1xf32>
    %104 = vector.broadcast %103 : vector<1x1xf32> to vector<32x1xf32>
    %105 = arith.addf %101, %104 : vector<32x1xf32>
    %106 = vector.broadcast %95 : vector<32x1xf32> to vector<32x16xf32>
    %107 = arith.mulf %16, %106 : vector<32x16xf32>
    %cst_84 = arith.constant dense<0.000000e+00> : vector<2x16xf32>
    %108 = tpu.matmul %15, %107, %cst_84 {dimension_numbers = #tpu.dot_dimension_numbers<[1], [0], [0], [1], [0, 0, 1, 1], [], []>} : vector<2x32xf32>, vector<32x16xf32>, vector<2x16xf32> -> vector<2x16xf32>
    %109 = vector.broadcast %105 : vector<32x1xf32> to vector<32x16xf32>
    %110 = arith.mulf %16, %109 : vector<32x16xf32>
    %cst_85 = arith.constant dense<0.000000e+00> : vector<2x16xf32>
    %111 = tpu.matmul %15, %110, %cst_85 {dimension_numbers = #tpu.dot_dimension_numbers<[1], [0], [0], [1], [0, 0, 1, 1], [], []>} : vector<2x32xf32>, vector<32x16xf32>, vector<2x16xf32> -> vector<2x16xf32>
    %cst_86 = arith.constant dense<0.000000e+00> : vector<2x16xf32>
    %112 = tpu.matmul %108, %5, %cst_86 {dimension_numbers = #tpu.dot_dimension_numbers<[1], [0], [0], [1], [0, 0, 1, 1], [], []>} : vector<2x16xf32>, vector<16x16xf32>, vector<2x16xf32> -> vector<2x16xf32>
    %cst_87 = arith.constant dense<0.000000e+00> : vector<2x16xf32>
    %113 = tpu.matmul %111, %5, %cst_87 {dimension_numbers = #tpu.dot_dimension_numbers<[1], [0], [0], [1], [0, 0, 1, 1], [], []>} : vector<2x16xf32>, vector<16x16xf32>, vector<2x16xf32> -> vector<2x16xf32>
    %114 = math.exp %113 : vector<2x16xf32>
    %cst_88 = arith.constant 1.000000e-10 : f32
    %115 = vector.broadcast %cst_88 : f32 to vector<2x16xf32>
    %116 = arith.addf %114, %115 : vector<2x16xf32>
    %117 = math.sqrt %116 : vector<2x16xf32>
    %118 = arith.mulf %11, %117 : vector<2x16xf32>
    %119 = arith.addf %112, %118 : vector<2x16xf32>
    %c0_89 = arith.constant 0 : index
    %c0_90 = arith.constant 0 : index
    %c0_91 = arith.constant 0 : index
    %120 = vector.load %arg27[%c0_89, %c0_90, %c0_91] : memref<1x8x64xf32, #tpu.memory_space<vmem>>, vector<1x8x64xf32>
    %121 = vector.shape_cast %120 : vector<1x8x64xf32> to vector<8x64xf32>
    %cst_92 = arith.constant dense<0.000000e+00> : vector<2x64xf32>
    %122 = tpu.matmul %62, %121, %cst_92 {dimension_numbers = #tpu.dot_dimension_numbers<[1], [0], [0], [1], [0, 0, 1, 1], [], []>} : vector<2x8xf32>, vector<8x64xf32>, vector<2x64xf32> -> vector<2x64xf32>
    %c0_93 = arith.constant 0 : index
    %c0_94 = arith.constant 0 : index
    %c0_95 = arith.constant 0 : index
    %123 = vector.load %arg28[%c0_93, %c0_94, %c0_95] : memref<1x1x64xf32, #tpu.memory_space<vmem>>, vector<1x1x64xf32>
    %124 = vector.shape_cast %123 : vector<1x1x64xf32> to vector<1x64xf32>
    %125 = vector.broadcast %124 : vector<1x64xf32> to vector<2x64xf32>
    %126 = arith.addf %122, %125 : vector<2x64xf32>
    %127 = math.tanh %126 : vector<2x64xf32>
    %c0_96 = arith.constant 0 : index
    %c0_97 = arith.constant 0 : index
    %c0_98 = arith.constant 0 : index
    %128 = vector.load %arg29[%c0_96, %c0_97, %c0_98] : memref<1x64x16xf32, #tpu.memory_space<vmem>>, vector<1x64x16xf32>
    %129 = vector.shape_cast %128 : vector<1x64x16xf32> to vector<64x16xf32>
    %cst_99 = arith.constant dense<0.000000e+00> : vector<2x16xf32>
    %130 = tpu.matmul %127, %129, %cst_99 {dimension_numbers = #tpu.dot_dimension_numbers<[1], [0], [0], [1], [0, 0, 1, 1], [], []>} : vector<2x64xf32>, vector<64x16xf32>, vector<2x16xf32> -> vector<2x16xf32>
    %c0_100 = arith.constant 0 : index
    %c0_101 = arith.constant 0 : index
    %c0_102 = arith.constant 0 : index
    %131 = vector.load %arg30[%c0_100, %c0_101, %c0_102] : memref<1x1x16xf32, #tpu.memory_space<vmem>>, vector<1x1x16xf32>
    %132 = vector.shape_cast %131 : vector<1x1x16xf32> to vector<1x16xf32>
    %133 = vector.broadcast %132 : vector<1x16xf32> to vector<2x16xf32>
    %134 = arith.addf %130, %133 : vector<2x16xf32>
    %c0_103 = arith.constant 0 : index
    %c0_104 = arith.constant 0 : index
    %c0_105 = arith.constant 0 : index
    %135 = vector.load %arg31[%c0_103, %c0_104, %c0_105] : memref<1x64x16xf32, #tpu.memory_space<vmem>>, vector<1x64x16xf32>
    %136 = vector.shape_cast %135 : vector<1x64x16xf32> to vector<64x16xf32>
    %cst_106 = arith.constant dense<0.000000e+00> : vector<2x16xf32>
    %137 = tpu.matmul %127, %136, %cst_106 {dimension_numbers = #tpu.dot_dimension_numbers<[1], [0], [0], [1], [0, 0, 1, 1], [], []>} : vector<2x64xf32>, vector<64x16xf32>, vector<2x16xf32> -> vector<2x16xf32>
    %c0_107 = arith.constant 0 : index
    %c0_108 = arith.constant 0 : index
    %c0_109 = arith.constant 0 : index
    %138 = vector.load %arg32[%c0_107, %c0_108, %c0_109] : memref<1x1x16xf32, #tpu.memory_space<vmem>>, vector<1x1x16xf32>
    %139 = vector.shape_cast %138 : vector<1x1x16xf32> to vector<1x16xf32>
    %140 = vector.broadcast %139 : vector<1x16xf32> to vector<2x16xf32>
    %141 = arith.addf %137, %140 : vector<2x16xf32>
    %cst_110 = arith.constant dense<0.000000e+00> : vector<2x16xf32>
    %142 = tpu.matmul %134, %7, %cst_110 {dimension_numbers = #tpu.dot_dimension_numbers<[1], [0], [0], [1], [0, 0, 1, 1], [], []>} : vector<2x16xf32>, vector<16x16xf32>, vector<2x16xf32> -> vector<2x16xf32>
    %cst_111 = arith.constant dense<0.000000e+00> : vector<2x16xf32>
    %143 = tpu.matmul %141, %7, %cst_111 {dimension_numbers = #tpu.dot_dimension_numbers<[1], [0], [0], [1], [0, 0, 1, 1], [], []>} : vector<2x16xf32>, vector<16x16xf32>, vector<2x16xf32> -> vector<2x16xf32>
    %144 = math.exp %143 : vector<2x16xf32>
    %cst_112 = arith.constant dense<0.000000e+00> : vector<32x16xf32>
    %145 = tpu.matmul %14, %119, %cst_112 {dimension_numbers = #tpu.dot_dimension_numbers<[1], [0], [0], [1], [0, 0, 1, 1], [], []>} : vector<32x2xf32>, vector<2x16xf32>, vector<32x16xf32> -> vector<32x16xf32>
    %146 = arith.mulf %145, %16 : vector<32x16xf32>
    %cst_113 = arith.constant dense<0.000000e+00> : vector<32xf32>
    %147 = vector.multi_reduction <add>, %146, %cst_113 [1] : vector<32x16xf32> to vector<32xf32>
    %148 = vector.shape_cast %147 : vector<32xf32> to vector<32x1xf32>
    %c0_114 = arith.constant 0 : index
    %c0_115 = arith.constant 0 : index
    %c0_116 = arith.constant 0 : index
    %149 = vector.load %arg33[%c0_114, %c0_115, %c0_116] : memref<1x1x32xf32, #tpu.memory_space<vmem>>, vector<1x1x32xf32>
    %150 = vector.shape_cast %149 : vector<1x1x32xf32> to vector<1x32xf32>
    %151 = vector.broadcast %148 : vector<32x1xf32> to vector<32x32xf32>
    %152 = vector.broadcast %150 : vector<1x32xf32> to vector<32x32xf32>
    %153 = arith.mulf %151, %152 : vector<32x32xf32>
    %c0_117 = arith.constant 0 : index
    %c0_118 = arith.constant 0 : index
    %c0_119 = arith.constant 0 : index
    %154 = vector.load %arg34[%c0_117, %c0_118, %c0_119] : memref<1x1x32xf32, #tpu.memory_space<vmem>>, vector<1x1x32xf32>
    %155 = vector.shape_cast %154 : vector<1x1x32xf32> to vector<1x32xf32>
    %156 = vector.broadcast %155 : vector<1x32xf32> to vector<32x32xf32>
    %157 = arith.addf %153, %156 : vector<32x32xf32>
    %158 = math.tanh %157 : vector<32x32xf32>
    %c0_120 = arith.constant 0 : index
    %c0_121 = arith.constant 0 : index
    %c0_122 = arith.constant 0 : index
    %159 = vector.load %arg35[%c0_120, %c0_121, %c0_122] : memref<1x32x32xf32, #tpu.memory_space<vmem>>, vector<1x32x32xf32>
    %160 = vector.shape_cast %159 : vector<1x32x32xf32> to vector<32x32xf32>
    %cst_123 = arith.constant dense<0.000000e+00> : vector<32x32xf32>
    %161 = tpu.matmul %158, %160, %cst_123 {dimension_numbers = #tpu.dot_dimension_numbers<[1], [0], [0], [1], [0, 0, 1, 1], [], []>} : vector<32x32xf32>, vector<32x32xf32>, vector<32x32xf32> -> vector<32x32xf32>
    %c0_124 = arith.constant 0 : index
    %c0_125 = arith.constant 0 : index
    %c0_126 = arith.constant 0 : index
    %162 = vector.load %arg36[%c0_124, %c0_125, %c0_126] : memref<1x1x32xf32, #tpu.memory_space<vmem>>, vector<1x1x32xf32>
    %163 = vector.shape_cast %162 : vector<1x1x32xf32> to vector<1x32xf32>
    %164 = vector.broadcast %163 : vector<1x32xf32> to vector<32x32xf32>
    %165 = arith.addf %161, %164 : vector<32x32xf32>
    %166 = math.tanh %165 : vector<32x32xf32>
    %c0_127 = arith.constant 0 : index
    %c0_128 = arith.constant 0 : index
    %c0_129 = arith.constant 0 : index
    %167 = vector.load %arg37[%c0_127, %c0_128, %c0_129] : memref<1x1x32xf32, #tpu.memory_space<vmem>>, vector<1x1x32xf32>
    %168 = vector.shape_cast %167 : vector<1x1x32xf32> to vector<1x32xf32>
    %169 = vector.broadcast %168 : vector<1x32xf32> to vector<32x32xf32>
    %170 = arith.mulf %166, %169 : vector<32x32xf32>
    %cst_130 = arith.constant dense<0.000000e+00> : vector<32xf32>
    %171 = vector.multi_reduction <add>, %170, %cst_130 [1] : vector<32x32xf32> to vector<32xf32>
    %172 = vector.shape_cast %171 : vector<32xf32> to vector<32x1xf32>
    %c0_131 = arith.constant 0 : index
    %c0_132 = arith.constant 0 : index
    %c0_133 = arith.constant 0 : index
    %173 = vector.load %arg38[%c0_131, %c0_132, %c0_133] : memref<1x1x1xf32, #tpu.memory_space<vmem>>, vector<1x1x1xf32>
    %174 = vector.shape_cast %173 : vector<1x1x1xf32> to vector<1x1xf32>
    %175 = vector.broadcast %174 : vector<1x1xf32> to vector<32x1xf32>
    %176 = arith.addf %172, %175 : vector<32x1xf32>
    %177 = vector.broadcast %176 : vector<32x1xf32> to vector<32x16xf32>
    %178 = arith.mulf %16, %177 : vector<32x16xf32>
    %cst_134 = arith.constant dense<0.000000e+00> : vector<2x16xf32>
    %179 = tpu.matmul %15, %178, %cst_134 {dimension_numbers = #tpu.dot_dimension_numbers<[1], [0], [0], [1], [0, 0, 1, 1], [], []>} : vector<2x32xf32>, vector<32x16xf32>, vector<2x16xf32> -> vector<2x16xf32>
    %c0_135 = arith.constant 0 : index
    %c0_136 = arith.constant 0 : index
    %180 = vector.load %arg39[%c0_135, %c0_136] : memref<16x8xf32, #tpu.memory_space<vmem>>, vector<16x8xf32>
    %cst_137 = arith.constant dense<0.000000e+00> : vector<2x8xf32>
    %181 = tpu.matmul %119, %180, %cst_137 {dimension_numbers = #tpu.dot_dimension_numbers<[1], [0], [0], [1], [0, 0, 1, 1], [], []>} : vector<2x16xf32>, vector<16x8xf32>, vector<2x8xf32> -> vector<2x8xf32>
    %c0_138 = arith.constant 0 : index
    %c0_139 = arith.constant 0 : index
    %182 = vector.load %arg40[%c0_138, %c0_139] : memref<1x8xf32, #tpu.memory_space<vmem>>, vector<1x8xf32>
    %183 = vector.broadcast %182 : vector<1x8xf32> to vector<2x8xf32>
    %184 = arith.addf %181, %183 : vector<2x8xf32>
    %cst_140 = arith.constant 0.000000e+00 : f32
    %185 = vector.broadcast %cst_140 : f32 to vector<2x8xf32>
    %186 = arith.cmpf oge, %184, %185 : vector<2x8xf32>
    %cst_141 = arith.constant 2.000000e-01 : f32
    %187 = vector.broadcast %cst_141 : f32 to vector<2x8xf32>
    %188 = arith.mulf %187, %184 : vector<2x8xf32>
    %189 = arith.select %186, %184, %188 : vector<2x8xi1>, vector<2x8xf32>
    %c0_142 = arith.constant 0 : index
    %c0_143 = arith.constant 0 : index
    %190 = vector.load %arg41[%c0_142, %c0_143] : memref<8x4xf32, #tpu.memory_space<vmem>>, vector<8x4xf32>
    %cst_144 = arith.constant dense<0.000000e+00> : vector<2x4xf32>
    %191 = tpu.matmul %189, %190, %cst_144 {dimension_numbers = #tpu.dot_dimension_numbers<[1], [0], [0], [1], [0, 0, 1, 1], [], []>} : vector<2x8xf32>, vector<8x4xf32>, vector<2x4xf32> -> vector<2x4xf32>
    %c0_145 = arith.constant 0 : index
    %c0_146 = arith.constant 0 : index
    %192 = vector.load %arg42[%c0_145, %c0_146] : memref<1x4xf32, #tpu.memory_space<vmem>>, vector<1x4xf32>
    %193 = vector.broadcast %192 : vector<1x4xf32> to vector<2x4xf32>
    %194 = arith.addf %191, %193 : vector<2x4xf32>
    %cst_147 = arith.constant 0.000000e+00 : f32
    %195 = vector.broadcast %cst_147 : f32 to vector<2x4xf32>
    %196 = arith.cmpf oge, %194, %195 : vector<2x4xf32>
    %cst_148 = arith.constant 2.000000e-01 : f32
    %197 = vector.broadcast %cst_148 : f32 to vector<2x4xf32>
    %198 = arith.mulf %197, %194 : vector<2x4xf32>
    %199 = arith.select %196, %194, %198 : vector<2x4xi1>, vector<2x4xf32>
    %c0_149 = arith.constant 0 : index
    %c0_150 = arith.constant 0 : index
    %200 = vector.load %arg43[%c0_149, %c0_150] : memref<4x4xf32, #tpu.memory_space<vmem>>, vector<4x4xf32>
    %cst_151 = arith.constant dense<0.000000e+00> : vector<2x4xf32>
    %201 = tpu.matmul %199, %200, %cst_151 {dimension_numbers = #tpu.dot_dimension_numbers<[1], [0], [0], [1], [0, 0, 1, 1], [], []>} : vector<2x4xf32>, vector<4x4xf32>, vector<2x4xf32> -> vector<2x4xf32>
    %c0_152 = arith.constant 0 : index
    %c0_153 = arith.constant 0 : index
    %202 = vector.load %arg44[%c0_152, %c0_153] : memref<1x4xf32, #tpu.memory_space<vmem>>, vector<1x4xf32>
    %203 = vector.broadcast %202 : vector<1x4xf32> to vector<2x4xf32>
    %204 = arith.addf %201, %203 : vector<2x4xf32>
    %cst_154 = arith.constant dense<0xFF800000> : vector<2xf32>
    %205 = vector.multi_reduction <maximumf>, %204, %cst_154 [1] : vector<2x4xf32> to vector<2xf32>
    %206 = vector.shape_cast %205 : vector<2xf32> to vector<2x1xf32>
    %207 = vector.broadcast %206 : vector<2x1xf32> to vector<2x4xf32>
    %208 = arith.subf %204, %207 : vector<2x4xf32>
    %209 = math.exp %208 : vector<2x4xf32>
    %cst_155 = arith.constant dense<0.000000e+00> : vector<2xf32>
    %210 = vector.multi_reduction <add>, %209, %cst_155 [1] : vector<2x4xf32> to vector<2xf32>
    %211 = vector.shape_cast %210 : vector<2xf32> to vector<2x1xf32>
    %212 = tpu.reciprocal %211 {approx = true} : vector<2x1xf32> -> vector<2x1xf32>
    %213 = vector.broadcast %212 : vector<2x1xf32> to vector<2x4xf32>
    %214 = arith.mulf %209, %213 : vector<2x4xf32>
    %215 = arith.subf %1, %179 : vector<2x16xf32>
    %216 = arith.mulf %215, %215 : vector<2x16xf32>
    %217 = arith.mulf %216, %12 : vector<2x16xf32>
    %cst_156 = arith.constant dense<0.000000e+00> : vector<2xf32>
    %218 = vector.multi_reduction <add>, %217, %cst_156 [1] : vector<2x16xf32> to vector<2xf32>
    %219 = vector.shape_cast %218 : vector<2xf32> to vector<2x1xf32>
    %cst_157 = arith.constant dense<0.000000e+00> : vector<1xf32>
    %220 = vector.multi_reduction <add>, %219, %cst_157 [0] : vector<2x1xf32> to vector<1xf32>
    %221 = vector.shape_cast %220 : vector<1xf32> to vector<1x1xf32>
    %cst_158 = arith.constant dense<0.000000e+00> : vector<2xf32>
    %222 = vector.multi_reduction <add>, %12, %cst_158 [1] : vector<2x16xf32> to vector<2xf32>
    %223 = vector.shape_cast %222 : vector<2xf32> to vector<2x1xf32>
    %cst_159 = arith.constant dense<0.000000e+00> : vector<1xf32>
    %224 = vector.multi_reduction <add>, %223, %cst_159 [0] : vector<2x1xf32> to vector<1xf32>
    %225 = vector.shape_cast %224 : vector<1xf32> to vector<1x1xf32>
    %226 = arith.divf %221, %225 : vector<1x1xf32>
    %cst_160 = arith.constant 9.99999993E-9 : f32
    %227 = vector.broadcast %cst_160 : f32 to vector<2x16xf32>
    %228 = arith.addf %114, %227 : vector<2x16xf32>
    %229 = math.log %228 : vector<2x16xf32>
    %cst_161 = arith.constant 1.83787704 : f32
    %230 = vector.broadcast %cst_161 : f32 to vector<2x16xf32>
    %231 = arith.addf %230, %229 : vector<2x16xf32>
    %232 = arith.subf %119, %112 : vector<2x16xf32>
    %233 = arith.mulf %232, %232 : vector<2x16xf32>
    %234 = arith.divf %233, %228 : vector<2x16xf32>
    %235 = arith.addf %231, %234 : vector<2x16xf32>
    %cst_162 = arith.constant dense<0.000000e+00> : vector<2xf32>
    %236 = vector.multi_reduction <add>, %235, %cst_162 [1] : vector<2x16xf32> to vector<2xf32>
    %237 = vector.shape_cast %236 : vector<2xf32> to vector<2x1xf32>
    %cst_163 = arith.constant 1.600000e+01 : f32
    %238 = vector.broadcast %cst_163 : f32 to vector<2x1xf32>
    %239 = arith.divf %237, %238 : vector<2x1xf32>
    %cst_164 = arith.constant -5.000000e-01 : f32
    %240 = vector.broadcast %cst_164 : f32 to vector<2x1xf32>
    %241 = arith.mulf %240, %239 : vector<2x1xf32>
    %cst_165 = arith.constant 9.99999993E-9 : f32
    %242 = vector.broadcast %cst_165 : f32 to vector<2x16xf32>
    %243 = arith.addf %144, %242 : vector<2x16xf32>
    %244 = math.log %243 : vector<2x16xf32>
    %cst_166 = arith.constant 1.83787704 : f32
    %245 = vector.broadcast %cst_166 : f32 to vector<2x16xf32>
    %246 = arith.addf %245, %244 : vector<2x16xf32>
    %247 = arith.subf %119, %142 : vector<2x16xf32>
    %248 = arith.mulf %247, %247 : vector<2x16xf32>
    %249 = arith.divf %248, %243 : vector<2x16xf32>
    %250 = arith.addf %246, %249 : vector<2x16xf32>
    %cst_167 = arith.constant dense<0.000000e+00> : vector<2xf32>
    %251 = vector.multi_reduction <add>, %250, %cst_167 [1] : vector<2x16xf32> to vector<2xf32>
    %252 = vector.shape_cast %251 : vector<2xf32> to vector<2x1xf32>
    %cst_168 = arith.constant 1.600000e+01 : f32
    %253 = vector.broadcast %cst_168 : f32 to vector<2x1xf32>
    %254 = arith.divf %252, %253 : vector<2x1xf32>
    %cst_169 = arith.constant -5.000000e-01 : f32
    %255 = vector.broadcast %cst_169 : f32 to vector<2x1xf32>
    %256 = arith.mulf %255, %254 : vector<2x1xf32>
    %257 = arith.subf %241, %256 : vector<2x1xf32>
    %cst_170 = arith.constant dense<0.000000e+00> : vector<1xf32>
    %258 = vector.multi_reduction <add>, %257, %cst_170 [0] : vector<2x1xf32> to vector<1xf32>
    %259 = vector.shape_cast %258 : vector<1xf32> to vector<1x1xf32>
    %cst_171 = arith.constant 5.000000e-01 : f32
    %260 = vector.broadcast %cst_171 : f32 to vector<1x1xf32>
    %261 = arith.mulf %259, %260 : vector<1x1xf32>
    %262 = math.log %46 : vector<2x1xf32>
    %263 = arith.addf %41, %262 : vector<2x1xf32>
    %264 = vector.broadcast %263 : vector<2x1xf32> to vector<2x8xf32>
    %265 = arith.subf %39, %264 : vector<2x8xf32>
    %266 = arith.mulf %49, %265 : vector<2x8xf32>
    %cst_172 = arith.constant dense<0.000000e+00> : vector<2xf32>
    %267 = vector.multi_reduction <add>, %266, %cst_172 [1] : vector<2x8xf32> to vector<2xf32>
    %268 = vector.shape_cast %267 : vector<2xf32> to vector<2x1xf32>
    %cst_173 = arith.constant dense<0.000000e+00> : vector<1xf32>
    %269 = vector.multi_reduction <add>, %268, %cst_173 [0] : vector<2x1xf32> to vector<1xf32>
    %270 = vector.shape_cast %269 : vector<1xf32> to vector<1x1xf32>
    %cst_174 = arith.constant 5.000000e-01 : f32
    %271 = vector.broadcast %cst_174 : f32 to vector<1x1xf32>
    %272 = arith.mulf %270, %271 : vector<1x1xf32>
    %273 = arith.subf %214, %13 : vector<2x4xf32>
    %274 = math.absf %273 : vector<2x4xf32>
    %cst_175 = arith.constant dense<0.000000e+00> : vector<2xf32>
    %275 = vector.multi_reduction <add>, %274, %cst_175 [1] : vector<2x4xf32> to vector<2xf32>
    %276 = vector.shape_cast %275 : vector<2xf32> to vector<2x1xf32>
    %cst_176 = arith.constant dense<0.000000e+00> : vector<1xf32>
    %277 = vector.multi_reduction <add>, %276, %cst_176 [0] : vector<2x1xf32> to vector<1xf32>
    %278 = vector.shape_cast %277 : vector<1xf32> to vector<1x1xf32>
    %cst_177 = arith.constant 1.250000e-01 : f32
    %279 = vector.broadcast %cst_177 : f32 to vector<1x1xf32>
    %280 = arith.mulf %278, %279 : vector<1x1xf32>
    %c0_178 = arith.constant 0 : index
    %c0_179 = arith.constant 0 : index
    %c0_180 = arith.constant 0 : index
    %281 = vector.load %arg45[%c0_178, %c0_179, %c0_180] : memref<1x2x16xf32, #tpu.memory_space<vmem>>, vector<1x2x16xf32>
    %282 = vector.shape_cast %281 : vector<1x2x16xf32> to vector<2x16xf32>
    %283 = vector.shape_cast %112 : vector<2x16xf32> to vector<1x2x16xf32>
    tpu.vector_store %arg45[%c0_178, %c0_179, %c0_180], %283 {strides = array<i32>} : memref<1x2x16xf32, #tpu.memory_space<vmem>>, vector<1x2x16xf32>,
    %c0_181 = arith.constant 0 : index
    %c0_182 = arith.constant 0 : index
    %c0_183 = arith.constant 0 : index
    %284 = vector.load %arg46[%c0_181, %c0_182, %c0_183] : memref<1x2x16xf32, #tpu.memory_space<vmem>>, vector<1x2x16xf32>
    %285 = vector.shape_cast %284 : vector<1x2x16xf32> to vector<2x16xf32>
    %286 = vector.shape_cast %114 : vector<2x16xf32> to vector<1x2x16xf32>
    tpu.vector_store %arg46[%c0_181, %c0_182, %c0_183], %286 {strides = array<i32>} : memref<1x2x16xf32, #tpu.memory_space<vmem>>, vector<1x2x16xf32>,
    %c0_184 = arith.constant 0 : index
    %c0_185 = arith.constant 0 : index
    %c0_186 = arith.constant 0 : index
    %287 = vector.load %arg47[%c0_184, %c0_185, %c0_186] : memref<1x2x16xf32, #tpu.memory_space<vmem>>, vector<1x2x16xf32>
    %288 = vector.shape_cast %287 : vector<1x2x16xf32> to vector<2x16xf32>
    %289 = vector.shape_cast %119 : vector<2x16xf32> to vector<1x2x16xf32>
    tpu.vector_store %arg47[%c0_184, %c0_185, %c0_186], %289 {strides = array<i32>} : memref<1x2x16xf32, #tpu.memory_space<vmem>>, vector<1x2x16xf32>,
    %c0_187 = arith.constant 0 : index
    %c0_188 = arith.constant 0 : index
    %c0_189 = arith.constant 0 : index
    %290 = vector.load %arg48[%c0_187, %c0_188, %c0_189] : memref<1x2x8xf32, #tpu.memory_space<vmem>>, vector<1x2x8xf32>
    %291 = vector.shape_cast %290 : vector<1x2x8xf32> to vector<2x8xf32>
    %292 = vector.shape_cast %39 : vector<2x8xf32> to vector<1x2x8xf32>
    tpu.vector_store %arg48[%c0_187, %c0_188, %c0_189], %292 {strides = array<i32>} : memref<1x2x8xf32, #tpu.memory_space<vmem>>, vector<1x2x8xf32>,
    %c0_190 = arith.constant 0 : index
    %c0_191 = arith.constant 0 : index
    %c0_192 = arith.constant 0 : index
    %293 = vector.load %arg49[%c0_190, %c0_191, %c0_192] : memref<1x2x8xf32, #tpu.memory_space<vmem>>, vector<1x2x8xf32>
    %294 = vector.shape_cast %293 : vector<1x2x8xf32> to vector<2x8xf32>
    %295 = vector.shape_cast %49 : vector<2x8xf32> to vector<1x2x8xf32>
    tpu.vector_store %arg49[%c0_190, %c0_191, %c0_192], %295 {strides = array<i32>} : memref<1x2x8xf32, #tpu.memory_space<vmem>>, vector<1x2x8xf32>,
    %c0_193 = arith.constant 0 : index
    %c0_194 = arith.constant 0 : index
    %c0_195 = arith.constant 0 : index
    %296 = vector.load %arg50[%c0_193, %c0_194, %c0_195] : memref<1x2x8xf32, #tpu.memory_space<vmem>>, vector<1x2x8xf32>
    %297 = vector.shape_cast %296 : vector<1x2x8xf32> to vector<2x8xf32>
    %298 = vector.shape_cast %62 : vector<2x8xf32> to vector<1x2x8xf32>
    tpu.vector_store %arg50[%c0_193, %c0_194, %c0_195], %298 {strides = array<i32>} : memref<1x2x8xf32, #tpu.memory_space<vmem>>, vector<1x2x8xf32>,
    %c0_196 = arith.constant 0 : index
    %c0_197 = arith.constant 0 : index
    %c0_198 = arith.constant 0 : index
    %299 = vector.load %arg51[%c0_196, %c0_197, %c0_198] : memref<1x2x16xf32, #tpu.memory_space<vmem>>, vector<1x2x16xf32>
    %300 = vector.shape_cast %299 : vector<1x2x16xf32> to vector<2x16xf32>
    %301 = vector.shape_cast %108 : vector<2x16xf32> to vector<1x2x16xf32>
    tpu.vector_store %arg51[%c0_196, %c0_197, %c0_198], %301 {strides = array<i32>} : memref<1x2x16xf32, #tpu.memory_space<vmem>>, vector<1x2x16xf32>,
    %c0_199 = arith.constant 0 : index
    %c0_200 = arith.constant 0 : index
    %c0_201 = arith.constant 0 : index
    %302 = vector.load %arg52[%c0_199, %c0_200, %c0_201] : memref<1x2x16xf32, #tpu.memory_space<vmem>>, vector<1x2x16xf32>
    %303 = vector.shape_cast %302 : vector<1x2x16xf32> to vector<2x16xf32>
    %304 = vector.shape_cast %142 : vector<2x16xf32> to vector<1x2x16xf32>
    tpu.vector_store %arg52[%c0_199, %c0_200, %c0_201], %304 {strides = array<i32>} : memref<1x2x16xf32, #tpu.memory_space<vmem>>, vector<1x2x16xf32>,
    %c0_202 = arith.constant 0 : index
    %c0_203 = arith.constant 0 : index
    %c0_204 = arith.constant 0 : index
    %305 = vector.load %arg53[%c0_202, %c0_203, %c0_204] : memref<1x2x16xf32, #tpu.memory_space<vmem>>, vector<1x2x16xf32>
    %306 = vector.shape_cast %305 : vector<1x2x16xf32> to vector<2x16xf32>
    %307 = vector.shape_cast %144 : vector<2x16xf32> to vector<1x2x16xf32>
    tpu.vector_store %arg53[%c0_202, %c0_203, %c0_204], %307 {strides = array<i32>} : memref<1x2x16xf32, #tpu.memory_space<vmem>>, vector<1x2x16xf32>,
    %c0_205 = arith.constant 0 : index
    %c0_206 = arith.constant 0 : index
    %c0_207 = arith.constant 0 : index
    %308 = vector.load %arg54[%c0_205, %c0_206, %c0_207] : memref<1x2x16xf32, #tpu.memory_space<vmem>>, vector<1x2x16xf32>
    %309 = vector.shape_cast %308 : vector<1x2x16xf32> to vector<2x16xf32>
    %310 = vector.shape_cast %179 : vector<2x16xf32> to vector<1x2x16xf32>
    tpu.vector_store %arg54[%c0_205, %c0_206, %c0_207], %310 {strides = array<i32>} : memref<1x2x16xf32, #tpu.memory_space<vmem>>, vector<1x2x16xf32>,
    %c0_208 = arith.constant 0 : index
    %c0_209 = arith.constant 0 : index
    %c0_210 = arith.constant 0 : index
    %311 = vector.load %arg55[%c0_208, %c0_209, %c0_210] : memref<1x2x4xf32, #tpu.memory_space<vmem>>, vector<1x2x4xf32>
    %312 = vector.shape_cast %311 : vector<1x2x4xf32> to vector<2x4xf32>
    %313 = vector.shape_cast %214 : vector<2x4xf32> to vector<1x2x4xf32>
    tpu.vector_store %arg55[%c0_208, %c0_209, %c0_210], %313 {strides = array<i32>} : memref<1x2x4xf32, #tpu.memory_space<vmem>>, vector<1x2x4xf32>,
    %c0_211 = arith.constant 0 : index
    %c0_212 = arith.constant 0 : index
    %c0_213 = arith.constant 0 : index
    %314 = vector.load %arg56[%c0_211, %c0_212, %c0_213] : memref<1x1x1xf32, #tpu.memory_space<vmem>>, vector<1x1x1xf32>
    %315 = vector.shape_cast %314 : vector<1x1x1xf32> to vector<1x1xf32>
    %316 = vector.shape_cast %226 : vector<1x1xf32> to vector<1x1x1xf32>
    tpu.vector_store %arg56[%c0_211, %c0_212, %c0_213], %316 {strides = array<i32>} : memref<1x1x1xf32, #tpu.memory_space<vmem>>, vector<1x1x1xf32>,
    %c0_214 = arith.constant 0 : index
    %c0_215 = arith.constant 0 : index
    %c0_216 = arith.constant 0 : index
    %317 = vector.load %arg57[%c0_214, %c0_215, %c0_216] : memref<1x1x1xf32, #tpu.memory_space<vmem>>, vector<1x1x1xf32>
    %318 = vector.shape_cast %317 : vector<1x1x1xf32> to vector<1x1xf32>
    %319 = vector.shape_cast %261 : vector<1x1xf32> to vector<1x1x1xf32>
    tpu.vector_store %arg57[%c0_214, %c0_215, %c0_216], %319 {strides = array<i32>} : memref<1x1x1xf32, #tpu.memory_space<vmem>>, vector<1x1x1xf32>,
    %c0_217 = arith.constant 0 : index
    %c0_218 = arith.constant 0 : index
    %c0_219 = arith.constant 0 : index
    %320 = vector.load %arg58[%c0_217, %c0_218, %c0_219] : memref<1x1x1xf32, #tpu.memory_space<vmem>>, vector<1x1x1xf32>
    %321 = vector.shape_cast %320 : vector<1x1x1xf32> to vector<1x1xf32>
    %322 = vector.shape_cast %272 : vector<1x1xf32> to vector<1x1x1xf32>
    tpu.vector_store %arg58[%c0_217, %c0_218, %c0_219], %322 {strides = array<i32>} : memref<1x1x1xf32, #tpu.memory_space<vmem>>, vector<1x1x1xf32>,
    %c0_220 = arith.constant 0 : index
    %c0_221 = arith.constant 0 : index
    %c0_222 = arith.constant 0 : index
    %323 = vector.load %arg59[%c0_220, %c0_221, %c0_222] : memref<1x1x1xf32, #tpu.memory_space<vmem>>, vector<1x1x1xf32>
    %324 = vector.shape_cast %323 : vector<1x1x1xf32> to vector<1x1xf32>
    %325 = vector.shape_cast %280 : vector<1x1xf32> to vector<1x1x1xf32>
    tpu.vector_store %arg59[%c0_220, %c0_221, %c0_222], %325 {strides = array<i32>} : memref<1x1x1xf32, #tpu.memory_space<vmem>>, vector<1x1x1xf32>,
    return
  }
  func.func @transform_0(%arg0: i32) -> (i32, i32, i32) {
    %c0_i32 = arith.constant 0 : i32
    %c0_i32_0 = arith.constant 0 : i32
    %c0_i32_1 = arith.constant 0 : i32
    return %arg0, %c0_i32, %c0_i32_0 : i32, i32, i32
  }
  func.func @transform_1(%arg0: i32) -> (i32, i32, i32) {
    %c0_i32 = arith.constant 0 : i32
    %c0_i32_0 = arith.constant 0 : i32
    %c0_i32_1 = arith.constant 0 : i32
    return %arg0, %c0_i32, %c0_i32_0 : i32, i32, i32
  }
  func.func @transform_2(%arg0: i32) -> (i32, i32, i32) {
    %c0_i32 = arith.constant 0 : i32
    %c0_i32_0 = arith.constant 0 : i32
    %c0_i32_1 = arith.constant 0 : i32
    return %arg0, %c0_i32, %c0_i32_0 : i32, i32, i32
  }
  func.func @transform_3(%arg0: i32) -> (i32, i32, i32) {
    %c0_i32 = arith.constant 0 : i32
    %c0_i32_0 = arith.constant 0 : i32
    %c0_i32_1 = arith.constant 0 : i32
    return %arg0, %c0_i32, %c0_i32_0 : i32, i32, i32
  }
  func.func @transform_4(%arg0: i32) -> (i32, i32, i32) {
    %c0_i32 = arith.constant 0 : i32
    %c0_i32_0 = arith.constant 0 : i32
    %c0_i32_1 = arith.constant 0 : i32
    return %arg0, %c0_i32, %c0_i32_0 : i32, i32, i32
  }
  func.func @transform_5(%arg0: i32) -> (i32, i32, i32) {
    %c0_i32 = arith.constant 0 : i32
    %c0_i32_0 = arith.constant 0 : i32
    %c0_i32_1 = arith.constant 0 : i32
    return %arg0, %c0_i32, %c0_i32_0 : i32, i32, i32
  }
  func.func @transform_6(%arg0: i32) -> (i32, i32) {
    %c0_i32 = arith.constant 0 : i32
    %c0_i32_0 = arith.constant 0 : i32
    %c0_i32_1 = arith.constant 0 : i32
    return %c0_i32, %c0_i32_0 : i32, i32
  }
  func.func @transform_7(%arg0: i32) -> (i32, i32) {
    %c0_i32 = arith.constant 0 : i32
    %c0_i32_0 = arith.constant 0 : i32
    %c0_i32_1 = arith.constant 0 : i32
    return %c0_i32, %c0_i32_0 : i32, i32
  }
  func.func @transform_8(%arg0: i32) -> (i32, i32) {
    %c0_i32 = arith.constant 0 : i32
    %c0_i32_0 = arith.constant 0 : i32
    %c0_i32_1 = arith.constant 0 : i32
    return %c0_i32, %c0_i32_0 : i32, i32
  }
  func.func @transform_9(%arg0: i32) -> (i32, i32) {
    %c0_i32 = arith.constant 0 : i32
    %c0_i32_0 = arith.constant 0 : i32
    %c0_i32_1 = arith.constant 0 : i32
    return %c0_i32, %c0_i32_0 : i32, i32
  }
  func.func @transform_10(%arg0: i32) -> (i32, i32) {
    %c0_i32 = arith.constant 0 : i32
    %c0_i32_0 = arith.constant 0 : i32
    %c0_i32_1 = arith.constant 0 : i32
    return %c0_i32, %c0_i32_0 : i32, i32
  }
  func.func @transform_11(%arg0: i32) -> (i32, i32, i32) {
    %c0_i32 = arith.constant 0 : i32
    %c0_i32_0 = arith.constant 0 : i32
    %c0_i32_1 = arith.constant 0 : i32
    return %arg0, %c0_i32, %c0_i32_0 : i32, i32, i32
  }
  func.func @transform_12(%arg0: i32) -> (i32, i32, i32) {
    %c0_i32 = arith.constant 0 : i32
    %c0_i32_0 = arith.constant 0 : i32
    %c0_i32_1 = arith.constant 0 : i32
    return %arg0, %c0_i32, %c0_i32_0 : i32, i32, i32
  }
  func.func @transform_13(%arg0: i32) -> (i32, i32, i32) {
    %c0_i32 = arith.constant 0 : i32
    %c0_i32_0 = arith.constant 0 : i32
    %c0_i32_1 = arith.constant 0 : i32
    return %arg0, %c0_i32, %c0_i32_0 : i32, i32, i32
  }
  func.func @transform_14(%arg0: i32) -> (i32, i32, i32) {
    %c0_i32 = arith.constant 0 : i32
    %c0_i32_0 = arith.constant 0 : i32
    %c0_i32_1 = arith.constant 0 : i32
    return %arg0, %c0_i32, %c0_i32_0 : i32, i32, i32
  }
  func.func @transform_15(%arg0: i32) -> (i32, i32, i32) {
    %c0_i32 = arith.constant 0 : i32
    %c0_i32_0 = arith.constant 0 : i32
    %c0_i32_1 = arith.constant 0 : i32
    return %arg0, %c0_i32, %c0_i32_0 : i32, i32, i32
  }
  func.func @transform_16(%arg0: i32) -> (i32, i32, i32) {
    %c0_i32 = arith.constant 0 : i32
    %c0_i32_0 = arith.constant 0 : i32
    %c0_i32_1 = arith.constant 0 : i32
    return %arg0, %c0_i32, %c0_i32_0 : i32, i32, i32
  }
  func.func @transform_17(%arg0: i32) -> (i32, i32, i32) {
    %c0_i32 = arith.constant 0 : i32
    %c0_i32_0 = arith.constant 0 : i32
    %c0_i32_1 = arith.constant 0 : i32
    return %arg0, %c0_i32, %c0_i32_0 : i32, i32, i32
  }
  func.func @transform_18(%arg0: i32) -> (i32, i32, i32) {
    %c0_i32 = arith.constant 0 : i32
    %c0_i32_0 = arith.constant 0 : i32
    %c0_i32_1 = arith.constant 0 : i32
    return %arg0, %c0_i32, %c0_i32_0 : i32, i32, i32
  }
  func.func @transform_19(%arg0: i32) -> (i32, i32, i32) {
    %c0_i32 = arith.constant 0 : i32
    %c0_i32_0 = arith.constant 0 : i32
    %c0_i32_1 = arith.constant 0 : i32
    return %arg0, %c0_i32, %c0_i32_0 : i32, i32, i32
  }
  func.func @transform_20(%arg0: i32) -> (i32, i32, i32) {
    %c0_i32 = arith.constant 0 : i32
    %c0_i32_0 = arith.constant 0 : i32
    %c0_i32_1 = arith.constant 0 : i32
    return %arg0, %c0_i32, %c0_i32_0 : i32, i32, i32
  }
  func.func @transform_21(%arg0: i32) -> (i32, i32, i32) {
    %c0_i32 = arith.constant 0 : i32
    %c0_i32_0 = arith.constant 0 : i32
    %c0_i32_1 = arith.constant 0 : i32
    return %arg0, %c0_i32, %c0_i32_0 : i32, i32, i32
  }
  func.func @transform_22(%arg0: i32) -> (i32, i32, i32) {
    %c0_i32 = arith.constant 0 : i32
    %c0_i32_0 = arith.constant 0 : i32
    %c0_i32_1 = arith.constant 0 : i32
    return %arg0, %c0_i32, %c0_i32_0 : i32, i32, i32
  }
  func.func @transform_23(%arg0: i32) -> (i32, i32, i32) {
    %c0_i32 = arith.constant 0 : i32
    %c0_i32_0 = arith.constant 0 : i32
    %c0_i32_1 = arith.constant 0 : i32
    return %arg0, %c0_i32, %c0_i32_0 : i32, i32, i32
  }
  func.func @transform_24(%arg0: i32) -> (i32, i32, i32) {
    %c0_i32 = arith.constant 0 : i32
    %c0_i32_0 = arith.constant 0 : i32
    %c0_i32_1 = arith.constant 0 : i32
    return %arg0, %c0_i32, %c0_i32_0 : i32, i32, i32
  }
  func.func @transform_25(%arg0: i32) -> (i32, i32, i32) {
    %c0_i32 = arith.constant 0 : i32
    %c0_i32_0 = arith.constant 0 : i32
    %c0_i32_1 = arith.constant 0 : i32
    return %arg0, %c0_i32, %c0_i32_0 : i32, i32, i32
  }
  func.func @transform_26(%arg0: i32) -> (i32, i32, i32) {
    %c0_i32 = arith.constant 0 : i32
    %c0_i32_0 = arith.constant 0 : i32
    %c0_i32_1 = arith.constant 0 : i32
    return %arg0, %c0_i32, %c0_i32_0 : i32, i32, i32
  }
  func.func @transform_27(%arg0: i32) -> (i32, i32, i32) {
    %c0_i32 = arith.constant 0 : i32
    %c0_i32_0 = arith.constant 0 : i32
    %c0_i32_1 = arith.constant 0 : i32
    return %arg0, %c0_i32, %c0_i32_0 : i32, i32, i32
  }
  func.func @transform_28(%arg0: i32) -> (i32, i32, i32) {
    %c0_i32 = arith.constant 0 : i32
    %c0_i32_0 = arith.constant 0 : i32
    %c0_i32_1 = arith.constant 0 : i32
    return %arg0, %c0_i32, %c0_i32_0 : i32, i32, i32
  }
  func.func @transform_29(%arg0: i32) -> (i32, i32, i32) {
    %c0_i32 = arith.constant 0 : i32
    %c0_i32_0 = arith.constant 0 : i32
    %c0_i32_1 = arith.constant 0 : i32
    return %arg0, %c0_i32, %c0_i32_0 : i32, i32, i32
  }
  func.func @transform_30(%arg0: i32) -> (i32, i32, i32) {
    %c0_i32 = arith.constant 0 : i32
    %c0_i32_0 = arith.constant 0 : i32
    %c0_i32_1 = arith.constant 0 : i32
    return %arg0, %c0_i32, %c0_i32_0 : i32, i32, i32
  }
  func.func @transform_31(%arg0: i32) -> (i32, i32, i32) {
    %c0_i32 = arith.constant 0 : i32
    %c0_i32_0 = arith.constant 0 : i32
    %c0_i32_1 = arith.constant 0 : i32
    return %arg0, %c0_i32, %c0_i32_0 : i32, i32, i32
  }
  func.func @transform_32(%arg0: i32) -> (i32, i32, i32) {
    %c0_i32 = arith.constant 0 : i32
    %c0_i32_0 = arith.constant 0 : i32
    %c0_i32_1 = arith.constant 0 : i32
    return %arg0, %c0_i32, %c0_i32_0 : i32, i32, i32
  }
  func.func @transform_33(%arg0: i32) -> (i32, i32, i32) {
    %c0_i32 = arith.constant 0 : i32
    %c0_i32_0 = arith.constant 0 : i32
    %c0_i32_1 = arith.constant 0 : i32
    return %arg0, %c0_i32, %c0_i32_0 : i32, i32, i32
  }
  func.func @transform_34(%arg0: i32) -> (i32, i32, i32) {
    %c0_i32 = arith.constant 0 : i32
    %c0_i32_0 = arith.constant 0 : i32
    %c0_i32_1 = arith.constant 0 : i32
    return %arg0, %c0_i32, %c0_i32_0 : i32, i32, i32
  }
  func.func @transform_35(%arg0: i32) -> (i32, i32, i32) {
    %c0_i32 = arith.constant 0 : i32
    %c0_i32_0 = arith.constant 0 : i32
    %c0_i32_1 = arith.constant 0 : i32
    return %arg0, %c0_i32, %c0_i32_0 : i32, i32, i32
  }
  func.func @transform_36(%arg0: i32) -> (i32, i32, i32) {
    %c0_i32 = arith.constant 0 : i32
    %c0_i32_0 = arith.constant 0 : i32
    %c0_i32_1 = arith.constant 0 : i32
    return %arg0, %c0_i32, %c0_i32_0 : i32, i32, i32
  }
  func.func @transform_37(%arg0: i32) -> (i32, i32, i32) {
    %c0_i32 = arith.constant 0 : i32
    %c0_i32_0 = arith.constant 0 : i32
    %c0_i32_1 = arith.constant 0 : i32
    return %arg0, %c0_i32, %c0_i32_0 : i32, i32, i32
  }
  func.func @transform_38(%arg0: i32) -> (i32, i32) {
    %c0_i32 = arith.constant 0 : i32
    %c0_i32_0 = arith.constant 0 : i32
    %c0_i32_1 = arith.constant 0 : i32
    return %c0_i32, %c0_i32_0 : i32, i32
  }
  func.func @transform_39(%arg0: i32) -> (i32, i32) {
    %c0_i32 = arith.constant 0 : i32
    %c0_i32_0 = arith.constant 0 : i32
    %c0_i32_1 = arith.constant 0 : i32
    return %c0_i32, %c0_i32_0 : i32, i32
  }
  func.func @transform_40(%arg0: i32) -> (i32, i32) {
    %c0_i32 = arith.constant 0 : i32
    %c0_i32_0 = arith.constant 0 : i32
    %c0_i32_1 = arith.constant 0 : i32
    return %c0_i32, %c0_i32_0 : i32, i32
  }
  func.func @transform_41(%arg0: i32) -> (i32, i32) {
    %c0_i32 = arith.constant 0 : i32
    %c0_i32_0 = arith.constant 0 : i32
    %c0_i32_1 = arith.constant 0 : i32
    return %c0_i32, %c0_i32_0 : i32, i32
  }
  func.func @transform_42(%arg0: i32) -> (i32, i32) {
    %c0_i32 = arith.constant 0 : i32
    %c0_i32_0 = arith.constant 0 : i32
    %c0_i32_1 = arith.constant 0 : i32
    return %c0_i32, %c0_i32_0 : i32, i32
  }
  func.func @transform_43(%arg0: i32) -> (i32, i32) {
    %c0_i32 = arith.constant 0 : i32
    %c0_i32_0 = arith.constant 0 : i32
    %c0_i32_1 = arith.constant 0 : i32
    return %c0_i32, %c0_i32_0 : i32, i32
  }
  func.func @transform_44(%arg0: i32) -> (i32, i32, i32) {
    %c0_i32 = arith.constant 0 : i32
    %c0_i32_0 = arith.constant 0 : i32
    %c0_i32_1 = arith.constant 0 : i32
    return %arg0, %c0_i32, %c0_i32_0 : i32, i32, i32
  }
  func.func @transform_45(%arg0: i32) -> (i32, i32, i32) {
    %c0_i32 = arith.constant 0 : i32
    %c0_i32_0 = arith.constant 0 : i32
    %c0_i32_1 = arith.constant 0 : i32
    return %arg0, %c0_i32, %c0_i32_0 : i32, i32, i32
  }
  func.func @transform_46(%arg0: i32) -> (i32, i32, i32) {
    %c0_i32 = arith.constant 0 : i32
    %c0_i32_0 = arith.constant 0 : i32
    %c0_i32_1 = arith.constant 0 : i32
    return %arg0, %c0_i32, %c0_i32_0 : i32, i32, i32
  }
  func.func @transform_47(%arg0: i32) -> (i32, i32, i32) {
    %c0_i32 = arith.constant 0 : i32
    %c0_i32_0 = arith.constant 0 : i32
    %c0_i32_1 = arith.constant 0 : i32
    return %arg0, %c0_i32, %c0_i32_0 : i32, i32, i32
  }
  func.func @transform_48(%arg0: i32) -> (i32, i32, i32) {
    %c0_i32 = arith.constant 0 : i32
    %c0_i32_0 = arith.constant 0 : i32
    %c0_i32_1 = arith.constant 0 : i32
    return %arg0, %c0_i32, %c0_i32_0 : i32, i32, i32
  }
  func.func @transform_49(%arg0: i32) -> (i32, i32, i32) {
    %c0_i32 = arith.constant 0 : i32
    %c0_i32_0 = arith.constant 0 : i32
    %c0_i32_1 = arith.constant 0 : i32
    return %arg0, %c0_i32, %c0_i32_0 : i32, i32, i32
  }
  func.func @transform_50(%arg0: i32) -> (i32, i32, i32) {
    %c0_i32 = arith.constant 0 : i32
    %c0_i32_0 = arith.constant 0 : i32
    %c0_i32_1 = arith.constant 0 : i32
    return %arg0, %c0_i32, %c0_i32_0 : i32, i32, i32
  }
  func.func @transform_51(%arg0: i32) -> (i32, i32, i32) {
    %c0_i32 = arith.constant 0 : i32
    %c0_i32_0 = arith.constant 0 : i32
    %c0_i32_1 = arith.constant 0 : i32
    return %arg0, %c0_i32, %c0_i32_0 : i32, i32, i32
  }
  func.func @transform_52(%arg0: i32) -> (i32, i32, i32) {
    %c0_i32 = arith.constant 0 : i32
    %c0_i32_0 = arith.constant 0 : i32
    %c0_i32_1 = arith.constant 0 : i32
    return %arg0, %c0_i32, %c0_i32_0 : i32, i32, i32
  }
  func.func @transform_53(%arg0: i32) -> (i32, i32, i32) {
    %c0_i32 = arith.constant 0 : i32
    %c0_i32_0 = arith.constant 0 : i32
    %c0_i32_1 = arith.constant 0 : i32
    return %arg0, %c0_i32, %c0_i32_0 : i32, i32, i32
  }
  func.func @transform_54(%arg0: i32) -> (i32, i32, i32) {
    %c0_i32 = arith.constant 0 : i32
    %c0_i32_0 = arith.constant 0 : i32
    %c0_i32_1 = arith.constant 0 : i32
    return %arg0, %c0_i32, %c0_i32_0 : i32, i32, i32
  }
  func.func @transform_55(%arg0: i32) -> (i32, i32, i32) {
    %c0_i32 = arith.constant 0 : i32
    %c0_i32_0 = arith.constant 0 : i32
    %c0_i32_1 = arith.constant 0 : i32
    return %arg0, %c0_i32, %c0_i32_0 : i32, i32, i32
  }
  func.func @transform_56(%arg0: i32) -> (i32, i32, i32) {
    %c0_i32 = arith.constant 0 : i32
    %c0_i32_0 = arith.constant 0 : i32
    %c0_i32_1 = arith.constant 0 : i32
    return %arg0, %c0_i32, %c0_i32_0 : i32, i32, i32
  }
  func.func @transform_57(%arg0: i32) -> (i32, i32, i32) {
    %c0_i32 = arith.constant 0 : i32
    %c0_i32_0 = arith.constant 0 : i32
    %c0_i32_1 = arith.constant 0 : i32
    return %arg0, %c0_i32, %c0_i32_0 : i32, i32, i32
  }
  func.func @transform_58(%arg0: i32) -> (i32, i32, i32) {
    %c0_i32 = arith.constant 0 : i32
    %c0_i32_0 = arith.constant 0 : i32
    %c0_i32_1 = arith.constant 0 : i32
    return %arg0, %c0_i32, %c0_i32_0 : i32, i32, i32
  }
}

</mosaic_0001>

<bundles_post_ra>
// kernel: custom-call.11
= control target key start
LH: loop header
LB: loop body
LE: loop exit
PB: predicated region body
PF: predicated region fallthrough
CT: control target
= control target key end

     0   :  { %5 = vsyncpa [#allocation4], 0  ;;  %s963_s0 = inlined_call_operand.vmem [shape: f32[2,16,16], index: 0, kind: input, shape index: {}]   ;;  %s964_s1 = inlined_call_operand.vmem [shape: f32[2,16,16], index: 1, kind: output, shape index: {0}]   ;;  %s965_s2 = inlined_call_operand.hbm [shape: s32[2,16], index: 2, kind: output, shape index: {1}]   ;;  %s966_s3 = inlined_call_operand.vmem [shape: s32[2,16], index: 3, kind: output, shape index: {2}]  }
   0x1   :  { %7 = vsyncpa [#allocation4 + $0x1], 0  ;;  %s755_s12 = smov 0   ;;  %s757_s13 = smov 0  }
   0x2   :  { %s759_s14 = smov 0   ;;  %s761_s15 = smov 0  }
   0x3 LB: > { %s776_s16 = sadd.s32 4294967295, %s723_s15   ;;  %s565_s17 = sadd.s32 4294967294, %s723_s15   ;;  %s723_s15 = sphi %s761_s15, %s974_s15   ;;  %s719_s14 = sphi %s759_s14, %s973_s14   ;;  %s715_s13 = sphi %s757_s13, %s972_s13   ;;  %s711_s12 = sphi %s755_s12, %s971_s12  }
   0x4   : > { %s780_s18 = sadd.s32 1, %s723_s15   ;;  %s17_s19 = sshrl.u32 %s723_s15, 3 }
   0x5   : > { %s18_s20 = sshrl.u32 %s780_s18, 3  ;;  %s22_s21 = sadd.s32 1, %s719_s14 }
   0x6   : > { %s19_s22 = ssub.s32 %s17_s19, %s18_s20  ;;  %p32_p0 = scmp.ne.s32.totalorder %s719_s14, %s715_s13 }
   0x7   : > { %p20_p1 = scmp.eq.s32.totalorder %s19_s22, 0  ;;  %p33_p2 = scmp.eq.s32.totalorder %s776_s16, 1 }
   0x8   : > { %p38_p3 = scmp.ne.s32.totalorder %s715_s13, %s711_s12  ;;  %p39_p4 = scmp.eq.s32.totalorder %s565_s17, 1 }
   0x9   : > { %s791_s23 = scalar_select %p20_p1, %s719_s14, %s22_s21  }
   0xa   : > { %p793_p5 = por %p33_p2, %p32_p0  ;;  %p797_p6 = por %p39_p4, %p38_p3 }
   0xb   : > { %p567_p7 = scmp.ge.s32.totalorder %s723_s15, 2 }
   0xc   : > { %s85_s26 = sand.u32 (!%p567_p7), 1, %s723_s15   ;;  %s569_s27 = sshll.u32 (!%p567_p7), %s723_s15, 4 }
   0xd   : > { %83 = sbr.rel (%p567_p7) target bundleno = 20 (0x14), region = 16  ;;  %s568_s28 = sshll.u32 (!%p567_p7), %s85_s26, 4 }
   0xe   : > { %s89_s4 = scalar_lea.vmem (!%p567_p7), %s963_s0, %s569_s27  ;;  %s87_s5 = scalar_lea.vmem (!%p567_p7), [#allocation0], %s568_s28 }
   0xf   : > { %v102_v0 = vld [vmem:[%s89_s4] sm:$0xff] (!%p567_p7)  ;;  %v104_v1 = vld [vmem:[%s89_s4 + $0x8] sm:$0xff] (!%p567_p7) }
  0x10   : > { %103 = vst [vmem:[%s87_s5] sm:$0xff] (!%p567_p7), %v102_v0  ;;  %105 = vst [vmem:[%s87_s5 + $0x8] sm:$0xff] (!%p567_p7), %v104_v1 }
  0x14 PF: > { %p570_p8 = scmp.ge.s32.totalorder %s723_s15, 1  ;;  %p110_p9 = scmp.lt.s32.totalorder %s723_s15, 3 }
  0x16   : > { %p111_p10 = pnand %p570_p8, %p110_p9 }
  0x18   : > { %114 = sbr.rel (%p111_p10) target bundleno = 450 (0x1c2), region = 39 }
  0x1f   : > { %s117_s6 = sand.u32 1, %s776_s16   ;;  %s132_s7 = sand.u32 1, %s715_s13   ;;  %v154_v2 = vlaneseq  ;;  %v733_v6 = vmov 0  }
  0x20   : > { %s571_s8 = sshll.u32 %s117_s6, 4  ;;  %s815_s9 = sshll.u32 %s132_s7, 1 }
  0x21   : > { %v818_v3 = vshrl.u32 %v154_v2, 7  ;;  %s119_s10 = scalar_lea.vmem [#allocation0], %s571_s8  ;;  %s820_s11 = scalar_lea.vmem [#allocation1], %s571_s8 }
  0x22   : > { %v143_v4 = vld [vmem:[%s119_s10] sm:$0xff]  ;;  %v575_v5 = vld [vmem:[%s119_s10 + $0x8] sm:$0xff]  ;;  %s149_s17 = sand.u32 7, %s776_s16   ;;  %s134_s20 = scalar_lea.vmem [#allocation3], %s815_s9 }
  0x23   : > { %144 = vst [vmem:[%s820_s11] sm:$0xff] %v143_v4  ;;  %576 = vst [vmem:[%s820_s11 + $0x8] sm:$0xff] %v575_v5  ;;  %s825_s19 = scalar_lea.vmem [#allocation2], %s149_s17  ;;  %s140_s21 = scalar_lea.vmem [#allocation6], %s815_s9 }
  0x24   : > { %153 = vst [vmem:[%s825_s19] sm:$0x1] %v733_v6  ;;  %s830_s22 = scalar_lea.vmem [#allocation5], %s149_s17  ;;  %s725_s26 = smov 0  }
  0x25 LB: >> { %s577_s27 = sshll.u32 %s727_s26, 3  ;;  %s162_s26 = sadd.s32 1, %s727_s26   ;;  %s727_s26 = sphi %s725_s26, %s162_s26  }
  0x26   : >> { %v166_v7 = vstv %s577_s27  ;;  %s164_s28 = scalar_lea.vmem [#allocation7], %s577_s27  ;;  %p159_p11 = scmp.ge.s32.totalorder %s162_s26, 2  }
  0x27   : >> { %v167_v8 = vadd.s32 %v166_v7, %v818_v3  ;;  %s833_s29 = smov (%p159_p11), 0  }
  0x28   : > { %161 = sbr.rel (!%p159_p11) target bundleno = 37 (0x25), region = 191 }
  0x29   : >> { %168 = vst [vmem:[%s164_s28] sm:$0xff] %v167_v8 }
  0x2f LB: >> { %v179_v9 = vld [vmem:[%s820_s11] sm:$0xff]  ;;  %v580_v10 = vld [vmem:[%s820_s11 + $0x8] sm:$0xff]  ;;  %v841_v11 = vadd.s32 8, %v818_v3  ;;  %v844_v13 = vstv %s731_s29  ;;  %s237_s30 = ssub.s32 128, %s731_s29  ;;  %v243_v46 = vand.u32 127, %v154_v2  ;;  %s249_s4 = scalar_lea.vmem %s820_s11, %s731_s29 [#allocation1]  ;;  %s731_s29 = sphi %s833_s29, %s174_s29  }
  0x30   : >> { %v180_v12 = vand.u32 2147483647, %v179_v9  ;;  %v192_v14 = vand.u32 2147483647, %v580_v10  ;;  %vm183_vm0 = vcmp.ge.s32.totalorder %v818_v3, %v844_v13  ;;  %v246_v49 = vld [vmem:[%s825_s19] ss:$0 sm:$0xff] }
  0x31   : >> { %vm195_vm3 = vcmp.ge.s32.totalorder %v841_v11, %v844_v13  ;;  %vm267_vm13 = vcmp.gt.s32.totalorder %v243_v46, %v844_v13  ;;  %vm290_vm14 = vcmp.gt.s32.totalorder %v841_v11, %v844_v13  ;;  %vm244_vm15 = vcmp.eq.s32.totalorder %v243_v46, %v844_v13  ;;  %v251_v50 = vld [vmem:[%s249_s4] ss:$0 sm:$0xff]  ;;  %s255_s6 = scalar_lea.vmem [#allocation7], %s731_s29  ;;  %s174_s29 = sadd.s32 1, %s731_s29  }
  0x32   : >> { %vm579_vm1 = vcmp.gt.f32.partialorder %v180_v12, -inf  ;;  %v257_v51 = vld [vmem:[%s255_s6] ss:$0 sm:$0xff]  ;;  %p171_p12 = scmp.ge.s32.totalorder %s174_s29, 16  }
  0x33   : >> { %vm187_vm2 = vmand %vm183_vm0, %vm579_vm1  ;;  %s400_s17 = sshrl.u32 (%p171_p12), %s776_s16, 3  ;;  %s586_s26 = sshll.u32 (%p171_p12), %s776_s16, 4 }
  0x34   : >> { %v188_v15 = vsel %vm187_vm2, %v818_v3, %v844_v13  ;;  %v189_v16 = vsel %vm187_vm2, %v180_v12, -inf  ;;  %vm864_vm0 = vmand %vm290_vm14, %vm244_vm15  ;;  %vm275_vm2 = vcmp.gt.s32.totalorder %v818_v3, %v844_v13  ;;  %s587_s27 = sshll.u32 (%p171_p12), %s400_s17, 5  ;;  %s377_s29 = scalar_lea.vmem (%p171_p12), %s964_s1, %s586_s26 }
  0x35   : >> { %vm198_vm4 = vcmp.lt.f32.partialorder %v189_v16, %v192_v14  ;;  %s734_s26 = smov (%p171_p12), [#allocation3]  }
  0x36   : >> { %vm199_vm5 = vmand %vm195_vm3, %vm198_vm4 }
  0x37   : >> { %v200_v17 = vsel %vm199_vm5, %v841_v11, %v188_v15  ;;  %v201_v18 = vsel %vm199_vm5, %v192_v14, %v189_v16  ;;  %vm279_vm4 = vmand %vm275_vm2, %vm244_vm15 }
  0x38   : >> { %v202_v19 = vrot.slane %v201_v18, 1  ;;  %v203_v20 = vrot.slane %v200_v17, 1 }
  0x3a   : >> { %vm204_vm6 = vcmp.ge.f32.partialorder %v202_v19, %v201_v18  ;;  %v207_v21 = vrot.slane %v202_v19, 1  ;;  %v208_v22 = vrot.slane %v203_v20, 1 }
  0x3b   : >> { %v205_v23 = vsel %vm204_vm6, %v202_v19, %v201_v18  ;;  %v206_v24 = vsel %vm204_vm6, %v203_v20, %v200_v17 }
  0x3c   : >> { %vm209_vm7 = vcmp.ge.f32.partialorder %v207_v21, %v205_v23  ;;  %v212_v25 = vrot.slane %v207_v21, 1  ;;  %v213_v26 = vrot.slane %v208_v22, 1 }
  0x3d   : >> { %v210_v27 = vsel %vm209_vm7, %v207_v21, %v205_v23  ;;  %v211_v28 = vsel %vm209_vm7, %v208_v22, %v206_v24 }
  0x3e   : >> { %vm214_vm8 = vcmp.ge.f32.partialorder %v212_v25, %v210_v27  ;;  %v217_v29 = vrot.slane %v212_v25, 1  ;;  %v218_v30 = vrot.slane %v213_v26, 1 }
  0x3f   : >> { %v215_v31 = vsel %vm214_vm8, %v212_v25, %v210_v27  ;;  %v216_v32 = vsel %vm214_vm8, %v213_v26, %v211_v28 }
  0x40   : >> { %vm219_vm9 = vcmp.ge.f32.partialorder %v217_v29, %v215_v31  ;;  %v222_v33 = vrot.slane %v217_v29, 1  ;;  %v223_v34 = vrot.slane %v218_v30, 1 }
  0x41   : >> { %v220_v35 = vsel %vm219_vm9, %v217_v29, %v215_v31  ;;  %v221_v36 = vsel %vm219_vm9, %v218_v30, %v216_v32 }
  0x42   : >> { %vm224_vm10 = vcmp.ge.f32.partialorder %v222_v33, %v220_v35  ;;  %v227_v37 = vrot.slane %v222_v33, 1  ;;  %v228_v38 = vrot.slane %v223_v34, 1 }
  0x43   : >> { %v225_v39 = vsel %vm224_vm10, %v222_v33, %v220_v35  ;;  %v226_v40 = vsel %vm224_vm10, %v223_v34, %v221_v36 }
  0x44   : >> { %vm229_vm11 = vcmp.ge.f32.partialorder %v227_v37, %v225_v39  ;;  %v232_v41 = vrot.slane %v227_v37, 1  ;;  %v233_v42 = vrot.slane %v228_v38, 1 }
  0x45   : >> { %v230_v43 = vsel %vm229_vm11, %v227_v37, %v225_v39  ;;  %v231_v44 = vsel %vm229_vm11, %v228_v38, %v226_v40 }
  0x46   : >> { %vm234_vm12 = vcmp.ge.f32.partialorder %v232_v41, %v230_v43 }
  0x47   : >> { %v236_v45 = vsel %vm234_vm12, %v233_v42, %v231_v44 }
  0x48   : >> { %238 = vrot.lane.b32.xlu0 %v236_v45, %s237_s30 }
  0xba   : >> { %v239_v48 = vpop.permute.xlu0 %238 }
  0xbb   : >> { %591 = vpush %v239_v48 }
  0xec   : >> { %s592_s5 = spop %591 }
  0xed   : >> { %v245_v52 = vstv %s592_s5  ;;  %s250_s8 = scalar_lea.vmem %s820_s11, %s592_s5 [#allocation1]  ;;  %s256_s10 = scalar_lea.vmem [#allocation7], %s592_s5 }
  0xee   : >> { %v247_v53 = vsel %vm244_vm15, %v245_v52, %v246_v49  ;;  %v252_v54 = vld [vmem:[%s250_s8] ss:$0 sm:$0xff]  ;;  %s910_s5 = scalar_lea.hbm (%p171_p12), %s965_s2, %s587_s27 }
  0xef   : >> { %v258_v55 = vld [vmem:[%s256_s10] ss:$0 sm:$0xff]  ;;  %248 = vst [vmem:[%s825_s19] sm:$0x1] %v247_v53  ;;  %253 = vst [vmem:[%s250_s8] sm:$0x1] %v251_v50  ;;  %vm261_vm1 = vcmp.ne.f32.partialorder %v252_v54, 0.0  ;;  %v268_v5 = vsel %vm267_vm13, %v252_v54, 0.0 }
  0xf0   : >> { %259 = vst [vmem:[%s256_s10] sm:$0x1] %v257_v51  ;;  %254 = vst [vmem:[%s249_s4] sm:$0x1] %v252_v54  ;;  %s368_s8 = scalar_lea.sflag (%p171_p12), [#allocation4], %s132_s7  ;;  %s657_s19 = sshll.u32 (%p171_p12), %s734_s26, 4  ;;  %s658_s19 = int_to_ptr.vmem [resolvable:$false] %s657_s19 }
  0xf1   : >> { %260 = vst [vmem:[%s255_s6] sm:$0x1] %v258_v55  ;;  %vm262_vm3 = vmand %vm244_vm15, %vm261_vm1  ;;  %s407_s6 = sshll.u32 (%p171_p12), %s134_s20, 4  ;;  %s408_s6 = int_to_ptr.vmem [resolvable:$true] %s407_s6 }
  0xf2   : >> { %v263_v56 = vsel %vm262_vm3, %v252_v54, 1.0  ;;  %s653_s10 = scalar_lea.vmem (%p171_p12), %s408_s6, 32  ;;  %p660_p2 = scmp.lt.s32.totalorder (%p171_p12), %s408_s6, %s658_s19 }
  0xf3   : >> { %v291_v57 = vsel %vm290_vm14, %v263_v56, 1.0  ;;  %v276_v58 = vsel %vm275_vm2, %v263_v56, 1.0  ;;  %p654_p13 = scmp.ne.s32.totalorder (%p171_p12), %s408_s6, %s653_s10 }
  0xf4   : >> { %649 = vrcp.f32 %v291_v57 }
  0xf5   : >> { %651 = vrcp.f32 %v276_v58  ;;  %p655_p0 = pnand (%p171_p12), %p654_p13, %p793_p5 }
  0xf6   : > { %v354_v14 = vld [vmem:[#allocation2] sm:$0x3] (%p171_p12) }
  0xf7   : >> { %v581_v60 = vld [vmem:[%s820_s11 + $0x8] sm:$0xff]  ;;  %v272_v63 = vld [vmem:[%s820_s11] sm:$0xff]  ;;  %356 = vst [vmem:[%s134_s20] sm:$0x3] (%p171_p12), %v354_v14  ;;  %p656_p1 = pneg (%p171_p12), %p655_p0 }
  0xf8   : > { %v301_v12 = vld [vmem:[#allocation7] sm:$0xff] (%p171_p12)  ;;  %v303_v13 = vld [vmem:[#allocation7 + $0x8] sm:$0xff] (%p171_p12) }
  0xfe   : >> { %v650_v59 = vpop.eup %649 }
  0xff   : >> { %v652_v61 = vpop.eup %651  ;;  %v293_v62 = vmul.f32 %v650_v59, %v581_v60 }
 0x100   : >> { %v278_v0 = vmul.f32 %v652_v61, %v272_v63 }
 0x101   : >> { %v295_v1 = vsel %vm864_vm0, %v293_v62, 0.0 }
 0x102   : >> { %296 = vadd.xlane.f32.xlu1 %v295_v1  ;;  %v280_v4 = vsel %vm279_vm4, %v278_v0, 0.0 }
 0x103   : >> { %281 = vadd.xlane.f32.xlu0 %v280_v4 }
 0x130   : > { %318 = vxpose.xlu0.b32.start [1/2] (short) (narrow) (%p171_p12), %v301_v12, 8 }
 0x134   : > { %319 = vxpose.xlu0.b32.end [2/2] (short) (narrow) (%p171_p12), %v303_v13, 8 }
 0x18f   : >> { %v297_v6 = vpop.xlane.xlu1 %296  ;;  %173 = sbr.rel (!%p171_p12) target bundleno = 47 (0x2f), region = 202 }
 0x190   : >> { %v298_v7 = vmul.f32 %v297_v6, %v268_v5  ;;  %v282_v8 = vpop.xlane.xlu0 %281 }
 0x191   : >> { %v283_v9 = vmul.f32 %v282_v8, %v268_v5 }
 0x192   : >> { %v299_v10 = vsub.f32 %v293_v62, %v298_v7 }
 0x193   : >> { %v284_v11 = vsub.f32 %v278_v0, %v283_v9 }
 0x194   : >> { %582 = vst [vmem:[%s820_s11 + $0x8] sm:$0xff] %v299_v10 }
 0x195   : >> { %285 = vst [vmem:[%s820_s11] sm:$0xff] %v284_v11 }
 0x19b   : > { %v392_v3 = vld [vmem:[%s820_s11 + $0x8] sm:$0xff] }
 0x19c   : > { %v390_v2 = vld [vmem:[%s820_s11] sm:$0xff]  ;;  %393 = vst [vmem:[%s377_s29 + $0x8] sm:$0xff] %v392_v3  ;;  %s659_s11 = scalar_lea.vmem %s658_s19, 64 }
 0x19d   : > { %391 = vst [vmem:[%s377_s29] sm:$0xff] %v390_v2  ;;  %p661_p3 = scmp.lt.s32.totalorder %s659_s11, %s653_s10 }
 0x19f   : > { %p662_p4 = por %p661_p3, %p660_p2 }
 0x1a1   : > { %p663_p8 = pnand %p662_p4, %p656_p1 }
 0x1a3   : > { %666 = shalt.err (!%p663_p8)
}
 0x1a4   : > { %s667_s7 = scalar_lea.hbm %s910_s5, 32  ;;  %s671_s28 = scalar_lea.hbm %s965_s2, 32 }
 0x1a5   : > { %p668_p9 = scmp.ne.s32.totalorder %s910_s5, %s667_s7  ;;  %p672_p12 = scmp.lt.u32.totalorder %s910_s5, %s965_s2 }
 0x1a6   : > { %p673_p13 = scmp.lt.u32.totalorder %s671_s28, %s667_s7  ;;  %p675_p1 = scmp.lt.u32.totalorder %s667_s7, %s910_s5 }
 0x1a7   : > { %p669_p10 = pnand %p668_p9, %p793_p5 }
 0x1a8   : > { %p674_p0 = por %p673_p13, %p672_p12 }
 0x1a9   : > { %p670_p11 = pneg %p669_p10 }
 0x1aa   : > { %p676_p2 = por %p675_p1, %p674_p0 }
 0x1ac   : > { %p677_p3 = pnand %p676_p2, %p670_p11 }
 0x1ae   : > { %680 = shalt.err (!%p677_p3)
}
 0x1af   : > { %593 = dma.vmem_to_hbm [thread:$0]  (%p793_p5), %s408_s6, 32, %s910_s5, %s368_s8  }
 0x1b0   : > { %v334_v15 = vpop.trf.xlu0  ;;  %s588_s4 = sshll.u32 (%p793_p5), %s400_s17, 1 }
 0x1b1   : > { %350 = vst [vmem:[%s830_s22] sm:$0x1] %v334_v15  ;;  %s416_s19 = scalar_lea.vmem (%p793_p5), %s966_s3, %s588_s4 }
 0x1b3   : > { %413 = sbr.rel (!%p793_p5) target bundleno = 450 (0x1c2), region = 80 }
 0x1b8   : > { %v360_v16 = vld [vmem:[#allocation5] sm:$0x3] }
 0x1b9   : > { %362 = vst [vmem:[%s140_s21] sm:$0x3] %v360_v16 }
 0x1c0   : > { %v432_v17 = vld [vmem:[%s140_s21] sm:$0x3] }
 0x1c1   : > { %433 = vst [vmem:[%s416_s19] sm:$0x3] %v432_v17 }
 0x1c2 PF: > { %s460_s22 = sand.u32 1, %s711_s12   ;;  %p596_p5 = pnand %p567_p7, %p797_p6 }
 0x1c3   : > { %s461_s24 = scalar_lea.sflag [#allocation4], %s460_s22 }
 0x1c4   : > { %706 = dma.done.wait (!%p596_p5), %s461_s24, 32  }
 0x1c5   : > { %708 = vsyncadd (!%p596_p5), %s461_s24, 4294967264  ;;  %p10_p4 = scmp.ge.s32.totalorder %s780_s18, 4   ;;  %s971_s12 = smov %s715_s13 }
 0x1c6   : > { %s972_s13 = smov %s719_s14  ;;  %s973_s14 = smov %s791_s23 }
 0x1c7   : > { %s974_s15 = smov %s780_s18  ;;  %12 = sbr.rel (!%p10_p4) target bundleno = 3 (0x3), region = 213 }
 0x1ce   :  { %473 = vsyncpa [#allocation4], 1 }
 0x1cf   :  { %475 = vsyncpa [#allocation4 + $0x1], 1 }

// kernel: custom-call.12
= control target key start
LH: loop header
LB: loop body
LE: loop exit
PB: predicated region body
PF: predicated region fallthrough
CT: control target
= control target key end

     0   :  { %s551_s6 = smov 0   ;;  %s553_s7 = smov 0   ;;  %s674_s0 = inlined_call_operand.vmem [shape: f32[2,1,16,16], index: 0, kind: input, shape index: {}]   ;;  %s675_s1 = inlined_call_operand.vmem [shape: f32[2,1,16,16], index: 1, kind: output, shape index: {}]  }
   0x1   :  { %s555_s8 = smov 0  }
   0x2 LB: > { %s467_s9 = sadd.s32 4294967295, %s537_s8   ;;  %s33_s10 = sadd.s32 1, %s533_s7  ;;  %s537_s8 = sphi %s555_s8, %s7_s8   ;;  %s533_s7 = sphi %s553_s7, %s677_s7   ;;  %s529_s6 = sphi %s551_s6, %s676_s6  }
   0x3   : > { %p35_p0 = scmp.ge.s32.totalorder %s33_s10, 2  ;;  %p469_p1 = scmp.ge.s32.totalorder %s537_s8, 2 }
   0x4   : > { %s49_s11 = sand.u32 (!%p469_p1), 1, %s537_s8   ;;  %s483_s12 = sshll.u32 (!%p469_p1), %s533_s7, 4 }
   0x5   : > { %s679_s10 = smov (%p35_p0, %s33_s10), 0  ;;  %47 = sbr.rel (%p469_p1) target bundleno = 12 (0xc), region = 16 }
   0x6   : > { %s470_s13 = sshll.u32 (!%p469_p1), %s49_s11, 4  ;;  %s58_s16 = scalar_lea.vmem (!%p469_p1), %s674_s0, %s483_s12 }
   0x7   : > { %v88_v0 = vld [vmem:[%s58_s16] sm:$0xff] (!%p469_p1)  ;;  %v90_v1 = vld [vmem:[%s58_s16 + $0x8] sm:$0xff] (!%p469_p1)  ;;  %s51_s17 = scalar_lea.vmem (!%p469_p1), [#allocation0], %s470_s13 }
   0x8   : > { %89 = vst [vmem:[%s51_s17] sm:$0xff] (!%p469_p1), %v88_v0  ;;  %91 = vst [vmem:[%s51_s17 + $0x8] sm:$0xff] (!%p469_p1), %v90_v1 }
   0xc PF: > { %p473_p2 = scmp.ge.s32.totalorder %s537_s8, 1  ;;  %p96_p3 = scmp.lt.s32.totalorder %s537_s8, 3 }
   0xe   : > { %p97_p4 = pnand %p473_p2, %p96_p3 }
  0x10   : > { %100 = sbr.rel (%p97_p4) target bundleno = 2375 (0x947), region = 54 }
  0x17   : > { %s103_s18 = sand.u32 1, %s467_s9   ;;  %v114_v2 = vlaneseq  ;;  %v539_v12 = vmov -1.0   ;;  %v540_v49 = vmov 0.0   ;;  %s484_s21 = sshll.u32 %s529_s6, 4 }
  0x18   : > { %s474_s19 = sshll.u32 %s103_s18, 4  ;;  %s367_s24 = scalar_lea.vmem %s675_s1, %s484_s21 }
  0x19   : > { %v578_v3 = vand.u32 127, %v114_v2  ;;  %v580_v4 = vshrl.u32 %v114_v2, 7  ;;  %s584_s20 = scalar_lea.vmem [#allocation0], %s474_s19 }
  0x1a   : > { %v476_v6 = vld [vmem:[%s584_s20 + $0x8] sm:$0xff]  ;;  %v121_v38 = vld [vmem:[%s584_s20] sm:$0xff] }
  0x1b   : > { %vm116_vm0 = vcmp.lt.s32.totalorder %v578_v3, 16  ;;  %v135_v5 = vadd.s32 8, %v580_v4  ;;  %vm162_vm4 = vcmp.eq.s32.totalorder %v578_v3, 15  ;;  %vm170_vm6 = vcmp.eq.s32.totalorder %v578_v3, 14 }
  0x1c   : > { %v163_v13 = vsel %vm162_vm4, 1.0, %v539_v12  ;;  %vm180_vm7 = vcmp.eq.s32.totalorder %v578_v3, 13  ;;  %vm190_vm8 = vcmp.eq.s32.totalorder %v578_v3, 12  ;;  %vm200_vm9 = vcmp.eq.s32.totalorder %v578_v3, 11 }
  0x1d   : > { %vm136_vm1 = vcmp.eq.s32.totalorder %v135_v5, %v578_v3  ;;  %vm141_vm2 = vcmp.le.s32.totalorder %v135_v5, %v578_v3  ;;  %vm159_vm5 = vcmp.eq.s32.totalorder %v578_v3, %v135_v5  ;;  %vm120_vm10 = vcmp.eq.s32.totalorder %v580_v4, %v578_v3 }
  0x1e   : > { %v138_v7 = vsel %vm136_vm1, %v476_v6, 0.0  ;;  %vm142_vm3 = vmand %vm141_vm2, %vm116_vm0  ;;  %v164_v14 = vsel %vm159_vm5, %v163_v13, 0.0  ;;  %v122_v39 = vsel %vm120_vm10, %v121_v38, 0.0  ;;  %vm210_vm11 = vcmp.eq.s32.totalorder %v578_v3, 10 }
  0x1f   : > { %v143_v8 = vsel %vm142_vm3, %v476_v6, 0.0  ;;  %139 = vadd.xlane.f32.xlu0 %v138_v7  ;;  %vm125_vm12 = vcmp.le.s32.totalorder %v580_v4, %v578_v3  ;;  %vm152_vm14 = vcmp.eq.s32.totalorder %v578_v3, %v580_v4  ;;  %vm220_vm15 = vcmp.eq.s32.totalorder %v578_v3, 9 }
  0x20   : > { %vm126_vm13 = vmand %vm125_vm12, %vm116_vm0  ;;  %v153_v50 = vsel %vm152_vm14, -1.0, %v540_v49  ;;  %vm240_vm0 = vcmp.eq.s32.totalorder %v578_v3, 7  ;;  %vm230_vm1 = vcmp.eq.s32.totalorder %v578_v3, 8  ;;  %vm254_vm2 = vcmp.eq.s32.totalorder %v578_v3, 6 }
  0x21   : > { %v127_v46 = vsel %vm126_vm13, %v121_v38, 0.0  ;;  %vm268_vm3 = vcmp.eq.s32.totalorder %v578_v3, 5  ;;  %vm282_vm4 = vcmp.eq.s32.totalorder %v578_v3, 4  ;;  %vm296_vm5 = vcmp.eq.s32.totalorder %v578_v3, 3 }
  0xac   : > { %v591_v9 = vpop.xlane.xlu0 %139 }
  0xad   : > { %511 = vrcp.f32 %v591_v9  ;;  %vm353_vm10 = vweird.f32 %v591_v9 }
  0xb7   : > { %v594_v10 = vpop.eup %511 }
  0xb8   : > { %v145_v11 = vmul.f32 %v594_v10, %v143_v8 }
  0xba   : > { %146 = vst [vmem:[#allocation2 + $0x8] sm:$0xff] %v145_v11 }
  0xc1   : > { %v166_v15 = vld [vmem:[#allocation2 + $0xe] ss:$0 sm:$0xff]  ;;  %v176_v18 = vld [vmem:[#allocation2 + $0xd] ss:$0 sm:$0xff]  ;;  %v186_v23 = vld [vmem:[#allocation2 + $0xc] ss:$0 sm:$0xff] }
  0xc2   : > { %v167_v16 = vxor.u32 2147483648, %v166_v15  ;;  %v177_v20 = vxor.u32 2147483648, %v176_v18  ;;  %v187_v25 = vxor.u32 2147483648, %v186_v23  ;;  %v196_v28 = vld [vmem:[#allocation2 + $0xb] ss:$0 sm:$0xff] }
  0xc3   : > { %v197_v30 = vxor.u32 2147483648, %v196_v28  ;;  %v206_v33 = vld [vmem:[#allocation2 + $0xa] ss:$0 sm:$0xff]  ;;  %v216_v40 = vld [vmem:[#allocation2 + $0x9] ss:$0 sm:$0xff] }
  0xc4   : > { %v171_v17 = vmul.f32 %v167_v16, %v164_v14  ;;  %v207_v35 = vxor.u32 2147483648, %v206_v33  ;;  %v217_v42 = vxor.u32 2147483648, %v216_v40  ;;  %v226_v54 = vld [vmem:[#allocation2 + $0x8] ss:$0 sm:$0xff] }
  0xc5   : > { %v227_v56 = vxor.u32 2147483648, %v226_v54 }
  0xc6   : > { %172 = vadd.xlane.f32.xlu0 %v171_v17 }
 0x153   : > { %v173_v19 = vpop.xlane.xlu0 %172 }
 0x154   : > { %v174_v21 = vsel %vm170_vm6, %v173_v19, %v164_v14  ;;  %vm310_vm6 = vcmp.eq.s32.totalorder %v578_v3, 2 }
 0x155   : > { %v181_v22 = vmul.f32 %v177_v20, %v174_v21 }
 0x157   : > { %182 = vadd.xlane.f32.xlu1 %v181_v22 }
 0x1e4   : > { %v183_v24 = vpop.xlane.xlu1 %182 }
 0x1e5   : > { %v184_v26 = vsel %vm180_vm7, %v183_v24, %v174_v21  ;;  %vm324_vm7 = vcmp.eq.s32.totalorder %v578_v3, 1 }
 0x1e6   : > { %v191_v27 = vmul.f32 %v187_v25, %v184_v26 }
 0x1e8   : > { %192 = vadd.xlane.f32.xlu1 %v191_v27 }
 0x275   : > { %v193_v29 = vpop.xlane.xlu1 %192 }
 0x276   : > { %v194_v31 = vsel %vm190_vm8, %v193_v29, %v184_v26  ;;  %vm337_vm8 = vcmp.eq.s32.totalorder %v578_v3, 0 }
 0x277   : > { %v201_v32 = vmul.f32 %v197_v30, %v194_v31 }
 0x279   : > { %202 = vadd.xlane.f32.xlu0 %v201_v32 }
 0x306   : > { %v203_v34 = vpop.xlane.xlu0 %202 }
 0x307   : > { %v204_v36 = vsel %vm200_vm9, %v203_v34, %v194_v31 }
 0x308   : > { %v211_v37 = vmul.f32 %v207_v35, %v204_v36 }
 0x30a   : > { %212 = vadd.xlane.f32.xlu1 %v211_v37 }
 0x30e   : > { %123 = vadd.xlane.f32.xlu1 %v122_v39 }
 0x397   : > { %v213_v41 = vpop.xlane.xlu1 %212 }
 0x398   : > { %v214_v43 = vsel %vm210_vm11, %v213_v41, %v204_v36 }
 0x399   : > { %v221_v44 = vmul.f32 %v217_v42, %v214_v43 }
 0x39b   : > { %222 = vadd.xlane.f32.xlu0 %v221_v44  ;;  %v607_v45 = vpop.xlane.xlu1 %123 }
 0x39c   : > { %513 = vrcp.f32 %v607_v45  ;;  %vm348_vm9 = vweird.f32 %v607_v45 }
 0x3a6   : > { %v614_v47 = vpop.eup %513 }
 0x3a7   : > { %v129_v48 = vmul.f32 %v614_v47, %v127_v46 }
 0x3a9   : > { %130 = vst [vmem:[#allocation2] sm:$0xff] %v129_v48 }
 0x3b0   : > { %v236_v51 = vld [vmem:[#allocation2 + $0x7] ss:$0 sm:$0xff]  ;;  %v250_v59 = vld [vmem:[#allocation2 + $0x6] ss:$0 sm:$0xff]  ;;  %v264_v4 = vld [vmem:[#allocation2 + $0x5] ss:$0 sm:$0xff] }
 0x3b1   : > { %v237_v52 = vxor.u32 2147483648, %v236_v51  ;;  %v251_v60 = vxor.u32 2147483648, %v250_v59  ;;  %v265_v6 = vxor.u32 2147483648, %v264_v4  ;;  %v278_v14 = vld [vmem:[#allocation2 + $0x4] ss:$0 sm:$0xff] }
 0x3b2   : > { %v279_v16 = vxor.u32 2147483648, %v278_v14  ;;  %v292_v22 = vld [vmem:[#allocation2 + $0x3] ss:$0 sm:$0xff]  ;;  %v306_v30 = vld [vmem:[#allocation2 + $0x2] ss:$0 sm:$0xff] }
 0x3b3   : > { %v241_v53 = vmul.f32 %v237_v52, %v153_v50  ;;  %v293_v24 = vxor.u32 2147483648, %v292_v22  ;;  %v307_v32 = vxor.u32 2147483648, %v306_v30  ;;  %v320_v38 = vld [vmem:[#allocation2 + $0x1] ss:$0 sm:$0xff]  ;;  %v333_v48 = vld [vmem:[#allocation2] ss:$0 sm:$0xff] }
 0x3b4   : > { %v321_v40 = vxor.u32 2147483648, %v320_v38 }
 0x3b5   : > { %242 = vadd.xlane.f32.xlu1 %v241_v53 }
 0x428   : > { %v223_v55 = vpop.xlane.xlu0 %222 }
 0x429   : > { %v224_v57 = vsel %vm220_vm15, %v223_v55, %v214_v43 }
 0x42a   : > { %v231_v58 = vmul.f32 %v227_v56, %v224_v57 }
 0x42c   : > { %232 = vadd.xlane.f32.xlu0 %v231_v58 }
 0x442   : > { %v243_v61 = vpop.xlane.xlu1 %242 }
 0x443   : > { %v244_v62 = vsel %vm240_vm0, %v243_v61, %v153_v50  ;;  %v334_v50 = vxor.u32 2147483648, %v333_v48 }
 0x444   : > { %v255_v63 = vmul.f32 %v251_v60, %v244_v62 }
 0x446   : > { %256 = vadd.xlane.f32.xlu1 %v255_v63 }
 0x4b9   : > { %v233_v0 = vpop.xlane.xlu0 %232 }
 0x4ba   : > { %v234_v1 = vsel %vm230_vm1, %v233_v0, %v224_v57 }
 0x4bb   : > { %v245_v2 = vmul.f32 %v237_v52, %v234_v1 }
 0x4bd   : > { %246 = vadd.xlane.f32.xlu0 %v245_v2 }
 0x4d3   : > { %v257_v5 = vpop.xlane.xlu1 %256 }
 0x4d4   : > { %v258_v7 = vsel %vm254_vm2, %v257_v5, %v244_v62 }
 0x4d5   : > { %v269_v8 = vmul.f32 %v265_v6, %v258_v7 }
 0x4d7   : > { %270 = vadd.xlane.f32.xlu1 %v269_v8 }
 0x54a   : > { %v247_v11 = vpop.xlane.xlu0 %246 }
 0x54b   : > { %v248_v12 = vsel %vm240_vm0, %v247_v11, %v234_v1 }
 0x54c   : > { %v259_v13 = vmul.f32 %v251_v60, %v248_v12 }
 0x54e   : > { %260 = vadd.xlane.f32.xlu0 %v259_v13 }
 0x564   : > { %v271_v15 = vpop.xlane.xlu1 %270 }
 0x565   : > { %v272_v17 = vsel %vm268_vm3, %v271_v15, %v258_v7 }
 0x566   : > { %v283_v18 = vmul.f32 %v279_v16, %v272_v17 }
 0x568   : > { %284 = vadd.xlane.f32.xlu1 %v283_v18 }
 0x5db   : > { %v261_v19 = vpop.xlane.xlu0 %260 }
 0x5dc   : > { %v262_v20 = vsel %vm254_vm2, %v261_v19, %v248_v12 }
 0x5dd   : > { %v273_v21 = vmul.f32 %v265_v6, %v262_v20 }
 0x5df   : > { %274 = vadd.xlane.f32.xlu0 %v273_v21 }
 0x5f5   : > { %v285_v23 = vpop.xlane.xlu1 %284 }
 0x5f6   : > { %v286_v25 = vsel %vm282_vm4, %v285_v23, %v272_v17 }
 0x5f7   : > { %v297_v26 = vmul.f32 %v293_v24, %v286_v25 }
 0x5f9   : > { %298 = vadd.xlane.f32.xlu1 %v297_v26 }
 0x66c   : > { %v275_v27 = vpop.xlane.xlu0 %274 }
 0x66d   : > { %v276_v28 = vsel %vm268_vm3, %v275_v27, %v262_v20 }
 0x66e   : > { %v287_v29 = vmul.f32 %v279_v16, %v276_v28 }
 0x670   : > { %288 = vadd.xlane.f32.xlu0 %v287_v29 }
 0x686   : > { %v299_v31 = vpop.xlane.xlu1 %298 }
 0x687   : > { %v300_v33 = vsel %vm296_vm5, %v299_v31, %v286_v25 }
 0x688   : > { %v311_v34 = vmul.f32 %v307_v32, %v300_v33 }
 0x68a   : > { %312 = vadd.xlane.f32.xlu1 %v311_v34 }
 0x6fd   : > { %v289_v35 = vpop.xlane.xlu0 %288 }
 0x6fe   : > { %v290_v36 = vsel %vm282_vm4, %v289_v35, %v276_v28 }
 0x6ff   : > { %v301_v37 = vmul.f32 %v293_v24, %v290_v36 }
 0x701   : > { %302 = vadd.xlane.f32.xlu0 %v301_v37 }
 0x717   : > { %v313_v39 = vpop.xlane.xlu1 %312 }
 0x718   : > { %v314_v41 = vsel %vm310_vm6, %v313_v39, %v300_v33 }
 0x719   : > { %v325_v42 = vmul.f32 %v321_v40, %v314_v41 }
 0x71b   : > { %326 = vadd.xlane.f32.xlu1 %v325_v42 }
 0x78e   : > { %v303_v43 = vpop.xlane.xlu0 %302 }
 0x78f   : > { %v304_v44 = vsel %vm296_vm5, %v303_v43, %v290_v36 }
 0x790   : > { %v315_v46 = vmul.f32 %v307_v32, %v304_v44 }
 0x792   : > { %316 = vadd.xlane.f32.xlu0 %v315_v46 }
 0x7a8   : > { %v327_v49 = vpop.xlane.xlu1 %326 }
 0x7a9   : > { %v328_v51 = vsel %vm324_vm7, %v327_v49, %v314_v41 }
 0x7aa   : > { %v338_v52 = vmul.f32 %v334_v50, %v328_v51 }
 0x7ac   : > { %339 = vadd.xlane.f32.xlu1 %v338_v52 }
 0x81f   : > { %v317_v53 = vpop.xlane.xlu0 %316 }
 0x820   : > { %v318_v54 = vsel %vm310_vm6, %v317_v53, %v304_v44 }
 0x821   : > { %v329_v55 = vmul.f32 %v321_v40, %v318_v54 }
 0x823   : > { %330 = vadd.xlane.f32.xlu0 %v329_v55 }
 0x839   : > { %v340_v56 = vpop.xlane.xlu1 %339 }
 0x83a   : > { %v341_v57 = vsel %vm337_vm8, %v340_v56, %v328_v51 }
 0x83b   : > { %v347_v58 = vmul.f32 %v614_v47, %v341_v57 }
 0x83d   : > { %v349_v59 = vsel %vm348_vm9, %v341_v57, %v347_v58 }
 0x83e   : > { %398 = vst [vmem:[%s367_s24] sm:$0xff] %v349_v59 }
 0x8b0   : > { %v331_v60 = vpop.xlane.xlu0 %330 }
 0x8b1   : > { %v332_v61 = vsel %vm324_vm7, %v331_v60, %v318_v54 }
 0x8b2   : > { %v342_v62 = vmul.f32 %v334_v50, %v332_v61 }
 0x8b4   : > { %343 = vadd.xlane.f32.xlu0 %v342_v62 }
 0x941   : > { %v344_v63 = vpop.xlane.xlu0 %343 }
 0x942   : > { %v345_v0 = vsel %vm337_vm8, %v344_v63, %v332_v61 }
 0x943   : > { %v352_v1 = vmul.f32 %v594_v10, %v345_v0 }
 0x945   : > { %v354_v2 = vsel %vm353_vm10, %v345_v0, %v352_v1 }
 0x946   : > { %400 = vst [vmem:[%s367_s24 + $0x8] sm:$0xff] %v354_v2 }
 0x947 PF: > { %s7_s8 = sadd.s32 1, %s537_s8   ;;  %s676_s6 = smov %s533_s7 }
 0x948   : > { %p4_p5 = scmp.ge.s32.totalorder %s7_s8, 4   ;;  %s677_s7 = smov %s679_s10 }
 0x94a   :  { %6 = sbr.rel (!%p4_p5) target bundleno = 2 (0x2), region = 135 }

// kernel: custom-call.13
= control target key start
LH: loop header
LB: loop body
LE: loop exit
PB: predicated region body
PF: predicated region fallthrough
CT: control target
= control target key end

     0   :  { %s552_s6 = smov 0   ;;  %s554_s7 = smov 0   ;;  %s641_s0 = inlined_call_operand.vmem [shape: f32[2,1,16,16], index: 0, kind: input, shape index: {}]   ;;  %s642_s1 = inlined_call_operand.vmem [shape: f32[2,1,16,16], index: 1, kind: output, shape index: {}]  }
   0x1   :  { %s556_s8 = smov 0  }
   0x2 LB: > { %s468_s9 = sadd.s32 4294967295, %s538_s8   ;;  %s33_s10 = sadd.s32 1, %s534_s7  ;;  %s538_s8 = sphi %s556_s8, %s7_s8   ;;  %s534_s7 = sphi %s554_s7, %s644_s7   ;;  %s530_s6 = sphi %s552_s6, %s643_s6  }
   0x3   : > { %p35_p0 = scmp.ge.s32.totalorder %s33_s10, 2  ;;  %p470_p1 = scmp.ge.s32.totalorder %s538_s8, 2 }
   0x4   : > { %s49_s11 = sand.u32 (!%p470_p1), 1, %s538_s8   ;;  %s484_s12 = sshll.u32 (!%p470_p1), %s534_s7, 4 }
   0x5   : > { %s646_s10 = smov (%p35_p0, %s33_s10), 0  ;;  %47 = sbr.rel (%p470_p1) target bundleno = 12 (0xc), region = 16 }
   0x6   : > { %s471_s13 = sshll.u32 (!%p470_p1), %s49_s11, 4  ;;  %s58_s16 = scalar_lea.vmem (!%p470_p1), %s641_s0, %s484_s12 }
   0x7   : > { %v88_v0 = vld [vmem:[%s58_s16] sm:$0xff] (!%p470_p1)  ;;  %v90_v1 = vld [vmem:[%s58_s16 + $0x8] sm:$0xff] (!%p470_p1)  ;;  %s51_s17 = scalar_lea.vmem (!%p470_p1), [#allocation0], %s471_s13 }
   0x8   : > { %89 = vst [vmem:[%s51_s17] sm:$0xff] (!%p470_p1), %v88_v0  ;;  %91 = vst [vmem:[%s51_s17 + $0x8] sm:$0xff] (!%p470_p1), %v90_v1 }
   0xc PF: > { %p474_p2 = scmp.ge.s32.totalorder %s538_s8, 1  ;;  %p96_p3 = scmp.lt.s32.totalorder %s538_s8, 3 }
   0xe   : > { %p97_p4 = pnand %p474_p2, %p96_p3 }
  0x10   : > { %100 = sbr.rel (%p97_p4) target bundleno = 2373 (0x945), region = 54 }
  0x17   : > { %s103_s18 = sand.u32 1, %s468_s9   ;;  %v114_v2 = vlaneseq  ;;  %v540_v11 = vmov -1.0   ;;  %v541_v55 = vmov 0.0   ;;  %s485_s21 = sshll.u32 %s530_s6, 4 }
  0x18   : > { %s475_s19 = sshll.u32 %s103_s18, 4  ;;  %s368_s24 = scalar_lea.vmem %s642_s1, %s485_s21 }
  0x19   : > { %v579_v3 = vand.u32 127, %v114_v2  ;;  %v118_v4 = vshrl.u32 %v114_v2, 7  ;;  %s581_s20 = scalar_lea.vmem [#allocation0], %s475_s19 }
  0x1a   : > { %v121_v5 = vld [vmem:[%s581_s20] sm:$0xff]  ;;  %v477_v38 = vld [vmem:[%s581_s20 + $0x8] sm:$0xff] }
  0x1b   : > { %vm120_vm0 = vcmp.eq.s32.totalorder %v118_v4, %v579_v3  ;;  %vm116_vm1 = vcmp.lt.s32.totalorder %v579_v3, 16  ;;  %vm125_vm2 = vcmp.ge.s32.totalorder %v118_v4, %v579_v3  ;;  %vm155_vm4 = vcmp.eq.s32.totalorder %v579_v3, 0 }
  0x1c   : > { %v122_v6 = vsel %vm120_vm0, %v121_v5, 0.0  ;;  %vm126_vm3 = vmand %vm125_vm2, %vm116_vm1  ;;  %vm152_vm5 = vcmp.eq.s32.totalorder %v579_v3, %v118_v4  ;;  %v156_v12 = vsel %vm155_vm4, 1.0, %v540_v11  ;;  %vm170_vm6 = vcmp.eq.s32.totalorder %v579_v3, 1 }
  0x1d   : > { %123 = vadd.xlane.f32.xlu0 %v122_v6  ;;  %v127_v8 = vsel %vm126_vm3, %v121_v5, 0.0  ;;  %v157_v13 = vsel %vm152_vm5, %v156_v12, 0.0  ;;  %vm180_vm7 = vcmp.eq.s32.totalorder %v579_v3, 2  ;;  %vm190_vm8 = vcmp.eq.s32.totalorder %v579_v3, 3 }
  0x1e   : > { %vm200_vm9 = vcmp.eq.s32.totalorder %v579_v3, 4  ;;  %v135_v33 = vadd.s32 8, %v118_v4  ;;  %vm210_vm11 = vcmp.eq.s32.totalorder %v579_v3, 5  ;;  %vm220_vm14 = vcmp.eq.s32.totalorder %v579_v3, 6 }
  0x1f   : > { %vm230_vm0 = vcmp.eq.s32.totalorder %v579_v3, 7  ;;  %vm254_vm2 = vcmp.eq.s32.totalorder %v579_v3, 9  ;;  %vm268_vm3 = vcmp.eq.s32.totalorder %v579_v3, 10  ;;  %vm282_vm4 = vcmp.eq.s32.totalorder %v579_v3, 11 }
  0x20   : > { %vm136_vm10 = vcmp.eq.s32.totalorder %v135_v33, %v579_v3  ;;  %vm141_vm12 = vcmp.ge.s32.totalorder %v135_v33, %v579_v3  ;;  %vm163_vm15 = vcmp.eq.s32.totalorder %v579_v3, %v135_v33  ;;  %vm296_vm5 = vcmp.eq.s32.totalorder %v579_v3, 12 }
  0x21   : > { %v138_v39 = vsel %vm136_vm10, %v477_v38, 0.0  ;;  %vm142_vm13 = vmand %vm141_vm12, %vm116_vm1  ;;  %v164_v56 = vsel %vm163_vm15, -1.0, %v541_v55  ;;  %vm240_vm1 = vcmp.eq.s32.totalorder %v579_v3, 8 }
  0x22   : > { %v143_v46 = vsel %vm142_vm13, %v477_v38, 0.0 }
  0xaa   : > { %v585_v7 = vpop.xlane.xlu0 %123 }
  0xab   : > { %512 = vrcp.f32 %v585_v7  ;;  %vm349_vm10 = vweird.f32 %v585_v7 }
  0xb5   : > { %v592_v9 = vpop.eup %512 }
  0xb6   : > { %v129_v10 = vmul.f32 %v592_v9, %v127_v8 }
  0xb8   : > { %130 = vst [vmem:[#allocation2] sm:$0xff] %v129_v10 }
  0xbf   : > { %v166_v14 = vld [vmem:[#allocation2 + $0x1] ss:$0 sm:$0xff]  ;;  %v176_v17 = vld [vmem:[#allocation2 + $0x2] ss:$0 sm:$0xff]  ;;  %v186_v22 = vld [vmem:[#allocation2 + $0x3] ss:$0 sm:$0xff] }
  0xc0   : > { %v167_v15 = vxor.u32 2147483648, %v166_v14  ;;  %v177_v19 = vxor.u32 2147483648, %v176_v17  ;;  %v187_v24 = vxor.u32 2147483648, %v186_v22  ;;  %v196_v27 = vld [vmem:[#allocation2 + $0x4] ss:$0 sm:$0xff] }
  0xc1   : > { %v197_v29 = vxor.u32 2147483648, %v196_v27  ;;  %v206_v32 = vld [vmem:[#allocation2 + $0x5] ss:$0 sm:$0xff]  ;;  %v216_v40 = vld [vmem:[#allocation2 + $0x6] ss:$0 sm:$0xff] }
  0xc2   : > { %v171_v16 = vmul.f32 %v167_v15, %v157_v13  ;;  %v207_v35 = vxor.u32 2147483648, %v206_v32  ;;  %v217_v42 = vxor.u32 2147483648, %v216_v40  ;;  %v226_v49 = vld [vmem:[#allocation2 + $0x7] ss:$0 sm:$0xff] }
  0xc3   : > { %v227_v52 = vxor.u32 2147483648, %v226_v49 }
  0xc4   : > { %172 = vadd.xlane.f32.xlu0 %v171_v16 }
 0x151   : > { %v173_v18 = vpop.xlane.xlu0 %172 }
 0x152   : > { %v174_v20 = vsel %vm170_vm6, %v173_v18, %v157_v13  ;;  %vm310_vm6 = vcmp.eq.s32.totalorder %v579_v3, 13 }
 0x153   : > { %v181_v21 = vmul.f32 %v177_v19, %v174_v20 }
 0x155   : > { %182 = vadd.xlane.f32.xlu1 %v181_v21 }
 0x1e2   : > { %v183_v23 = vpop.xlane.xlu1 %182 }
 0x1e3   : > { %v184_v25 = vsel %vm180_vm7, %v183_v23, %v174_v20  ;;  %vm324_vm7 = vcmp.eq.s32.totalorder %v579_v3, 14 }
 0x1e4   : > { %v191_v26 = vmul.f32 %v187_v24, %v184_v25 }
 0x1e6   : > { %192 = vadd.xlane.f32.xlu1 %v191_v26 }
 0x273   : > { %v193_v28 = vpop.xlane.xlu1 %192 }
 0x274   : > { %v194_v30 = vsel %vm190_vm8, %v193_v28, %v184_v25  ;;  %vm338_vm8 = vcmp.eq.s32.totalorder %v579_v3, 15 }
 0x275   : > { %v201_v31 = vmul.f32 %v197_v29, %v194_v30 }
 0x277   : > { %202 = vadd.xlane.f32.xlu0 %v201_v31 }
 0x304   : > { %v203_v34 = vpop.xlane.xlu0 %202 }
 0x305   : > { %v204_v36 = vsel %vm200_vm9, %v203_v34, %v194_v30 }
 0x306   : > { %v211_v37 = vmul.f32 %v207_v35, %v204_v36 }
 0x308   : > { %212 = vadd.xlane.f32.xlu1 %v211_v37 }
 0x30c   : > { %139 = vadd.xlane.f32.xlu1 %v138_v39 }
 0x395   : > { %v213_v41 = vpop.xlane.xlu1 %212 }
 0x396   : > { %v214_v43 = vsel %vm210_vm11, %v213_v41, %v204_v36 }
 0x397   : > { %v221_v44 = vmul.f32 %v217_v42, %v214_v43 }
 0x399   : > { %222 = vadd.xlane.f32.xlu0 %v221_v44  ;;  %v604_v45 = vpop.xlane.xlu1 %139 }
 0x39a   : > { %514 = vrcp.f32 %v604_v45  ;;  %vm354_vm9 = vweird.f32 %v604_v45 }
 0x3a4   : > { %v610_v47 = vpop.eup %514 }
 0x3a5   : > { %v145_v48 = vmul.f32 %v610_v47, %v143_v46 }
 0x3a7   : > { %146 = vst [vmem:[#allocation2 + $0x8] sm:$0xff] %v145_v48 }
 0x3ae   : > { %v236_v50 = vld [vmem:[#allocation2 + $0x8] ss:$0 sm:$0xff]  ;;  %v250_v61 = vld [vmem:[#allocation2 + $0x9] ss:$0 sm:$0xff]  ;;  %v264_v6 = vld [vmem:[#allocation2 + $0xa] ss:$0 sm:$0xff] }
 0x3af   : > { %v237_v53 = vxor.u32 2147483648, %v236_v50  ;;  %v251_v0 = vxor.u32 2147483648, %v250_v61  ;;  %v265_v11 = vxor.u32 2147483648, %v264_v6  ;;  %v278_v16 = vld [vmem:[#allocation2 + $0xb] ss:$0 sm:$0xff] }
 0x3b0   : > { %v279_v19 = vxor.u32 2147483648, %v278_v16  ;;  %v292_v24 = vld [vmem:[#allocation2 + $0xc] ss:$0 sm:$0xff]  ;;  %v306_v32 = vld [vmem:[#allocation2 + $0xd] ss:$0 sm:$0xff] }
 0x3b1   : > { %v245_v58 = vmul.f32 %v237_v53, %v164_v56  ;;  %v293_v27 = vxor.u32 2147483648, %v292_v24  ;;  %v307_v35 = vxor.u32 2147483648, %v306_v32  ;;  %v320_v40 = vld [vmem:[#allocation2 + $0xe] ss:$0 sm:$0xff]  ;;  %v334_v50 = vld [vmem:[#allocation2 + $0xf] ss:$0 sm:$0xff] }
 0x426   : > { %v223_v51 = vpop.xlane.xlu0 %222 }
 0x427   : > { %v224_v54 = vsel %vm220_vm14, %v223_v51, %v214_v43  ;;  %v321_v43 = vxor.u32 2147483648, %v320_v40 }
 0x428   : > { %v231_v57 = vmul.f32 %v227_v52, %v224_v54 }
 0x42a   : > { %232 = vadd.xlane.f32.xlu0 %v231_v57 }
 0x42e   : > { %246 = vadd.xlane.f32.xlu0 %v245_v58 }
 0x4b7   : > { %v233_v59 = vpop.xlane.xlu0 %232 }
 0x4b8   : > { %v234_v60 = vsel %vm230_vm0, %v233_v59, %v224_v54 }
 0x4b9   : > { %v241_v62 = vmul.f32 %v237_v53, %v234_v60  ;;  %v335_v53 = vxor.u32 2147483648, %v334_v50 }
 0x4bb   : > { %v247_v63 = vpop.xlane.xlu0 %246  ;;  %242 = vadd.xlane.f32.xlu1 %v241_v62 }
 0x4bc   : > { %v248_v1 = vsel %vm240_vm1, %v247_v63, %v164_v56 }
 0x4bd   : > { %v259_v2 = vmul.f32 %v251_v0, %v248_v1 }
 0x4bf   : > { %260 = vadd.xlane.f32.xlu0 %v259_v2 }
 0x548   : > { %v243_v4 = vpop.xlane.xlu1 %242 }
 0x549   : > { %v244_v5 = vsel %vm240_vm1, %v243_v4, %v234_v60 }
 0x54a   : > { %v255_v8 = vmul.f32 %v251_v0, %v244_v5 }
 0x54c   : > { %v261_v10 = vpop.xlane.xlu0 %260  ;;  %256 = vadd.xlane.f32.xlu1 %v255_v8 }
 0x54d   : > { %v262_v12 = vsel %vm254_vm2, %v261_v10, %v248_v1 }
 0x54e   : > { %v273_v13 = vmul.f32 %v265_v11, %v262_v12 }
 0x550   : > { %274 = vadd.xlane.f32.xlu0 %v273_v13 }
 0x5d9   : > { %v257_v14 = vpop.xlane.xlu1 %256 }
 0x5da   : > { %v258_v15 = vsel %vm254_vm2, %v257_v14, %v244_v5 }
 0x5db   : > { %v269_v17 = vmul.f32 %v265_v11, %v258_v15 }
 0x5dd   : > { %v275_v18 = vpop.xlane.xlu0 %274  ;;  %270 = vadd.xlane.f32.xlu1 %v269_v17 }
 0x5de   : > { %v276_v20 = vsel %vm268_vm3, %v275_v18, %v262_v12 }
 0x5df   : > { %v287_v21 = vmul.f32 %v279_v19, %v276_v20 }
 0x5e1   : > { %288 = vadd.xlane.f32.xlu0 %v287_v21 }
 0x66a   : > { %v271_v22 = vpop.xlane.xlu1 %270 }
 0x66b   : > { %v272_v23 = vsel %vm268_vm3, %v271_v22, %v258_v15 }
 0x66c   : > { %v283_v25 = vmul.f32 %v279_v19, %v272_v23 }
 0x66e   : > { %v289_v26 = vpop.xlane.xlu0 %288  ;;  %284 = vadd.xlane.f32.xlu1 %v283_v25 }
 0x66f   : > { %v290_v28 = vsel %vm282_vm4, %v289_v26, %v276_v20 }
 0x670   : > { %v301_v29 = vmul.f32 %v293_v27, %v290_v28 }
 0x672   : > { %302 = vadd.xlane.f32.xlu0 %v301_v29 }
 0x6fb   : > { %v285_v30 = vpop.xlane.xlu1 %284 }
 0x6fc   : > { %v286_v31 = vsel %vm282_vm4, %v285_v30, %v272_v23 }
 0x6fd   : > { %v297_v33 = vmul.f32 %v293_v27, %v286_v31 }
 0x6ff   : > { %v303_v34 = vpop.xlane.xlu0 %302  ;;  %298 = vadd.xlane.f32.xlu1 %v297_v33 }
 0x700   : > { %v304_v36 = vsel %vm296_vm5, %v303_v34, %v290_v28 }
 0x701   : > { %v315_v37 = vmul.f32 %v307_v35, %v304_v36 }
 0x703   : > { %316 = vadd.xlane.f32.xlu0 %v315_v37 }
 0x78c   : > { %v299_v38 = vpop.xlane.xlu1 %298 }
 0x78d   : > { %v300_v39 = vsel %vm296_vm5, %v299_v38, %v286_v31 }
 0x78e   : > { %v311_v41 = vmul.f32 %v307_v35, %v300_v39 }
 0x790   : > { %v317_v42 = vpop.xlane.xlu0 %316  ;;  %312 = vadd.xlane.f32.xlu1 %v311_v41 }
 0x791   : > { %v318_v44 = vsel %vm310_vm6, %v317_v42, %v304_v36 }
 0x792   : > { %v329_v46 = vmul.f32 %v321_v43, %v318_v44 }
 0x794   : > { %330 = vadd.xlane.f32.xlu0 %v329_v46 }
 0x81d   : > { %v313_v48 = vpop.xlane.xlu1 %312 }
 0x81e   : > { %v314_v49 = vsel %vm310_vm6, %v313_v48, %v300_v39 }
 0x81f   : > { %v325_v51 = vmul.f32 %v321_v43, %v314_v49 }
 0x821   : > { %v331_v52 = vpop.xlane.xlu0 %330  ;;  %326 = vadd.xlane.f32.xlu1 %v325_v51 }
 0x822   : > { %v332_v54 = vsel %vm324_vm7, %v331_v52, %v318_v44 }
 0x823   : > { %v343_v55 = vmul.f32 %v335_v53, %v332_v54 }
 0x825   : > { %344 = vadd.xlane.f32.xlu0 %v343_v55 }
 0x8ae   : > { %v327_v56 = vpop.xlane.xlu1 %326 }
 0x8af   : > { %v328_v57 = vsel %vm324_vm7, %v327_v56, %v314_v49 }
 0x8b0   : > { %v339_v58 = vmul.f32 %v335_v53, %v328_v57 }
 0x8b2   : > { %v345_v59 = vpop.xlane.xlu0 %344  ;;  %340 = vadd.xlane.f32.xlu1 %v339_v58 }
 0x8b3   : > { %v346_v60 = vsel %vm338_vm8, %v345_v59, %v332_v54 }
 0x8b4   : > { %v353_v61 = vmul.f32 %v610_v47, %v346_v60 }
 0x8b6   : > { %v355_v62 = vsel %vm354_vm9, %v346_v60, %v353_v61 }
 0x8b7   : > { %401 = vst [vmem:[%s368_s24 + $0x8] sm:$0xff] %v355_v62 }
 0x93f   : > { %v341_v63 = vpop.xlane.xlu1 %340 }
 0x940   : > { %v342_v0 = vsel %vm338_vm8, %v341_v63, %v328_v57 }
 0x941   : > { %v348_v1 = vmul.f32 %v592_v9, %v342_v0 }
 0x943   : > { %v350_v3 = vsel %vm349_vm10, %v342_v0, %v348_v1 }
 0x944   : > { %399 = vst [vmem:[%s368_s24] sm:$0xff] %v350_v3 }
 0x945 PF: > { %s7_s8 = sadd.s32 1, %s538_s8   ;;  %s643_s6 = smov %s534_s7 }
 0x946   : > { %p4_p5 = scmp.ge.s32.totalorder %s7_s8, 4   ;;  %s644_s7 = smov %s646_s10 }
 0x948   :  { %6 = sbr.rel (!%p4_p5) target bundleno = 2 (0x2), region = 136 }

// kernel: dann_sem_forward.3
= control target key start
LH: loop header
LB: loop body
LE: loop exit
PB: predicated region body
PF: predicated region fallthrough
CT: control target
= control target key end

     0   :  { %s6053_s6 = smov 1   ;;  %s6054_s10 = smov 2   ;;  %s6782_s0 = inlined_call_operand.smem [shape: u32[59], index: -1, kind: input, shape index: {}] }
   0x1   :  { %s6123_s5 = sld [smem:[%s6782_s0]]   ;;  %s6055_s14 = smov 3  }
   0x2   :  { %s6128_s9 = sld [smem:[%s6782_s0 + %s6053_s6]]   ;;  %s6056_s18 = smov 4  }
   0x3   :  { %s6133_s13 = sld [smem:[%s6782_s0 + %s6054_s10]]   ;;  %s6057_s22 = smov 5  }
   0x4   :  { %s6138_s17 = sld [smem:[%s6782_s0 + %s6055_s14]]   ;;  %s6058_s26 = smov 6  }
   0x5   :  { %s6143_s21 = sld [smem:[%s6782_s0 + %s6056_s18]]   ;;  %s6059_s30 = smov 7  }
   0x6   :  { %s6148_s25 = sld [smem:[%s6782_s0 + %s6057_s22]]   ;;  %s6060_s4 = smov 8  }
   0x7   :  { %6786 = sst [smem:[#allocation2_spill]] %s6123_s5  ;;  %s6061_s10 = smov 9  }
   0x8   :  { %s6153_s29 = sld [smem:[%s6782_s0 + %s6058_s26]]   ;;  %s6062_s15 = smov 10  }
   0x9   :  { %6787 = sst [smem:[#allocation3_spill]] %s6133_s13  ;;  %s6063_s20 = smov 11  }
   0xa   :  { %6788 = sst [smem:[#allocation4_spill]] %s6138_s17  ;;  %s6064_s26 = smov 12  }
   0xb   :  { %s6158_s3 = sld [smem:[%s6782_s0 + %s6059_s30]]   ;;  %s6065_s1 = smov 13  }
   0xc   :  { %6789 = sst [smem:[#allocation5_spill]] %s6148_s25  ;;  %s6066_s7 = smov 14  }
   0xd   :  { %s6163_s8 = sld [smem:[%s6782_s0 + %s6060_s4]]   ;;  %s6068_s22 = smov 16  }
   0xe   :  { %6790 = sst [smem:[#allocation6_spill]] %s6153_s29  ;;  %s6069_s28 = smov 17  }
   0xf   :  { %s6168_s14 = sld [smem:[%s6782_s0 + %s6061_s10]]  }
  0x10   :  { %s6173_s19 = sld [smem:[%s6782_s0 + %s6062_s15]]   ;;  %s6067_s15 = smov 15  }
  0x11   :  { %6791 = sst [smem:[#allocation7_spill]] %s6158_s3 }
  0x12   :  { %s6178_s24 = sld [smem:[%s6782_s0 + %s6063_s20]]  }
  0x13   :  { %s6183_s30 = sld [smem:[%s6782_s0 + %s6064_s26]]  }
  0x14   :  { %s6188_s6 = sld [smem:[%s6782_s0 + %s6065_s1]]  }
  0x15   :  { %6792 = sst [smem:[#allocation8_spill]] %s6168_s14 }
  0x16   :  { %6793 = sst [smem:[#allocation9_spill]] %s6173_s19 }
  0x17   :  { %s6193_s12 = sld [smem:[%s6782_s0 + %s6066_s7]]   ;;  %s6070_s7 = smov 18  }
  0x18   :  { %s6198_s20 = sld [smem:[%s6782_s0 + %s6067_s15]]   ;;  %s6071_s15 = smov 19  }
  0x19   :  { %s6203_s27 = sld [smem:[%s6782_s0 + %s6068_s22]]   ;;  %s6072_s22 = smov 20  }
  0x1a   :  { %6794 = sst [smem:[#allocation10_spill]] %s6188_s6 }
  0x1b   :  { %s6208_s4 = sld [smem:[%s6782_s0 + %s6069_s28]]   ;;  %s6073_s28 = smov 21  }
  0x1c   :  { %s6213_s3 = sld [smem:[%s6782_s0 + %s6070_s7]]   ;;  %s6074_s7 = smov 22  }
  0x1d   :  { %s6218_s29 = sld [smem:[%s6782_s0 + %s6071_s15]]   ;;  %s6075_s15 = smov 23  }
  0x1e   :  { %s6223_s25 = sld [smem:[%s6782_s0 + %s6072_s22]]   ;;  %s6076_s22 = smov 24  }
  0x1f   :  { %s6228_s17 = sld [smem:[%s6782_s0 + %s6073_s28]]   ;;  %s6077_s28 = smov 25  }
  0x20   :  { %s6233_s14 = sld [smem:[%s6782_s0 + %s6074_s7]]   ;;  %s6078_s7 = smov 26  }
  0x21   :  { %6795 = sst [smem:[#allocation11_spill]] %s6208_s4 }
  0x22   :  { %6796 = sst [smem:[#allocation12_spill]] %s6213_s3 }
  0x23   :  { %s6238_s13 = sld [smem:[%s6782_s0 + %s6075_s15]]   ;;  %s6079_s15 = smov 27  }
  0x24   :  { %6797 = sst [smem:[#allocation13_spill]] %s6223_s25 }
  0x25   :  { %6798 = sst [smem:[#allocation14_spill]] %s6228_s17 }
  0x26   :  { %6799 = sst [smem:[#allocation15_spill]] %s6233_s14 }
  0x27   :  { %s6243_s19 = sld [smem:[%s6782_s0 + %s6076_s22]]   ;;  %s6080_s22 = smov 28  }
  0x28   :  { %s6248_s17 = sld [smem:[%s6782_s0 + %s6077_s28]]   ;;  %s6081_s28 = smov 29  }
  0x29   :  { %6800 = sst [smem:[#allocation16_spill]] %s6238_s13 }
  0x2a   :  { %s6253_s14 = sld [smem:[%s6782_s0 + %s6078_s7]]   ;;  %s6082_s7 = smov 30  }
  0x2b   :  { %s6258_s13 = sld [smem:[%s6782_s0 + %s6079_s15]]   ;;  %s6083_s15 = smov 31  }
  0x2d   :  { %6801 = sst [smem:[#allocation17_spill]] %s6243_s19 }
  0x2e   :  { %6802 = sst [smem:[#allocation18_spill]] %s6248_s17 }
  0x2f   :  { %s6263_s19 = sld [smem:[%s6782_s0 + %s6080_s22]]   ;;  %s6084_s22 = smov 32  }
  0x30   :  { %6803 = sst [smem:[#allocation19_spill]] %s6253_s14 }
  0x31   :  { %6804 = sst [smem:[#allocation20_spill]] %s6258_s13 }
  0x32   :  { %s6268_s17 = sld [smem:[%s6782_s0 + %s6081_s28]]   ;;  %s6085_s28 = smov 33  }
  0x33   :  { %s6273_s14 = sld [smem:[%s6782_s0 + %s6082_s7]]   ;;  %s6086_s7 = smov 34  }
  0x34   :  { %s6278_s13 = sld [smem:[%s6782_s0 + %s6083_s15]]   ;;  %s6087_s15 = smov 35  }
  0x35   :  { %6805 = sst [smem:[#allocation21_spill]] %s6263_s19 }
  0x36   :  { %s6283_s19 = sld [smem:[%s6782_s0 + %s6084_s22]]   ;;  %s6088_s22 = smov 36  }
  0x38   :  { %6806 = sst [smem:[#allocation22_spill]] %s6268_s17 }
  0x39   :  { %6807 = sst [smem:[#allocation23_spill]] %s6273_s14 }
  0x3a   :  { %6808 = sst [smem:[#allocation24_spill]] %s6278_s13 }
  0x3b   :  { %s6288_s17 = sld [smem:[%s6782_s0 + %s6085_s28]]   ;;  %s6089_s28 = smov 37  }
  0x3c   :  { %6809 = sst [smem:[#allocation25_spill]] %s6283_s19 }
  0x3d   :  { %s6293_s14 = sld [smem:[%s6782_s0 + %s6086_s7]]   ;;  %s6090_s7 = smov 38  }
  0x3e   :  { %s6298_s13 = sld [smem:[%s6782_s0 + %s6087_s15]]   ;;  %s6091_s15 = smov 39  }
  0x3f   :  { %s6303_s19 = sld [smem:[%s6782_s0 + %s6088_s22]]   ;;  %s6092_s22 = smov 40  }
  0x41   :  { %6810 = sst [smem:[#allocation26_spill]] %s6288_s17 }
  0x42   :  { %s6308_s17 = sld [smem:[%s6782_s0 + %s6089_s28]]   ;;  %s6093_s28 = smov 41  }
  0x43   :  { %6811 = sst [smem:[#allocation27_spill]] %s6293_s14 }
  0x44   :  { %6812 = sst [smem:[#allocation28_spill]] %s6298_s13 }
  0x45   :  { %6813 = sst [smem:[#allocation29_spill]] %s6303_s19 }
  0x46   :  { %s6313_s14 = sld [smem:[%s6782_s0 + %s6090_s7]]   ;;  %s6094_s7 = smov 42  }
  0x47   :  { %s6318_s13 = sld [smem:[%s6782_s0 + %s6091_s15]]   ;;  %s6095_s15 = smov 43  }
  0x48   :  { %6814 = sst [smem:[#allocation30_spill]] %s6308_s17 }
  0x49   :  { %s6323_s19 = sld [smem:[%s6782_s0 + %s6092_s22]]   ;;  %s6096_s22 = smov 44  }
  0x4a   :  { %s6328_s17 = sld [smem:[%s6782_s0 + %s6093_s28]]   ;;  %s6097_s28 = smov 45  }
  0x4c   :  { %6815 = sst [smem:[#allocation31_spill]] %s6313_s14 }
  0x4d   :  { %6816 = sst [smem:[#allocation32_spill]] %s6318_s13 }
  0x4e   :  { %s6333_s14 = sld [smem:[%s6782_s0 + %s6094_s7]]   ;;  %s6098_s7 = smov 46  }
  0x4f   :  { %6817 = sst [smem:[#allocation33_spill]] %s6323_s19 }
  0x50   :  { %6818 = sst [smem:[#allocation34_spill]] %s6328_s17 }
  0x51   :  { %s6338_s13 = sld [smem:[%s6782_s0 + %s6095_s15]]   ;;  %s6099_s15 = smov 47  }
  0x52   :  { %s6343_s19 = sld [smem:[%s6782_s0 + %s6096_s22]]   ;;  %s6100_s22 = smov 48  }
  0x53   :  { %s6348_s17 = sld [smem:[%s6782_s0 + %s6097_s28]]   ;;  %s6101_s28 = smov 49  }
  0x54   :  { %6819 = sst [smem:[#allocation35_spill]] %s6333_s14 }
  0x55   :  { %s6353_s14 = sld [smem:[%s6782_s0 + %s6098_s7]]   ;;  %s6102_s7 = smov 50  }
  0x57   :  { %6820 = sst [smem:[#allocation36_spill]] %s6338_s13 }
  0x58   :  { %6821 = sst [smem:[#allocation37_spill]] %s6343_s19 }
  0x59   :  { %6822 = sst [smem:[#allocation38_spill]] %s6348_s17 }
  0x5a   :  { %s6358_s13 = sld [smem:[%s6782_s0 + %s6099_s15]]   ;;  %s6103_s15 = smov 51  }
  0x5b   :  { %6823 = sst [smem:[#allocation39_spill]] %s6353_s14 }
  0x5c   :  { %s6363_s19 = sld [smem:[%s6782_s0 + %s6100_s22]]   ;;  %s6104_s22 = smov 52  }
  0x5d   :  { %s6368_s17 = sld [smem:[%s6782_s0 + %s6101_s28]]   ;;  %s6105_s28 = smov 53  }
  0x5e   :  { %s6373_s14 = sld [smem:[%s6782_s0 + %s6102_s7]]   ;;  %s6106_s7 = smov 54  }
  0x5f   :  { %s6378_s4 = sld [smem:[%s6782_s0 + %s6103_s15]]   ;;  %s6107_s15 = smov 55  }
  0x60   :  { %s6388_s25 = sld [smem:[%s6782_s0 + %s6105_s28]]   ;;  %s6109_s28 = smov 57  }
  0x62   :  { %6824 = sst [smem:[#allocation40_spill]] %s6363_s19 }
  0x63   :  { %s6383_s19 = sld [smem:[%s6782_s0 + %s6104_s22]]   ;;  %s6108_s22 = smov 56  }
  0x64   :  { %6825 = sst [smem:[#allocation41_spill]] %s6373_s14 }
  0x65   :  { %6826 = sst [smem:[#allocation42_spill]] %s6378_s4 }
  0x66   :  { %6828 = sst [smem:[#allocation44_spill]] %s6388_s25 }
  0x67   :  { %s6393_s14 = sld [smem:[%s6782_s0 + %s6106_s7]]   ;;  %s6110_s7 = smov 58  }
  0x68   :  { %s6398_s4 = sld [smem:[%s6782_s0 + %s6107_s15]]   ;;  %s6415_s15 = smov 0  }
  0x69   :  { %6827 = sst [smem:[#allocation43_spill]] %s6383_s19 }
  0x6a   :  { %s6403_s19 = sld [smem:[%s6782_s0 + %s6108_s22]]  }
  0x6b   :  { %s6408_s25 = sld [smem:[%s6782_s0 + %s6109_s28]]  }
  0x6d   :  { %6829 = sst [smem:[#allocation45_spill]] %s6393_s14 }
  0x6e   :  { %s6413_s14 = sld [smem:[%s6782_s0 + %s6110_s7]]  }
  0x6f LB: > { %s5412_s16 = sadd.s32 4294967295, %s6051_s15   ;;  %p5416_p0 = scmp.ge.s32.totalorder %s6051_s15, 1  ;;  %s6051_s15 = sphi %s6415_s15, %s128_s15  }
  0x70   : > { %p1879_p1 = scmp.lt.s32.totalorder %s6051_s15, 3 }
  0x72   : > { %p1880_p2 = pnand %p5416_p0, %p1879_p1 }
  0x73   : > { %p2183_p3 = scmp.lt.s32.totalorder (!%p1880_p2), %s5412_s16, 1  ;;  %s6830_s5 = sld [smem:[#allocation2_spill]] (!%p1880_p2)  ;;  %v6111_v0 = vmov (!%p1880_p2), 0.0|0.0   ;;  %vm6112_vm0 = vmmov (!%p1880_p2), 0   ;;  %v6113_v1 = vmov (!%p1880_p2), 0.0   ;;  %vm2394_vm1 = vcmask (!%p1880_p2), 130048  }
  0x74   : > { %1883 = sbr.rel (%p1880_p2) target bundleno = 4580 (0x11e4), region = 196  ;;  %5816 = vmatprep.subr.bf16.mxu0 (!%p1880_p2), %v6111_v0  ;;  %5621 = vmatprep.mubr.msk.f32.mxu0 (!%p1880_p2), %vm6112_vm0, %v6113_v1  ;;  %s6831_s6 = sld [smem:[#allocation10_spill]] (!%p1880_p2)  ;;  %vm2480_vm2 = vcmask (!%p1880_p2), 261120   ;;  %vm2639_vm3 = vcmask (!%p1880_p2), 58368   ;;  %vm2671_vm4 = vcmask (!%p1880_p2), 64512   ;;  %v6492_v44 = vld [vmem:[%s6163_s8] sm:$0xff] (!%p1880_p2) }
  0x75   : > { %5819 = vmatprep.subr.bf16.mxu1 (!%p1880_p2), %v6111_v0  ;;  %5632 = vmatprep.mubr.msk.f32.mxu1 (!%p1880_p2), %vm6112_vm0, %v6113_v1  ;;  %s6832_s3 = sld [smem:[#allocation12_spill]] (!%p1880_p2)  ;;  %vm2776_vm5 = vcmask (!%p1880_p2), 15360   ;;  %v6114_v45 = vmov (!%p1880_p2), 0   ;;  %vm2789_vm6 = vcmask (!%p1880_p2), 1041408   ;;  %v6501_v54 = vld [vmem:[%s6163_s8 + $0x8] sm:$0xff] (!%p1880_p2)  ;;  %v6505_v55 = vld [vmem:[%s6163_s8 + $0x10] sm:$0xff] (!%p1880_p2) }
  0x76   : > { %5974 = vset.pattern.permute.xlu1 (!%p1880_p2), %v6114_v45  ;;  %5975 = vset.pattern.permute.xlu0 (!%p1880_p2), %v6114_v45  ;;  %v6514_v56 = vld [vmem:[%s6163_s8 + $0x18] sm:$0xff] (!%p1880_p2)  ;;  %vm4455_vm7 = vcmask (!%p1880_p2), 123904   ;;  %vm3509_vm8 = vcmask (!%p1880_p2), 523264   ;;  %vm4366_vm12 = vcmask (!%p1880_p2), 1043456   ;;  %vm4362_vm14 = vcmask (!%p1880_p2), 31744  }
  0x77   : > { %vm4440_vm15 = vcmask (!%p1880_p2), 25600  }
  0x7b   : > { %s6875_s16 = smov (!%p2183_p3, %s5412_s16), 1 }
  0x7c   : > { %s6432_s0 = sshll.u32 %s6875_s16, 4  ;;  %s6435_s18 = sshll.u32 %s6875_s16, 1 }
  0x7d   : > { %s2214_s22 = scalar_lea.vmem %s6178_s24, %s6432_s0  ;;  %s6441_s23 = scalar_lea.vmem %s6830_s5, %s6435_s18 }
  0x7e   : > { %v2385_v2 = vld [vmem:[%s2214_s22] sm:$0xff]  ;;  %v2386_v3 = vld [vmem:[%s2214_s22 + $0x8] sm:$0xff]  ;;  %s6449_s26 = sshll.u32 %s6875_s16, 5  ;;  %s2217_s1 = scalar_lea.vmem %s6183_s30, %s6875_s16 }
  0x7f   : > { %v5817_v4 = vpack.c.bf16 %v2386_v3, %v2385_v2  ;;  %v2363_v5 = vld [vmem:[%s6441_s23] sm:$0x3]  ;;  %s2222_s28 = scalar_lea.vmem %s6831_s6, %s6449_s26  ;;  %s2230_s2 = scalar_lea.vmem %s6198_s20, %s6449_s26 }
  0x80   : > { %v2469_v6 = vld [vmem:[%s2222_s28] sm:$0xff]  ;;  %v2470_v7 = vld [vmem:[%s2222_s28 + $0x8] sm:$0xff]  ;;  %v2471_v8 = vld [vmem:[%s2222_s28 + $0x10] sm:$0xff]  ;;  %s2225_s7 = scalar_lea.vmem %s6193_s12, %s6875_s16  ;;  %s2233_s10 = scalar_lea.vmem %s6203_s27, %s6875_s16 }
  0x81   : > { %5818 = vmatpush3.bf16.msra.mxu0 %v5817_v4  ;;  %v5820_v9 = vpack.c.bf16 %v2470_v7, %v2469_v6  ;;  %v2472_v10 = vld [vmem:[%s2222_s28 + $0x18] sm:$0xff]  ;;  %v5453_v12 = vld [vmem:[%s2217_s1] ss:$0 sm:$0xff]  ;;  %v2556_v18 = vld [vmem:[%s2230_s2 + $0x8] sm:$0xff]  ;;  %s2205_s11 = scalar_lea.vmem %s6143_s21, %s6435_s18  ;;  %s2322_s22 = scalar_lea.vmem %s6358_s13, %s6435_s18 }
  0x82   : > { %5825 = vmatprep.subr.bf16.mxu0 %v6111_v0  ;;  %v5823_v11 = vpack.c.bf16 %v2472_v10, %v2471_v8  ;;  %v2555_v17 = vld [vmem:[%s2230_s2] sm:$0xff]  ;;  %v2557_v19 = vld [vmem:[%s2230_s2 + $0x10] sm:$0xff]  ;;  %v2558_v21 = vld [vmem:[%s2230_s2 + $0x18] sm:$0xff]  ;;  %s5432_s28 = sshll.u32 %s6875_s16, 3  ;;  %s2330_s2 = scalar_lea.vmem %s6368_s17, %s6435_s18 }
  0x83   : > { %5821 = vmatpush3.bf16.msra.mxu1 %v5820_v9  ;;  %v5826_v20 = vpack.c.bf16 %v2556_v18, %v2555_v17  ;;  %v5829_v22 = vpack.c.bf16 %v2558_v21, %v2557_v19  ;;  %v5455_v23 = vld [vmem:[%s2225_s7] ss:$0 sm:$0xff]  ;;  %s2240_s1 = scalar_lea.vmem %s6832_s3, %s5432_s28  ;;  %s2191_s7 = scalar_lea.vmem %s6128_s9, %s6449_s26 }
  0x84   : > { %5622 = vmatmul.mubr.msk.f32.vlgmr.msra.gmra.mrb[0].mxu0 %vm2394_vm1, %v2363_v5  ;;  %5822 = vmatprep.subr.bf16.mxu1 %v6111_v0  ;;  %v5457_v28 = vld [vmem:[%s2233_s10] ss:$0 sm:$0xff]  ;;  %v2366_v47 = vld [vmem:[%s2191_s7 + $0x10] sm:$0xff]  ;;  %v2365_v48 = vld [vmem:[%s2191_s7 + $0x8] sm:$0xff]  ;;  %s2243_s10 = scalar_lea.vmem %s6218_s29, %s6875_s16 }
  0x85   : > { %5643 = vmatprep.mubr.msk.f32.mxu0 %vm6112_vm0, %v6113_v1  ;;  %5827 = vmatpush3.bf16.msra.mxu0 %v5826_v20  ;;  %v2372_v30 = vld [vmem:[%s2205_s11] sm:$0x3]  ;;  %v2367_v49 = vld [vmem:[%s2191_s7 + $0x18] sm:$0xff]  ;;  %s6833_s11 = sld [smem:[#allocation13_spill]] }
  0x86   : > { %5828 = vmatprep.subr.bf16.mxu0 %v6111_v0  ;;  %v2663_v40 = vld [vmem:[%s2240_s1] sm:$0xff] }
  0x87   : > { %5824 = vmatpush3.bf16.msra.mxu1 %v5823_v11  ;;  %v2364_v46 = vld [vmem:[%s2191_s7] sm:$0xff]  ;;  %s6835_s7 = sld [smem:[#allocation14_spill]] }
  0x88   : > { %5646 = vmatprep.subr.mxu1 %v6113_v1  ;;  %2748 = vperm.xlu1 %5974, %v2364_v46   ;;  %v5459_v50 = vld [vmem:[%s2243_s10] ss:$0 sm:$0xff]  ;;  %s6836_s10 = sld [smem:[#allocation15_spill]] }
  0x89   : > { %5830 = vmatpush3.bf16.msra.mxu0 %v5829_v22 }
  0x8b   : > { %s2248_s1 = scalar_lea.vmem %s6833_s11, %s6449_s26 }
  0x8c   : > { %2753 = vperm.xlu1 %5974, %v2365_v48   ;;  %v2886_v57 = vld [vmem:[%s2248_s1] sm:$0xff]  ;;  %v2887_v58 = vld [vmem:[%s2248_s1 + $0x8] sm:$0xff]  ;;  %v2888_v60 = vld [vmem:[%s2248_s1 + $0x10] sm:$0xff] }
  0x8d   : > { %v5831_v59 = vpack.c.bf16 %v2887_v58, %v2886_v57  ;;  %v2889_v61 = vld [vmem:[%s2248_s1 + $0x18] sm:$0xff]  ;;  %s2251_s11 = scalar_lea.vmem %s6835_s7, %s6875_s16  ;;  %s6838_s7 = sld [smem:[#allocation16_spill]] }
  0x8e   : > { %v5835_v62 = vpack.c.bf16 %v2889_v61, %v2888_v60  ;;  %v5467_v22 = vld [vmem:[%s2251_s11] ss:$0 sm:$0xff]  ;;  %s2254_s1 = scalar_lea.vmem %s6836_s10, %s6875_s16  ;;  %s6839_s10 = sld [smem:[#allocation18_spill]] }
  0x90   : > { %2763 = vperm.xlu1 %5974, %v2367_v49  }
  0x93   : > { %s2257_s11 = scalar_lea.vmem %s6838_s7, %s6875_s16  ;;  %s6842_s7 = sld [smem:[#allocation8_spill]] }
 0x107   : > { %v2749_v63 = vpop.permute.xlu1 %2748 }
 0x10b   : > { %v2754_v2 = vpop.permute.xlu1 %2753 }
 0x10f   : > { %v2764_v7 = vpop.permute.xlu1 %2763 }
 0x157   : > { %v2464_v13 = vpop.f32.mrb[0].mxu0 }
 0x158   : > { %v2465_v14 = vadd.f32 %v5453_v12, %v2464_v13  ;;  %v5623_v15 = vpop.f32.mrb[1].mxu0 }
 0x15a   : > { %5976 = vtanh.f32 %v2465_v14 }
 0x164   : > { %v5977_v16 = vpop.eup %5976 }
 0x165   : > { %5633 = vmatmul.mubr.msk.f32.vlgmr.msra.gmra.mrb[0].mxu1 %vm2480_vm2, %v5977_v16 }
 0x166   : > { %5648 = vmatprep.mubr.msk.f32.mxu1 %vm6112_vm0, %v6113_v1  ;;  %5647 = vmatpush3.msra.mxu1 %v2663_v40 }
 0x167   : > { %5832 = vmatprep.subr.bf16.mxu1 %v5831_v59 }
 0x238   : > { %v2550_v24 = vpop.f32.mrb[0].mxu1 }
 0x239   : > { %v2551_v25 = vadd.f32 %v5455_v23, %v2550_v24  ;;  %v5634_v26 = vpop.f32.mrb[1].mxu1 }
 0x23b   : > { %5978 = vtanh.f32 %v2551_v25 }
 0x245   : > { %v5979_v27 = vpop.eup %5978 }
 0x246   : > { %5644 = vmatmul.mubr.msk.f32.vlgmr.msra.gmra.mrb[2].mxu0 %vm2480_vm2, %v5979_v27 }
 0x247   : > { %5653 = vmatprep.mubr.msk.f32.mxu0 %vm2776_vm5, %v6492_v44 }
 0x319   : > { %v2635_v29 = vpop.f32.mrb[2].mxu0 }
 0x31a   : > { %v6472_v31 = vadd.f32 %v5457_v28, %v2635_v29  ;;  %v5645_v32 = vpop.f32.mrb[3].mxu0 }
 0x31b   : > { %v5472_v32 = vld [vmem:[%s2254_s1] ss:$0 sm:$0xff]  ;;  %s6840_s1 = sld [smem:[#allocation9_spill]] }
 0x31c   : > { %4548 = vst.msk [vmem:[%s2322_s22] sm:$0x3] %vm2639_vm3, %v6472_v31  ;;  %v2651_v33 = vadd.f32 %v6472_v31, %v2372_v30  ;;  %s6834_s22 = sld [smem:[#allocation11_spill]] }
 0x31e   : > { %v2652_v34 = vsel %vm2639_vm3, %v2651_v33, -inf }
 0x31f   : > { %2653 = vmax.xlane.f32.xlu0 %v2652_v34 }
 0x3ac   : > { %v2654_v35 = vpop.xlane.xlu0 %2653 }
 0x3ad   : > { %v2655_v36 = vsub.f32 %v2651_v33, %v2654_v35 }
 0x3af   : > { %v2656_v37 = vmul.f32 1.442695, %v2655_v36 }
 0x3b1   : > { %5980 = vpow2.f32 %v2656_v37 }
 0x3bb   : > { %v5981_v38 = vpop.eup %5980 }
 0x3bc   : > { %v2658_v39 = vsel %vm2639_vm3, %v5981_v38, 0.0 }
 0x3bd   : > { %2659 = vadd.xlane.f32.xlu0 %v2658_v39 }
 0x3d3   : > { %2758 = vperm.xlu0 %5975, %v2366_v47  }
 0x44a   : > { %v2660_v41 = vpop.xlane.xlu0 %2659 }
 0x44b   : > { %5982 = vrcp.f32 %v2660_v41 }
 0x452   : > { %v2759_v5 = vpop.permute.xlu0 %2758 }
 0x455   : > { %v5983_v42 = vpop.eup %5982 }
 0x456   : > { %v6485_v43 = vmul.f32 %v5983_v42, %v5981_v38 }
 0x458   : > { %4550 = vst.msk [vmem:[%s2330_s2] sm:$0x3] %vm2639_vm3, %v6485_v43  ;;  %5649 = vmatmul.mubr.msk.f32.vlgmr.msra.gmra.mrb[2].mxu1 %vm2671_vm4, %v6485_v43  ;;  %s2236_s2 = scalar_lea.vmem %s6834_s22, %s6875_s16  ;;  %s6837_s22 = sld [smem:[#allocation17_spill]] }
 0x459   : > { %5834 = vmatpush3.bf16.msra.mxu1 %v5831_v59  ;;  %v5461_v3 = vld [vmem:[%s2236_s2] ss:$0 sm:$0xff] }
 0x45a   : > { %5836 = vmatprep.subr.bf16.mxu1 %v5835_v62  ;;  %v2773_v4 = vmul.f32 %v5461_v3, %v2754_v2  ;;  %v2772_v6 = vmul.f32 %v5461_v3, %v2749_v63  ;;  %v2774_v12 = vmul.f32 %v5461_v3, %v2759_v5  ;;  %v2775_v13 = vmul.f32 %v5461_v3, %v2764_v7  ;;  %v5473_v59 = vld [vmem:[%s2257_s11] ss:$0 sm:$0xff]  ;;  %s6843_s11 = sld [smem:[#allocation19_spill]] }
 0x45d   : > { %5838 = vmatpush3.bf16.msra.mxu1 %v5835_v62 }
 0x45e   : > { %5845 = vmatprep.subr.bf16.mxu1 %v6111_v0  ;;  %s2260_s2 = scalar_lea.vmem %s6837_s22, %s6875_s16  ;;  %s2263_s22 = scalar_lea.vmem %s6839_s10, %s6875_s16 }
 0x45f   : > { %v5474_v46 = vld [vmem:[%s2260_s2] ss:$0 sm:$0xff]  ;;  %s6841_s2 = sld [smem:[#allocation3_spill]] }
 0x460   : > { %v5475_v3 = vld [vmem:[%s2263_s22] ss:$0 sm:$0xff]  ;;  %s6844_s22 = sld [smem:[#allocation23_spill]] }
 0x465   : > { %s2196_s10 = scalar_lea.vmem %s6841_s2, %s6432_s0  ;;  %s2267_s2 = scalar_lea.vmem %s6843_s11, %s5432_s28 }
 0x466   : > { %s5519_s28 = sshll.u32 %s6875_s16, 6  ;;  %s6846_s11 = sld [smem:[#allocation41_spill]] }
 0x52b   : > { %v2741_v51 = vpop.f32.mrb[2].mxu1 }
 0x52c   : > { %v2742_v52 = vadd.f32 %v5459_v50, %v2741_v51  ;;  %v5650_v53 = vpop.f32.mrb[3].mxu1 }
 0x52e   : > { %5651 = vmatprep.subr.msk.mxu0 %vm2789_vm6, %v2742_v52 }
 0x52f   : > { %5652 = vmatpush3.msk.msra.mxu0 %vm2789_vm6, %v2742_v52 }
 0x530   : > { %5654 = vmatmul.mubr.msk.f32.vlgmr.msra.gmra.mrb[4].mxu0 %vm2776_vm5, %v6501_v54  ;;  %5839 = vmatprep.subr.bf16.mxu0 %v6111_v0 }
 0x531   : > { %5656 = vmatprep.mubr.msk.f32.mxu0 %vm2776_vm5, %v6505_v55 }
 0x534   : > { %5657 = vmatmul.mubr.msk.f32.gmra.mrb[6].mxu0 %vm2776_vm5, %v6514_v56 }
 0x535   : > { %5681 = vmatprep.mubr.msk.f32.mxu0 %vm6112_vm0, %v6113_v1 }
 0x603   : > { %v5655_v8 = vpop.f32.mrb[4].mxu0 }
 0x604   : > { %v2879_v9 = vadd.f32 %v5655_v8, %v2773_v4  ;;  %v2859_v10 = vpop.f32.mrb[5].mxu0 }
 0x605   : > { %v2878_v11 = vadd.f32 %v2859_v10, %v2772_v6 }
 0x607   : > { %5984 = vtanh.f32 %v2878_v11  ;;  %v5658_v14 = vpop.f32.mrb[6].mxu0 }
 0x608   : > { %5986 = vtanh.f32 %v2879_v9  ;;  %v2881_v15 = vadd.f32 %v5658_v14, %v2775_v13  ;;  %v2869_v16 = vpop.f32.mrb[7].mxu0 }
 0x609   : > { %v2880_v17 = vadd.f32 %v2869_v16, %v2774_v12  ;;  %v6550_v16 = vld [vmem:[%s6840_s1 + $0x8] sm:$0xff] }
 0x60b   : > { %5988 = vtanh.f32 %v2880_v17 }
 0x60c   : > { %5990 = vtanh.f32 %v2881_v15 }
 0x611   : > { %v5985_v18 = vpop.eup %5984 }
 0x612   : > { %v5987_v19 = vpop.eup %5986  ;;  %5667 = vmatprep.mubr.msk.f32.mxu1 %vm2480_vm2, %v5985_v18  ;;  %v6553_v18 = vld [vmem:[%s6840_s1] sm:$0xff] }
 0x613   : > { %5668 = vmatmul.mubr.msk.f32.vlgmr.msra.gmra.mrb[4].mxu1 %vm2480_vm2, %v5987_v19 }
 0x615   : > { %v5989_v20 = vpop.eup %5988 }
 0x616   : > { %v5991_v21 = vpop.eup %5990  ;;  %5670 = vmatprep.mubr.msk.f32.mxu1 %vm2480_vm2, %v5989_v20 }
 0x617   : > { %5671 = vmatmul.mubr.msk.f32.gmra.mrb[6].mxu1 %vm2480_vm2, %v5991_v21 }
 0x618   : > { %5692 = vmatprep.mubr.msk.f32.mxu1 %vm6112_vm0, %v6113_v1 }
 0x6e6   : > { %v5669_v23 = vpop.f32.mrb[4].mxu1 }
 0x6e7   : > { %v2981_v24 = vadd.f32 %v5669_v23, %v5467_v22  ;;  %v2975_v25 = vpop.f32.mrb[5].mxu1 }
 0x6e8   : > { %v2976_v26 = vadd.f32 %v5467_v22, %v2975_v25 }
 0x6e9   : > { %5992 = vtanh.f32 %v2981_v24 }
 0x6ea   : > { %5994 = vtanh.f32 %v2976_v26  ;;  %v5672_v27 = vpop.f32.mrb[6].mxu1 }
 0x6eb   : > { %v2991_v28 = vadd.f32 %v5672_v27, %v5467_v22  ;;  %v2985_v29 = vpop.f32.mrb[7].mxu1 }
 0x6ec   : > { %v2986_v30 = vadd.f32 %v5467_v22, %v2985_v29  ;;  %v6567_v29 = vld [vmem:[%s6840_s1 + $0x10] sm:$0xff] }
 0x6ed   : > { %5996 = vtanh.f32 %v2991_v28  ;;  %v6561_v28 = vld [vmem:[%s6840_s1 + $0x18] sm:$0xff]  ;;  %s2334_s1 = scalar_lea.vmem %s6846_s11, %s6435_s18  ;;  %s6851_s11 = sld [smem:[#allocation22_spill]] }
 0x6ee   : > { %5998 = vtanh.f32 %v2986_v30 }
 0x6f3   : > { %v5993_v33 = vpop.eup %5992  ;;  %s2278_s5 = scalar_lea.vmem %s6851_s11, %s6875_s16 }
 0x6f4   : > { %v5995_v34 = vpop.eup %5994  ;;  %v3006_v35 = vmul.f32 %v5993_v33, %v5472_v32  ;;  %v3040_v50 = vmul.f32 %v5993_v33, %v5474_v46 }
 0x6f5   : > { %v3005_v37 = vmul.f32 %v5995_v34, %v5472_v32  ;;  %v3039_v48 = vmul.f32 %v5995_v34, %v5474_v46 }
 0x6f6   : > { %v3012_v36 = vsel %vm2480_vm2, %v3006_v35, 0.0  ;;  %v3046_v51 = vsel %vm2480_vm2, %v3040_v50, 0.0  ;;  %v2368_v35 = vld [vmem:[%s2196_s10] sm:$0xff] }
 0x6f7   : > { %v5997_v38 = vpop.eup %5996  ;;  %3013 = vadd.xlane.f32.xlu1 %v3012_v36  ;;  %v3009_v41 = vsel %vm2480_vm2, %v3005_v37, 0.0  ;;  %v3043_v49 = vsel %vm2480_vm2, %v3039_v48, 0.0  ;;  %v2369_v36 = vld [vmem:[%s2196_s10 + $0x8] sm:$0xff]  ;;  %s6845_s10 = sld [smem:[#allocation21_spill]] }
 0x6f8   : > { %v5999_v39 = vpop.eup %5998  ;;  %v3008_v42 = vmul.f32 %v5997_v38, %v5472_v32  ;;  %v3042_v57 = vmul.f32 %v5997_v38, %v5474_v46 }
 0x6f9   : > { %v3007_v40 = vmul.f32 %v5999_v39, %v5472_v32  ;;  %v3041_v52 = vmul.f32 %v5999_v39, %v5474_v46  ;;  %v3415_v46 = vld [vmem:[%s2267_s2] sm:$0xff] }
 0x6fa   : > { %v3018_v47 = vsel %vm2480_vm2, %v3008_v42, 0.0  ;;  %v3052_v58 = vsel %vm2480_vm2, %v3042_v57, 0.0  ;;  %v5852_v42 = vpack.c.bf16 %v2369_v36, %v2368_v35  ;;  %v5482_v35 = vld [vmem:[%s2278_s5] ss:$0 sm:$0xff] }
 0x6fb   : > { %3010 = vadd.xlane.f32.xlu1 %v3009_v41  ;;  %v3015_v45 = vsel %vm2480_vm2, %v3007_v40, 0.0  ;;  %v3049_v53 = vsel %vm2480_vm2, %v3041_v52, 0.0  ;;  %v6574_v41 = vld [vmem:[%s6842_s7] sm:$0x3]  ;;  %s2283_s7 = scalar_lea.vmem %s6844_s22, %s5519_s28  ;;  %s6847_s22 = sld [smem:[#allocation20_spill]] }
 0x6fc   : > { %3016 = vadd.xlane.f32.xlu0 %v3015_v45  ;;  %v3584_v48 = vld [vmem:[%s2283_s7 + $0x8] sm:$0xff]  ;;  %v3585_v50 = vld [vmem:[%s2283_s7 + $0x10] sm:$0xff] }
 0x6fd   : > { %s6602_s2 = scalar_lea.vmem %s6845_s10, %s5519_s28  ;;  %s6850_s10 = sld [smem:[#allocation38_spill]] }
 0x6ff   : > { %3019 = vadd.xlane.f32.xlu1 %v3018_v47  ;;  %v3583_v47 = vld [vmem:[%s2283_s7] sm:$0xff] }
 0x701   : > { %s2270_s28 = scalar_lea.vmem %s6847_s22, %s6875_s16 }
 0x703   : > { %3044 = vadd.xlane.f32.xlu1 %v3043_v49  ;;  %v5870_v49 = vpack.c.bf16 %v3584_v48, %v3583_v47  ;;  %s2314_s3 = scalar_lea.vmem %s6850_s10, %s6435_s18 }
 0x707   : > { %3047 = vadd.xlane.f32.xlu1 %v3046_v51  ;;  %v3586_v51 = vld [vmem:[%s2283_s7 + $0x18] sm:$0xff] }
 0x708   : > { %v5873_v52 = vpack.c.bf16 %v3586_v51, %v3585_v50 }
 0x70b   : > { %3050 = vadd.xlane.f32.xlu1 %v3049_v53  ;;  %v3587_v53 = vld [vmem:[%s2283_s7 + $0x20] sm:$0xff] }
 0x70f   : > { %3053 = vadd.xlane.f32.xlu1 %v3052_v58  ;;  %v3589_v58 = vld [vmem:[%s2283_s7 + $0x30] sm:$0xff] }
 0x784   : > { %v3014_v60 = vpop.xlane.xlu1 %3013 }
 0x785   : > { %v3029_v61 = vadd.f32 %v5473_v59, %v3014_v60 }
 0x787   : > { %3073 = vperm.xlu0 %5975, %v3029_v61   ;;  %v3494_v61 = vld [vmem:[%s6602_s2] sm:$0xff] }
 0x788   : > { %v3011_v62 = vpop.xlane.xlu1 %3010 }
 0x789   : > { %v3028_v7 = vadd.f32 %v5473_v59, %v3011_v62  ;;  %v3017_v11 = vpop.xlane.xlu0 %3016  ;;  %v3495_v62 = vld [vmem:[%s6602_s2 + $0x8] sm:$0xff] }
 0x78a   : > { %v3030_v12 = vadd.f32 %v5473_v59, %v3017_v11  ;;  %v3499_v11 = vld [vmem:[%s6602_s2 + $0x28] sm:$0xff] }
 0x78c   : > { %v3020_v63 = vpop.xlane.xlu1 %3019 }
 0x78d   : > { %v3031_v10 = vadd.f32 %v5473_v59, %v3020_v63  ;;  %v3590_v59 = vld [vmem:[%s2283_s7 + $0x38] sm:$0xff] }
 0x78e   : > { %v5879_v60 = vpack.c.bf16 %v3590_v59, %v3589_v58 }
 0x790   : > { %v3045_v2 = vpop.xlane.xlu1 %3044 }
 0x791   : > { %v3062_v9 = vadd.f32 %v5475_v3, %v3045_v2 }
 0x794   : > { %v3048_v4 = vpop.xlane.xlu1 %3047 }
 0x795   : > { %v3063_v5 = vadd.f32 %v5475_v3, %v3048_v4  ;;  %v3496_v4 = vld [vmem:[%s6602_s2 + $0x10] sm:$0xff] }
 0x797   : > { %3170 = vperm.xlu1 %5974, %v3063_v5   ;;  %v3497_v5 = vld [vmem:[%s6602_s2 + $0x18] sm:$0xff] }
 0x798   : > { %v3051_v6 = vpop.xlane.xlu1 %3050 }
 0x799   : > { %v3064_v8 = vadd.f32 %v5475_v3, %v3051_v6 }
 0x79b   : > { %3068 = vperm.xlu1 %5974, %v3028_v7   ;;  %3175 = vperm.xlu0 %5975, %v3064_v8   ;;  %v5480_v8 = vld [vmem:[%s2270_s28] ss:$0 sm:$0xff] }
 0x79c   : > { %v3054_v13 = vpop.xlane.xlu1 %3053 }
 0x79d   : > { %v3065_v14 = vadd.f32 %v5475_v3, %v3054_v13  ;;  %v5858_v3 = vpack.c.bf16 %v3495_v62, %v3494_v61 }
 0x79f   : > { %3165 = vperm.xlu1 %5974, %v3062_v9   ;;  %v5861_v9 = vpack.c.bf16 %v3497_v5, %v3496_v4 }
 0x7a3   : > { %3083 = vperm.xlu1 %5974, %v3031_v10   ;;  %v3498_v10 = vld [vmem:[%s6602_s2 + $0x20] sm:$0xff] }
 0x7a7   : > { %3078 = vperm.xlu1 %5974, %v3030_v12  }
 0x7ab   : > { %3180 = vperm.xlu1 %5974, %v3065_v14  }
 0x806   : > { %v3074_v17 = vpop.permute.xlu0 %3073 }
 0x807   : > { %v3087_v20 = vmul.f32 %v3074_v17, %v6550_v16  ;;  %v3500_v17 = vld [vmem:[%s6602_s2 + $0x30] sm:$0xff] }
 0x816   : > { %v3171_v15 = vpop.permute.xlu1 %3170 }
 0x817   : > { %v3184_v24 = vmul.f32 %v3171_v15, %v6550_v16  ;;  %v5864_v15 = vpack.c.bf16 %v3499_v11, %v3498_v10 }
 0x81a   : > { %v3069_v19 = vpop.permute.xlu1 %3068  ;;  %v3176_v34 = vpop.permute.xlu0 %3175 }
 0x81b   : > { %v3086_v21 = vmul.f32 %v3069_v19, %v6553_v18  ;;  %v3185_v39 = vmul.f32 %v3176_v34, %v6567_v29  ;;  %v3501_v19 = vld [vmem:[%s6602_s2 + $0x38] sm:$0xff]  ;;  %s6852_s2 = sld [smem:[#allocation24_spill]] }
 0x81d   : > { %v5840_v22 = vpack.c.bf16 %v3087_v20, %v3086_v21  ;;  %v5867_v20 = vpack.c.bf16 %v3501_v19, %v3500_v17 }
 0x81e   : > { %v3166_v23 = vpop.permute.xlu1 %3165 }
 0x81f   : > { %v3183_v25 = vmul.f32 %v3166_v23, %v6553_v18  ;;  %5841 = vmatpush3.bf16.msra.mxu0 %v5840_v22 }
 0x820   : > { %5842 = vmatprep.subr.bf16.mxu0 %v6111_v0 }
 0x821   : > { %v5846_v26 = vpack.c.bf16 %v3184_v24, %v3183_v25  ;;  %s2286_s6 = scalar_lea.vmem %s6852_s2, %s6875_s16  ;;  %s6858_s2 = sld [smem:[#allocation25_spill]] }
 0x822   : > { %v3084_v27 = vpop.permute.xlu1 %3083  ;;  %v5484_v36 = vld [vmem:[%s2286_s6] ss:$0 sm:$0xff]  ;;  %s6855_s6 = sld [smem:[#allocation42_spill]] }
 0x823   : > { %5847 = vmatpush3.bf16.msra.mxu1 %v5846_v26  ;;  %v3089_v32 = vmul.f32 %v3084_v27, %v6561_v28 }
 0x824   : > { %5848 = vmatprep.subr.bf16.mxu1 %v6111_v0 }
 0x826   : > { %v3079_v30 = vpop.permute.xlu1 %3078 }
 0x827   : > { %v3088_v33 = vmul.f32 %v3079_v30, %v6567_v29 }
 0x828   : > { %s2338_s10 = scalar_lea.vmem %s6855_s6, %s6435_s18 }
 0x829   : > { %v5843_v37 = vpack.c.bf16 %v3089_v32, %v3088_v33 }
 0x82a   : > { %v3181_v38 = vpop.permute.xlu1 %3180 }
 0x82b   : > { %v3186_v40 = vmul.f32 %v3181_v38, %v6561_v28  ;;  %5844 = vmatpush3.bf16.msra.mxu0 %v5843_v37 }
 0x82c   : > { %5851 = vmatprep.subr.bf16.mxu0 %v6111_v0 }
 0x82d   : > { %v5849_v45 = vpack.c.bf16 %v3186_v40, %v3185_v39 }
 0x82e   : > { %5682 = vmatmul.mubr.msk.f32.vlgmr.msra.gmra.mrb[8].mxu0 %vm2480_vm2, %v6574_v41 }
 0x82f   : > { %5850 = vmatpush3.bf16.msra.mxu1 %v5849_v45  ;;  %5853 = vmatpush3.bf16.msra.mxu0 %v5852_v42 }
 0x830   : > { %5709 = vmatprep.subr.mxu1 %v6113_v1  ;;  %5699 = vmatprep.mubr.msk.f32.mxu0 %vm6112_vm0, %v6113_v1 }
 0x831   : > { %5854 = vmatprep.subr.bf16.mxu0 %v6111_v0 }
 0x832   : > { %5693 = vmatmul.mubr.msk.f32.vlgmr.msra.gmra.mrb[8].mxu1 %vm2480_vm2, %v6574_v41 }
 0x833   : > { %5710 = vmatpush3.msra.mxu1 %v3415_v46  ;;  %5711 = vmatprep.mubr.msk.f32.mxu1 %vm6112_vm0, %v6113_v1 }
 0x834   : > { %5869 = vmatprep.subr.bf16.mxu1 %v6111_v0 }
 0x836   : > { %5712 = vmatmul.mubr.msk.f32.vlgmr.msra.gmra.mrb[10].mxu1 %vm2671_vm4, %v6485_v43  ;;  %v3588_v43 = vld [vmem:[%s2283_s7 + $0x28] sm:$0xff]  ;;  %s6849_s7 = sld [smem:[#allocation37_spill]] }
 0x837   : > { %5749 = vmatprep.mubr.msk.f32.mxu1 %vm6112_vm0, %v6113_v1  ;;  %5871 = vmatpush3.bf16.msra.mxu1 %v5870_v49  ;;  %v5876_v57 = vpack.c.bf16 %v3588_v43, %v3587_v53 }
 0x838   : > { %5872 = vmatprep.subr.bf16.mxu1 %v6111_v0 }
 0x83b   : > { %5874 = vmatpush3.bf16.msra.mxu1 %v5873_v52 }
 0x83c   : > { %5875 = vmatprep.subr.bf16.mxu1 %v6111_v0  ;;  %s2310_s28 = scalar_lea.vmem %s6849_s7, %s6435_s18  ;;  %s6856_s7 = sld [smem:[#allocation43_spill]] }
 0x83f   : > { %5877 = vmatpush3.bf16.msra.mxu1 %v5876_v57 }
 0x840   : > { %5878 = vmatprep.subr.bf16.mxu1 %v6111_v0 }
 0x842   : > { %s2342_s11 = scalar_lea.vmem %s6856_s7, %s6435_s18 }
 0x843   : > { %5880 = vmatpush3.bf16.msra.mxu1 %v5879_v60 }
 0x844   : > { %5884 = vmatprep.subr.bf16.mxu1 %v6111_v0 }
 0x901   : > { %v3159_v63 = vpop.f32.mrb[8].mxu0 }
 0x902   : > { %4551 = vst.msk [vmem:[%s2334_s1] sm:$0x3] %vm4455_vm7, %v3159_v63  ;;  %v5683_v2 = vpop.f32.mrb[9].mxu0  ;;  %5700 = vmatmul.mubr.msk.f32.vlgmr.msra.gmra.mrb[10].mxu0 %vm2394_vm1, %v3159_v63  ;;  %s6848_s1 = sld [smem:[#allocation4_spill]] }
 0x903   : > { %5856 = vmatpush3.bf16.msra.mxu0 %v5852_v42  ;;  %5706 = vmatprep.mubr.msk.f32.mxu0 %vm6112_vm0, %v6113_v1 }
 0x904   : > { %5857 = vmatprep.subr.bf16.mxu0 %v6111_v0 }
 0x905   : > { %v3253_v6 = vpop.f32.mrb[8].mxu1 }
 0x906   : > { %v5694_v7 = vpop.f32.mrb[9].mxu1  ;;  %5707 = vmatmul.mubr.msk.f32.vlgmr.msra.gmra.mrb[12].mxu0 %vm2394_vm1, %v3253_v6 }
 0x907   : > { %5859 = vmatpush3.bf16.msra.mxu0 %v5858_v3  ;;  %5730 = vmatprep.mubr.msk.f32.mxu0 %vm6112_vm0, %v6113_v1 }
 0x908   : > { %5860 = vmatprep.subr.bf16.mxu0 %v6111_v0  ;;  %s2201_s22 = scalar_lea.vmem %s6848_s1, %s6432_s0  ;;  %s6853_s0 = sld [smem:[#allocation5_spill]] }
 0x909   : > { %v3489_v12 = vpop.f32.mrb[10].mxu1  ;;  %v2370_v22 = vld [vmem:[%s2201_s22] sm:$0xff]  ;;  %v2371_v23 = vld [vmem:[%s2201_s22 + $0x8] sm:$0xff]  ;;  %s6854_s1 = sld [smem:[#allocation39_spill]]  ;;  %s6857_s22 = sld [smem:[#allocation27_spill]] }
 0x90a   : > { %v3490_v13 = vadd.f32 %v5480_v8, %v3489_v12  ;;  %v5713_v14 = vpop.f32.mrb[11].mxu1  ;;  %v5882_v24 = vpack.c.bf16 %v2371_v23, %v2370_v22 }
 0x90b   : > { %5862 = vmatpush3.bf16.msra.mxu0 %v5861_v9 }
 0x90c   : > { %6000 = vtanh.f32 %v3490_v13  ;;  %5863 = vmatprep.subr.bf16.mxu0 %v6111_v0 }
 0x90e   : > { %s2209_s5 = scalar_lea.vmem %s6853_s0, %s6435_s18 }
 0x90f   : > { %5865 = vmatpush3.bf16.msra.mxu0 %v5864_v15  ;;  %v2373_v49 = vld [vmem:[%s2209_s5] sm:$0x3]  ;;  %s2297_s0 = scalar_lea.vmem %s6857_s22, %s6449_s26  ;;  %s6860_s26 = sld [smem:[#allocation28_spill]] }
 0x910   : > { %5866 = vmatprep.subr.bf16.mxu0 %v6111_v0  ;;  %s6863_s22 = sld [smem:[#allocation31_spill]] }
 0x913   : > { %5868 = vmatpush3.bf16.msra.mxu0 %v5867_v20 }
 0x914   : > { %5881 = vmatprep.subr.bf16.mxu0 %v6111_v0 }
 0x915   : > { %s2300_s6 = scalar_lea.vmem %s6860_s26, %s6875_s16 }
 0x916   : > { %v6001_v21 = vpop.eup %6000 }
 0x917   : > { %5731 = vmatmul.mubr.msk.f32.vlgmr.msra.gmra.mrb[14].mxu0 %vm3509_vm8, %v6001_v21  ;;  %5750 = vmatmul.mubr.msk.f32.vlgmr.msra.gmra.mrb[12].mxu1 %vm3509_vm8, %v6001_v21 }
 0x918   : > { %5756 = vmatprep.mubr.msk.f32.mxu0 %vm6112_vm0, %v6113_v1  ;;  %5763 = vmatprep.mubr.msk.f32.mxu1 %vm6112_vm0, %v6113_v1 }
 0x919   : > { %5883 = vmatpush3.bf16.msra.mxu0 %v5882_v24  ;;  %5886 = vmatpush3.bf16.msra.mxu1 %v5882_v24 }
 0x9d5   : > { %v3326_v25 = vpop.f32.mrb[10].mxu0 }
 0x9d6   : > { %4545 = vst.msk [vmem:[%s2310_s28] sm:$0x3] %vm4455_vm7, %v3326_v25  ;;  %v5701_v26 = vpop.f32.mrb[11].mxu0  ;;  %s6859_s28 = sld [smem:[#allocation26_spill]] }
 0x9d9   : > { %v3399_v27 = vpop.f32.mrb[12].mxu0 }
 0x9da   : > { %v3403_v30 = vmul.f32 1.442695, %v3399_v27  ;;  %v5708_v32 = vpop.f32.mrb[13].mxu0 }
 0x9db   : > { %v3947_v32 = vld [vmem:[%s2297_s0 + $0x8] sm:$0xff] }
 0x9dc   : > { %6002 = vpow2.f32 %v3403_v30  ;;  %v3946_v30 = vld [vmem:[%s2297_s0] sm:$0xff]  ;;  %s2292_s5 = scalar_lea.vmem %s6859_s28, %s6875_s16  ;;  %s6865_s28 = sld [smem:[#allocation40_spill]] }
 0x9e2   : > { %s2326_s26 = scalar_lea.vmem %s6865_s28, %s6435_s18 }
 0x9e6   : > { %v6003_v33 = vpop.eup %6002 }
 0x9e7   : > { %v3405_v34 = vadd.f32 1e-10, %v6003_v33  ;;  %4546 = vst.msk [vmem:[%s2314_s3] sm:$0x3] %vm4455_vm7, %v6003_v33  ;;  %v4478_v46 = vadd.f32 1e-08, %v6003_v33  ;;  %s2318_s3 = scalar_lea.vmem %s6854_s1, %s6435_s18  ;;  %v5887_v33 = vpack.c.bf16 %v3947_v32, %v3946_v30  ;;  %s2289_s1 = scalar_lea.vmem %s6858_s2, %s6875_s16 }
 0x9e8   : > { %s6864_s2 = sld [smem:[#allocation33_spill]] }
 0x9e9   : > { %6004 = vrsqrt.f32 %v3405_v34  ;;  %vm3408_vm9 = vcmp.eq.f32.partialorder %v3405_v34, inf  ;;  %v3411_v50 = vand.u32 2147483648, %v3405_v34  ;;  %vm3410_vm10 = vcmp.eq.f32.partialorder %v3405_v34, 0.0  ;;  %5888 = vmatprep.subr.bf16.mxu1 %v5887_v33 }
 0x9ea   : > { %v3579_v37 = vpop.f32.mrb[14].mxu0  ;;  %v3664_v38 = vpop.f32.mrb[12].mxu1  ;;  %6006 = vlog2.f32 %v4478_v46 }
 0x9eb   : > { %v3580_v39 = vadd.f32 %v5482_v35, %v3579_v37  ;;  %v3665_v40 = vadd.f32 %v5484_v36, %v3664_v38  ;;  %v5732_v42 = vpop.f32.mrb[15].mxu0  ;;  %v5751_v45 = vpop.f32.mrb[13].mxu1  ;;  %6008 = vrcp.f32 %v4478_v46  ;;  %v3949_v35 = vld [vmem:[%s2297_s0 + $0x18] sm:$0xff]  ;;  %v5493_v37 = vld [vmem:[%s2289_s1] ss:$0 sm:$0xff]  ;;  %s6867_s1 = sld [smem:[#allocation32_spill]] }
 0x9ec   : > { %v5494_v38 = vld [vmem:[%s2292_s5] ss:$0 sm:$0xff]  ;;  %s6868_s5 = sld [smem:[#allocation35_spill]] }
 0x9ed   : > { %5757 = vmatmul.mubr.msk.f32.vlgmr.msra.gmra.mrb[16].mxu0 %vm2394_vm1, %v3580_v39  ;;  %5764 = vmatmul.mubr.msk.f32.vlgmr.msra.gmra.mrb[14].mxu1 %vm2394_vm1, %v3665_v40 }
 0x9ee   : > { %5768 = vmatprep.mubr.msk.f32.mxu0 %vm2776_vm5, %v6492_v44  ;;  %5890 = vmatpush3.bf16.msra.mxu1 %v5887_v33  ;;  %v2640_v33 = vsel %vm2639_vm3, %v6472_v31, -inf }
 0x9f3   : > { %v6005_v47 = vpop.eup %6004 }
 0x9f4   : > { %v3407_v48 = vmul.f32 %v6005_v47, %v3405_v34  ;;  %v6007_v43 = vpop.eup %6006 }
 0x9f5   : > { %v4480_v44 = vmul.f32 0.6931472, %v6007_v43  ;;  %v6009_v60 = vpop.eup %6008 }
 0x9f6   : > { %v3409_v51 = vsel %vm3408_vm9, %v3405_v34, %v3407_v48  ;;  %v3948_v34 = vld [vmem:[%s2297_s0 + $0x10] sm:$0xff]  ;;  %s6866_s0 = sld [smem:[#allocation44_spill]] }
 0x9f7   : > { %v3412_v52 = vsel %vm3410_vm10, %v3411_v50, %v3409_v51  ;;  %v4481_v61 = vadd.f32 1.837877, %v4480_v44  ;;  %v5891_v36 = vpack.c.bf16 %v3949_v35, %v3948_v34 }
 0x9f8   : > { %v3413_v53 = vmul.f32 %v3412_v52, %v2373_v49 }
 0x9f9   : > { %5892 = vmatprep.subr.bf16.mxu1 %v5891_v36 }
 0x9fa   : > { %v6652_v57 = vadd.f32 %v3413_v53, %v3326_v25  ;;  %5894 = vmatpush3.bf16.msra.mxu1 %v5891_v36 }
 0x9fb   : > { %5806 = vmatprep.subr.mxu1 %v6113_v1 }
 0x9fc   : > { %5766 = vmatprep.subr.msk.mxu0 %vm2789_vm6, %v6652_v57  ;;  %4547 = vst.msk [vmem:[%s2318_s3] sm:$0x3] %vm4455_vm7, %v6652_v57  ;;  %v4482_v58 = vsub.f32 %v6652_v57, %v3326_v25  ;;  %s6861_s3 = sld [smem:[#allocation29_spill]] }
 0x9fd   : > { %5767 = vmatpush3.msk.msra.mxu0 %vm2789_vm6, %v6652_v57 }
 0x9fe   : > { %5769 = vmatmul.mubr.msk.f32.vlgmr.msra.gmra.mrb[18].mxu0 %vm2776_vm5, %v6501_v54  ;;  %5895 = vmatprep.subr.bf16.mxu0 %v6111_v0  ;;  %v4483_v59 = vmul.f32 %v4482_v58, %v4482_v58 }
 0x9ff   : > { %5771 = vmatprep.mubr.msk.f32.mxu0 %vm2776_vm5, %v6505_v55 }
 0xa00   : > { %v4485_v62 = vmul.f32 %v6009_v60, %v4483_v59  ;;  %v5495_v60 = vld [vmem:[%s2300_s6] ss:$0 sm:$0xff]  ;;  %s2346_s6 = scalar_lea.vmem %s6866_s0, %s6435_s18  ;;  %s2356_s0 = scalar_lea.vmem %s6403_s19, %s6875_s16 }
 0xa02   : > { %5772 = vmatmul.mubr.msk.f32.gmra.mrb[20].mxu0 %vm2776_vm5, %v6514_v56  ;;  %v6668_v63 = vadd.f32 %v4485_v62, %v4481_v61  ;;  %s2303_s7 = scalar_lea.vmem %s6861_s3, %s6875_s16  ;;  %s6869_s3 = sld [smem:[#allocation34_spill]] }
 0xa03   : > { %5796 = vmatprep.mubr.msk.f32.mxu0 %vm6112_vm0, %v6113_v1 }
 0xac0   : > { %v3737_v54 = vpop.f32.mrb[16].mxu0  ;;  %v3810_v2 = vpop.f32.mrb[14].mxu1 }
 0xac1   : > { %4552 = vst.msk [vmem:[%s2338_s10] sm:$0x3] %vm4455_vm7, %v3737_v54  ;;  %v3814_v3 = vmul.f32 1.442695, %v3810_v2  ;;  %v5758_v4 = vpop.f32.mrb[17].mxu0  ;;  %v5765_v5 = vpop.f32.mrb[15].mxu1  ;;  %v4497_v13 = vsub.f32 %v6652_v57, %v3737_v54 }
 0xac2   : > { %s6862_s10 = sld [smem:[#allocation30_spill]] }
 0xac3   : > { %6010 = vpow2.f32 %v3814_v3  ;;  %v4498_v21 = vmul.f32 %v4497_v13, %v4497_v13 }
 0xacd   : > { %v6011_v55 = vpop.eup %6010 }
 0xace   : > { %4553 = vst.msk [vmem:[%s2342_s11] sm:$0x3] %vm4455_vm7, %v6011_v55  ;;  %v4493_v6 = vadd.f32 1e-08, %v6011_v55  ;;  %s2306_s11 = scalar_lea.vmem %s6862_s10, %s6875_s16  ;;  %s6871_s10 = sld [smem:[#allocation6_spill]] }
 0xad0   : > { %6012 = vlog2.f32 %v4493_v6 }
 0xad1   : > { %v5770_v56 = vpop.f32.mrb[18].mxu0  ;;  %6014 = vrcp.f32 %v4493_v6  ;;  %v5500_v6 = vld [vmem:[%s2303_s7] ss:$0 sm:$0xff]  ;;  %s6870_s7 = sld [smem:[#allocation36_spill]] }
 0xad2   : > { %v3905_v7 = vmul.f32 %v5770_v56, %v6550_v16  ;;  %v3885_v8 = vpop.f32.mrb[19].mxu0 }
 0xad3   : > { %v3904_v9 = vmul.f32 %v3885_v8, %v6553_v18 }
 0xad4   : > { %v3911_v10 = vsel %vm2394_vm1, %v3905_v7, 0.0 }
 0xad5   : > { %v5773_v11 = vpop.f32.mrb[20].mxu0  ;;  %v3908_v12 = vsel %vm2394_vm1, %v3904_v9, 0.0  ;;  %3912 = vadd.xlane.f32.xlu1 %v3911_v10 }
 0xad6   : > { %3909 = vadd.xlane.f32.xlu0 %v3908_v12  ;;  %v3895_v14 = vpop.f32.mrb[21].mxu0  ;;  %v3907_v17 = vmul.f32 %v5773_v11, %v6561_v28 }
 0xad7   : > { %v3906_v15 = vmul.f32 %v3895_v14, %v6567_v29 }
 0xad8   : > { %v3917_v25 = vsel %vm2394_vm1, %v3907_v17, 0.0 }
 0xad9   : > { %v3914_v19 = vsel %vm2394_vm1, %v3906_v15, 0.0 }
 0xada   : > { %v6013_v20 = vpop.eup %6012  ;;  %3915 = vadd.xlane.f32.xlu0 %v3914_v19 }
 0xadb   : > { %v6015_v22 = vpop.eup %6014  ;;  %v4495_v23 = vmul.f32 0.6931472, %v6013_v20  ;;  %v5501_v20 = vld [vmem:[%s2306_s11] ss:$0 sm:$0xff]  ;;  %s6872_s11 = sld [smem:[#allocation45_spill]] }
 0xadc   : > { %v4500_v24 = vmul.f32 %v6015_v22, %v4498_v21 }
 0xadd   : > { %v4496_v26 = vadd.f32 1.837877, %v4495_v23 }
 0xade   : > { %3918 = vadd.xlane.f32.xlu0 %v3917_v25 }
 0xadf   : > { %v6687_v27 = vadd.f32 %v4500_v24, %v4496_v26 }
 0xae1   : > { %s2350_s28 = scalar_lea.vmem %s6872_s11, %s6435_s18  ;;  %s2353_s18 = scalar_lea.vmem %s6398_s4, %s6875_s16 }
 0xb62   : > { %v3913_v39 = vpop.xlane.xlu1 %3912 }
 0xb63   : > { %v3910_v40 = vpop.xlane.xlu0 %3909  ;;  %v3928_v42 = vmul.f32 %v5493_v37, %v3913_v39 }
 0xb64   : > { %v3927_v45 = vmul.f32 %v5493_v37, %v3910_v40 }
 0xb65   : > { %v3939_v46 = vadd.f32 %v5494_v38, %v3928_v42 }
 0xb66   : > { %v3938_v47 = vadd.f32 %v5494_v38, %v3927_v45 }
 0xb67   : > { %v3916_v48 = vpop.xlane.xlu0 %3915 }
 0xb68   : > { %6016 = vtanh.f32 %v3938_v47  ;;  %v3929_v49 = vmul.f32 %v5493_v37, %v3916_v48  ;;  %v4187_v47 = vld [vmem:[%s6863_s22 + $0x8] sm:$0xff] }
 0xb69   : > { %6018 = vtanh.f32 %v3939_v46  ;;  %v4186_v46 = vld [vmem:[%s6863_s22] sm:$0xff] }
 0xb6a   : > { %v3940_v50 = vadd.f32 %v5494_v38, %v3929_v49  ;;  %v5902_v49 = vpack.c.bf16 %v4187_v47, %v4186_v46 }
 0xb6b   : > { %v3919_v51 = vpop.xlane.xlu0 %3918 }
 0xb6c   : > { %6020 = vtanh.f32 %v3940_v50  ;;  %v3930_v52 = vmul.f32 %v5493_v37, %v3919_v51 }
 0xb6e   : > { %v3941_v53 = vadd.f32 %v5494_v38, %v3930_v52 }
 0xb70   : > { %6022 = vtanh.f32 %v3941_v53  ;;  %v5503_v53 = vld [vmem:[%s6867_s1] ss:$0 sm:$0xff]  ;;  %s2362_s1 = scalar_lea.vmem %s6413_s14, %s6875_s16 }
 0xb72   : > { %v6017_v43 = vpop.eup %6016 }
 0xb73   : > { %v6019_v44 = vpop.eup %6018  ;;  %5782 = vmatprep.mubr.msk.f32.mxu1 %vm2480_vm2, %v6017_v43 }
 0xb74   : > { %5783 = vmatmul.mubr.msk.f32.vlgmr.msra.gmra.mrb[16].mxu1 %vm2480_vm2, %v6019_v44 }
 0xb76   : > { %v6021_v58 = vpop.eup %6020 }
 0xb77   : > { %5785 = vmatprep.mubr.msk.f32.mxu1 %vm2480_vm2, %v6021_v58 }
 0xb7a   : > { %v6023_v59 = vpop.eup %6022 }
 0xb7b   : > { %5786 = vmatmul.mubr.msk.f32.gmra.mrb[18].mxu1 %vm2480_vm2, %v6023_v59 }
 0xb7c   : > { %5808 = vmatprep.mubr.msk.f32.mxu1 %vm6112_vm0, %v6113_v1 }
 0xc47   : > { %v5784_v61 = vpop.f32.mrb[16].mxu1 }
 0xc48   : > { %v4041_v62 = vadd.f32 %v5784_v61, %v5495_v60  ;;  %v4035_v54 = vpop.f32.mrb[17].mxu1  ;;  %v4354_v61 = vld [vmem:[%s6868_s5] sm:$0xf] }
 0xc49   : > { %v4036_v2 = vadd.f32 %v5495_v60, %v4035_v54 }
 0xc4a   : > { %6024 = vtanh.f32 %v4041_v62  ;;  %v5505_v62 = vld [vmem:[%s6869_s3] ss:$0 sm:$0xff] }
 0xc4b   : > { %6026 = vtanh.f32 %v4036_v2 }
 0xc4e   : > { %v5787_v3 = vpop.f32.mrb[18].mxu1 }
 0xc4f   : > { %v4051_v4 = vadd.f32 %v5787_v3, %v5495_v60  ;;  %v4045_v5 = vpop.f32.mrb[19].mxu1 }
 0xc50   : > { %v4046_v55 = vadd.f32 %v5495_v60, %v4045_v5 }
 0xc51   : > { %6028 = vtanh.f32 %v4051_v4 }
 0xc52   : > { %6030 = vtanh.f32 %v4046_v55 }
 0xc54   : > { %v6025_v56 = vpop.eup %6024 }
 0xc55   : > { %v6027_v7 = vpop.eup %6026  ;;  %v4066_v8 = vmul.f32 %v6025_v56, %v5500_v6 }
 0xc56   : > { %v4065_v9 = vmul.f32 %v6027_v7, %v5500_v6 }
 0xc57   : > { %v4072_v10 = vsel %vm2480_vm2, %v4066_v8, 0.0 }
 0xc58   : > { %4073 = vadd.xlane.f32.xlu0 %v4072_v10  ;;  %v4069_v11 = vsel %vm2480_vm2, %v4065_v9, 0.0 }
 0xc59   : > { %4070 = vadd.xlane.f32.xlu1 %v4069_v11 }
 0xc5b   : > { %v6029_v12 = vpop.eup %6028 }
 0xc5c   : > { %v6031_v13 = vpop.eup %6030  ;;  %v4068_v14 = vmul.f32 %v6029_v12, %v5500_v6  ;;  %v2374_v12 = vld [vmem:[%s6871_s10] sm:$0x3] }
 0xc5d   : > { %v4067_v15 = vmul.f32 %v6031_v13, %v5500_v6  ;;  %v5507_v6 = vld [vmem:[%s6870_s7] ss:$0 sm:$0xff]  ;;  %v4466_v13 = vsel %vm4455_vm7, %v2374_v12, 0.0 }
 0xc5e   : > { %v4078_v17 = vsel %vm2480_vm2, %v4068_v14, 0.0 }
 0xc5f   : > { %4079 = vadd.xlane.f32.xlu0 %v4078_v17  ;;  %v4075_v19 = vsel %vm2480_vm2, %v4067_v15, 0.0  ;;  %v4502_v15 = vsel %vm4455_vm7, %v6687_v27, 0.0 }
 0xc60   : > { %4076 = vadd.xlane.f32.xlu1 %v4075_v19 }
 0xce5   : > { %v4074_v21 = vpop.xlane.xlu0 %4073 }
 0xce6   : > { %v4089_v22 = vadd.f32 %v5501_v20, %v4074_v21  ;;  %v4071_v23 = vpop.xlane.xlu1 %4070 }
 0xce7   : > { %v4088_v24 = vadd.f32 %v5501_v20, %v4071_v23 }
 0xce8   : > { %4099 = vperm.xlu0 %5975, %v4089_v22  }
 0xce9   : > { %4094 = vperm.xlu1 %5974, %v4088_v24  }
 0xcec   : > { %v4080_v30 = vpop.xlane.xlu0 %4079 }
 0xced   : > { %v4077_v25 = vpop.xlane.xlu1 %4076  ;;  %v4091_v32 = vadd.f32 %v5501_v20, %v4080_v30 }
 0xcee   : > { %v4090_v26 = vadd.f32 %v5501_v20, %v4077_v25  ;;  %v6044_v25 = vld [vmem:[%s6441_s23] sm:$0x3]  ;;  %s2359_s23 = scalar_lea.vmem %s6408_s25, %s6875_s16 }
 0xcf0   : > { %4104 = vperm.xlu1 %5974, %v4090_v26  }
 0xcf4   : > { %4109 = vperm.xlu1 %5974, %v4091_v32  }
 0xd07   : > { %2641 = vmax.xlane.f32.xlu0 %v2640_v33 }
 0xd67   : > { %v4100_v34 = vpop.permute.xlu0 %4099 }
 0xd68   : > { %v4113_v35 = vmul.f32 %v4100_v34, %v6550_v16  ;;  %v4095_v36 = vpop.permute.xlu1 %4094 }
 0xd69   : > { %v4112_v37 = vmul.f32 %v4095_v36, %v6553_v18 }
 0xd6b   : > { %v5896_v38 = vpack.c.bf16 %v4113_v35, %v4112_v37 }
 0xd6d   : > { %5897 = vmatpush3.bf16.msra.mxu0 %v5896_v38  ;;  %v4487_v38 = vsel %vm4455_vm7, %v6668_v63, 0.0 }
 0xd6e   : > { %5898 = vmatprep.subr.bf16.mxu0 %v6111_v0 }
 0xd6f   : > { %v4105_v39 = vpop.permute.xlu1 %4104 }
 0xd70   : > { %v4114_v42 = vmul.f32 %v4105_v39, %v6567_v29 }
 0xd73   : > { %v4110_v40 = vpop.permute.xlu1 %4109 }
 0xd74   : > { %v4115_v45 = vmul.f32 %v4110_v40, %v6561_v28 }
 0xd76   : > { %v5899_v48 = vpack.c.bf16 %v4115_v45, %v4114_v42 }
 0xd78   : > { %5900 = vmatpush3.bf16.msra.mxu0 %v5899_v48 }
 0xd79   : > { %5901 = vmatprep.subr.bf16.mxu0 %v6111_v0 }
 0xd7b   : > { %5797 = vmatmul.mubr.msk.f32.vlgmr.msra.gmra.mrb[22].mxu0 %vm2480_vm2, %v6574_v41  ;;  %v4270_v41 = vld [vmem:[%s6864_s2] sm:$0xff]  ;;  %s6873_s2 = sld [smem:[#allocation7_spill]] }
 0xd7c   : > { %5903 = vmatpush3.bf16.msra.mxu0 %v5902_v49  ;;  %5803 = vmatprep.mubr.msk.f32.mxu0 %vm6112_vm0, %v6113_v1 }
 0xd7d   : > { %5811 = vmatprep.subr.mxu0 %v6113_v1  ;;  %5807 = vmatpush3.msra.mxu1 %v4270_v41 }
 0xd7f   : > { %5804 = vmatmul.mubr.msk.f32.vlgmr.msra.gmra.mrb[24].mxu0 %vm2394_vm1, %v6652_v57 }
 0xd80   : > { %5813 = vmatprep.mubr.msk.f32.mxu0 %vm6112_vm0, %v6113_v1  ;;  %5812 = vmatpush3.msk.msra.mxu0 %vm4366_vm12, %v4354_v61  ;;  %vm4556_vm0 = vcmask 0  }
 0xd94   : > { %v2642_v0 = vpop.xlane.xlu0 %2641 }
 0xd95   : > { %v2643_v16 = vsub.f32 %v6472_v31, %v2642_v0 }
 0xd97   : > { %v2644_v18 = vmul.f32 1.442695, %v2643_v16 }
 0xd99   : > { %6032 = vpow2.f32 %v2644_v18 }
 0xda3   : > { %v6033_v28 = vpop.eup %6032 }
 0xda4   : > { %v2646_v29 = vsel %vm2639_vm3, %v6033_v28, 0.0 }
 0xda5   : > { %2647 = vadd.xlane.f32.xlu0 %v2646_v29 }
 0xe32   : > { %v2648_v50 = vpop.xlane.xlu0 %2647 }
 0xe33   : > { %6034 = vrcp.f32 %v2648_v50 }
 0xe34   : > { %6036 = vlog2.f32 %v2648_v50 }
 0xe3d   : > { %v6035_v57 = vpop.eup %6034 }
 0xe3e   : > { %v2650_v1 = vmul.f32 %v6035_v57, %v6033_v28  ;;  %v6037_v55 = vpop.eup %6036 }
 0xe3f   : > { %v4517_v56 = vmul.f32 0.6931472, %v6037_v55 }
 0xe40   : > { %4549 = vst.msk [vmem:[%s2326_s26] sm:$0x3] %vm2639_vm3, %v2650_v1 }
 0xe41   : > { %v4518_v11 = vadd.f32 %v4517_v56, %v2642_v0 }
 0xe43   : > { %v4519_v14 = vsub.f32 %v6472_v31, %v4518_v11 }
 0xe45   : > { %v4520_v17 = vmul.f32 %v4519_v14, %v2650_v1 }
 0xe47   : > { %v4521_v19 = vsel %vm2639_vm3, %v4520_v17, 0.0 }
 0xe4e   : > { %v4182_v51 = vpop.f32.mrb[22].mxu0 }
 0xe4f   : > { %4554 = vst.msk [vmem:[%s2346_s6] sm:$0x3] %vm4455_vm7, %v4182_v51  ;;  %v5798_v52 = vpop.f32.mrb[23].mxu0  ;;  %v4452_v26 = vsub.f32 %v6044_v25, %v4182_v51 }
 0xe51   : > { %v4453_v33 = vmul.f32 %v4452_v26, %v4452_v26 }
 0xe52   : > { %v4263_v43 = vpop.f32.mrb[24].mxu0 }
 0xe53   : > { %v4264_v44 = vadd.f32 %v5503_v53, %v4263_v43  ;;  %v5805_v58 = vpop.f32.mrb[25].mxu0  ;;  %v4454_v39 = vmul.f32 %v4453_v33, %v2374_v12 }
 0xe55   : > { %vm4267_vm11 = vcmp.ge.f32.partialorder %v4264_v44, 0.0  ;;  %v4268_v59 = vmul.f32 0.2, %v4264_v44  ;;  %v4456_v45 = vsel %vm4455_vm7, %v4454_v39, 0.0 }
 0xe57   : > { %v4269_v60 = vsel %vm4267_vm11, %v4264_v44, %v4268_v59  ;;  %v2375_v59 = vld [vmem:[%s6873_s2] sm:$0x3] }
 0xe58   : > { %5809 = vmatmul.mubr.msk.f32.vlgmr.msra.gmra.mrb[20].mxu1 %vm2671_vm4, %v4269_v60 }
 0xf2b   : > { %v4347_v54 = vpop.f32.mrb[20].mxu1 }
 0xf2c   : > { %v4348_v2 = vadd.f32 %v5505_v62, %v4347_v54  ;;  %v5810_v3 = vpop.f32.mrb[21].mxu1 }
 0xf2e   : > { %vm4351_vm13 = vcmp.ge.f32.partialorder %v4348_v2, 0.0  ;;  %v4352_v4 = vmul.f32 0.2, %v4348_v2 }
 0xf30   : > { %v4353_v5 = vsel %vm4351_vm13, %v4348_v2, %v4352_v4 }
 0xf31   : > { %5814 = vmatmul.mubr.msk.f32.vlgmr.msra.gmra.mrb[26].mxu0 %vm4362_vm14, %v4353_v5 }
0x1004   : > { %v4436_v7 = vpop.f32.mrb[26].mxu0 }
0x1005   : > { %v4437_v8 = vadd.f32 %v5507_v6, %v4436_v7  ;;  %v5815_v9 = vpop.f32.mrb[27].mxu0 }
0x1007   : > { %v4441_v10 = vsel %vm4440_vm15, %v4437_v8, -inf }
0x1008   : > { %4442 = vmax.xlane.f32.xlu1 %v4441_v10 }
0x100c   : > { %4467 = vadd.xlane.f32.xlu1 %v4466_v13 }
0x1010   : > { %4503 = vadd.xlane.f32.xlu1 %v4502_v15 }
0x1014   : > { %4522 = vadd.xlane.f32.xlu1 %v4521_v19 }
0x1095   : > { %v4443_v20 = vpop.xlane.xlu1 %4442 }
0x1096   : > { %v4444_v21 = vsub.f32 %v4437_v8, %v4443_v20 }
0x1098   : > { %v4445_v22 = vmul.f32 1.442695, %v4444_v21 }
0x1099   : > { %v4468_v23 = vpop.xlane.xlu1 %4467 }
0x109a   : > { %6038 = vpow2.f32 %v4445_v22  ;;  %v4469_v47 = vsel %vm2789_vm6, %v4468_v23, 0.0 }
0x109b   : > { %v4470_v48 = vrot.slane %v4469_v47, 4 }
0x109d   : > { %v4504_v24 = vpop.xlane.xlu1 %4503  ;;  %v4471_v49 = vadd.f32 %v4470_v48, %v4469_v47 }
0x109e   : > { %v4505_v28 = vmul.f32 0.0625, %v4504_v24 }
0x109f   : > { %v4472_v0 = vrot.slane %v4471_v49, 2 }
0x10a0   : > { %v4506_v57 = vmul.f32 -0.5, %v4505_v28 }
0x10a1   : > { %v4523_v30 = vpop.xlane.xlu1 %4522  ;;  %v4473_v16 = vadd.f32 %v4472_v0, %v4471_v49 }
0x10a2   : > { %v4524_v31 = vsel %vm2789_vm6, %v4523_v30, 0.0 }
0x10a3   : > { %v4525_v32 = vrot.slane %v4524_v31, 4  ;;  %v4474_v63 = vrot.slane %v4473_v16, 1 }
0x10a4   : > { %v6039_v27 = vpop.eup %6038 }
0x10a5   : > { %v4526_v34 = vadd.f32 %v4525_v32, %v4524_v31  ;;  %v4447_v35 = vsel %vm4440_vm15, %v6039_v27, 0.0  ;;  %v4475_v41 = vadd.f32 %v4474_v63, %v4473_v16 }
0x10a6   : > { %4448 = vadd.xlane.f32.xlu0 %v4447_v35 }
0x10a7   : > { %v4527_v36 = vrot.slane %v4526_v34, 2 }
0x10a9   : > { %v4528_v37 = vadd.f32 %v4527_v36, %v4526_v34 }
0x10aa   : > { %4488 = vadd.xlane.f32.xlu0 %v4487_v38 }
0x10ab   : > { %v4529_v40 = vrot.slane %v4528_v37, 1 }
0x10ad   : > { %v4530_v42 = vadd.f32 %v4529_v40, %v4528_v37 }
0x10ae   : > { %4457 = vadd.xlane.f32.xlu0 %v4456_v45 }
0x10af   : > { %v4531_v46 = vmul.f32 0.5, %v4530_v42 }
0x10b1   : > { %4559 = vst.msk [vmem:[%s2359_s23] sm:$0x1] %vm4556_vm0, %v4531_v46 }
0x1133   : > { %v4449_v18 = vpop.xlane.xlu0 %4448 }
0x1134   : > { %6040 = vrcp.f32 %v4449_v18 }
0x1135   : > { %6042 = vrcp.f32 %v4475_v41 }
0x1137   : > { %v4489_v29 = vpop.xlane.xlu0 %4488 }
0x1138   : > { %v4491_v50 = vmul.f32 0.0625, %v4489_v29 }
0x113a   : > { %v4492_v1 = vmul.f32 -0.5, %v4491_v50 }
0x113b   : > { %v4458_v51 = vpop.xlane.xlu0 %4457 }
0x113c   : > { %v4507_v52 = vsub.f32 %v4492_v1, %v4506_v57  ;;  %v4459_v53 = vsel %vm2789_vm6, %v4458_v51, 0.0 }
0x113d   : > { %v4460_v43 = vrot.slane %v4459_v53, 4 }
0x113e   : > { %v6041_v44 = vpop.eup %6040  ;;  %v4508_v58 = vsel %vm2789_vm6, %v4507_v52, 0.0 }
0x113f   : > { %v4509_v60 = vrot.slane %v4508_v58, 4  ;;  %v4461_v61 = vadd.f32 %v4460_v43, %v4459_v53  ;;  %v4451_v62 = vmul.f32 %v6041_v44, %v6039_v27  ;;  %v6043_v8 = vpop.eup %6042 }
0x1141   : > { %v4510_v54 = vadd.f32 %v4509_v60, %v4508_v58  ;;  %v4462_v2 = vrot.slane %v4461_v61, 2  ;;  %v4532_v3 = vsub.f32 %v4451_v62, %v2375_v59  ;;  %4555 = vst.msk [vmem:[%s2350_s28] sm:$0x3] %vm4440_vm15, %v4451_v62 }
0x1143   : > { %v4511_v4 = vrot.slane %v4510_v54, 2  ;;  %v4463_v5 = vadd.f32 %v4462_v2, %v4461_v61  ;;  %v4533_v55 = vand.u32 2147483647, %v4532_v3 }
0x1145   : > { %v4512_v6 = vadd.f32 %v4511_v4, %v4510_v54  ;;  %v4464_v56 = vrot.slane %v4463_v5, 1  ;;  %v4534_v7 = vsel %vm4440_vm15, %v4533_v55, 0.0 }
0x1146   : > { %4535 = vadd.xlane.f32.xlu0 %v4534_v7 }
0x1147   : > { %v4513_v9 = vrot.slane %v4512_v6, 1  ;;  %v4465_v10 = vadd.f32 %v4464_v56, %v4463_v5 }
0x1149   : > { %v4514_v11 = vadd.f32 %v4513_v9, %v4512_v6  ;;  %v4477_v12 = vmul.f32 %v6043_v8, %v4465_v10 }
0x114b   : > { %v4515_v13 = vmul.f32 0.5, %v4514_v11  ;;  %4557 = vst.msk [vmem:[%s2353_s18] sm:$0x1] %vm4556_vm0, %v4477_v12 }
0x114d   : > { %4558 = vst.msk [vmem:[%s2356_s0] sm:$0x1] %vm4556_vm0, %v4515_v13 }
0x11d3   : > { %v4536_v14 = vpop.xlane.xlu0 %4535 }
0x11d4   : > { %v4537_v15 = vsel %vm2789_vm6, %v4536_v14, 0.0 }
0x11d5   : > { %v4538_v17 = vrot.slane %v4537_v15, 4 }
0x11d7   : > { %v4539_v19 = vadd.f32 %v4538_v17, %v4537_v15 }
0x11d9   : > { %v4540_v20 = vrot.slane %v4539_v19, 2 }
0x11db   : > { %v4541_v21 = vadd.f32 %v4540_v20, %v4539_v19 }
0x11dd   : > { %v4542_v22 = vrot.slane %v4541_v21, 1 }
0x11df   : > { %v4543_v23 = vadd.f32 %v4542_v22, %v4541_v21 }
0x11e1   : > { %v4544_v24 = vmul.f32 0.125, %v4543_v23 }
0x11e3   : > { %4560 = vst.msk [vmem:[%s2362_s1] sm:$0x1] %vm4556_vm0, %v4544_v24 }
0x11e4 PF: > { %s128_s15 = sadd.s32 1, %s6051_s15  }
0x11e5   : > { %p125_p4 = scmp.ge.s32.totalorder %s128_s15, 4  }
0x11e7   :  { %127 = sbr.rel (!%p125_p4) target bundleno = 111 (0x6f), region = 548 }

</bundles_post_ra>
